<compile_context>
chip_gen: v5e
topology: v5e:2x2
jax: 0.10.0
libtpu: 0.0.40
codegen_flags: <defaults>
</compile_context>

<pallas_src>
import functools

import jax
import jax.numpy as jnp
from jax import lax
from jax.experimental import pallas as pl
from jax.experimental.pallas import tpu as pltpu


# ------------------------------ Pallas kernel -------------------------------

def _fused_bilstm_head_kernel(x2d_ref, wih_ref, whh_ref, bcat_ref, w1_ref,
                              b1_ref, gamma_ref, beta_ref, wd_ref, bd_ref,
                              y_ref, f_ref, xp_ref, hbuf_ref, *, n_valid):
    """Fused bi-LSTM recurrence + ReLU/flatten/test1 + BN + ReLU + decoder.

    x2d_ref:   (T*Bp, 2F) bf16  row (s*Bp+b) = [x[b, s, :] | x[b, T-1-s, :]]
    wih_ref:   (2F, 8H)  bf16   input weights, cols [i|f|o|g], each [fwd|bwd],
                                sigmoid cols pre-scaled by 0.5
    whh_ref:   (2H, 8H)  bf16   recurrent weights, same column layout/scaling
    bcat_ref:  (1, 8H)   f32    merged bias (b_ih+b_hh), same layout/scaling
    w1_ref:    (T*2H, BDp) bf16 test1 weight, fused-step row order, lane-padded
    b1/gamma/beta: (1, BDp) f32
    wd_ref:    (BDp, Cp) bf16   decoder weight (pre-transposed, lane-padded)
    bd_ref:    (1, Cp)   f32
    y_ref:     (Bp, Cp)  f32    padded logits out
    f_ref:     (Bp, BDp) f32    padded bottleneck features out
    xp_ref:    (T*Bp, 8H) f32   scratch: hoisted input projection
    hbuf_ref:  (T*Bp, 2H) f32   scratch: relu(h) per fused step
    """
    Bp = y_ref.shape[0]
    TB = x2d_ref.shape[0]
    T = TB // Bp
    H2, G = whh_ref.shape          # (2H, 8H)
    H = G // 8
    BDp = b1_ref.shape[1]

    # --- hoisted input projection: ONE MXU matmul, off the recurrent chain.
    xp_ref[...] = (jnp.dot(x2d_ref[...], wih_ref[...],
                           preferred_element_type=jnp.float32)
                   + bcat_ref[...])

    w_hh = whh_ref[...]            # (2H, 8H) bf16, held across the loop

    # sigmoid(z) = 0.5*tanh(0.5*z) + 0.5 ; the 0.5 pre-scale is baked into the
    # packed i/f/o weight columns, so one full-width tanh + one FMA activates
    # every gate (no select, no misaligned activation slice, no divide).
    col = lax.broadcasted_iota(jnp.int32, (1, G), 1)
    is_sig = col < 6 * H
    post_scale = jnp.broadcast_to(jnp.where(is_sig, 0.5, 1.0), (Bp, G))
    post_shift = jnp.broadcast_to(jnp.where(is_sig, 0.5, 0.0), (Bp, G))

    h_cat = jnp.zeros((Bp, H2), jnp.float32)    # [h_fwd | h_bwd]
    c_cat = jnp.zeros((Bp, H2), jnp.float32)

    # Fully-unrolled fused recurrence: step s runs forward time s and backward
    # time T-1-s. All ref indices are static.
    for s in range(T):
        gates = xp_ref[pl.ds(s * Bp, Bp), :] + jnp.dot(
            h_cat.astype(jnp.bfloat16), w_hh,
            preferred_element_type=jnp.float32)
        act = jnp.tanh(gates) * post_scale + post_shift   # cols [i | f | o | g]
        i_cat = act[:, 0:H2]                              # lane offset 0
        o_cat = act[:, 2 * H2:3 * H2]                     # lane offset 128
        # One lane rotate realigns the two misaligned quarters (f, g) to
        # 128-aligned offsets (roll by 6H == roll by -2H mod 8H).
        act_r = pltpu.roll(act, shift=6 * H, axis=1)
        f_cat = act_r[:, 0:H2]                            # was cols 2H:4H
        g_cat = act_r[:, 2 * H2:3 * H2]                   # was cols 6H:8H
        c_cat = f_cat * c_cat + i_cat * g_cat
        h_cat = o_cat * jnp.tanh(c_cat)
        # F.relu(lstm_out), stored off the critical path for the post-loop
        # test1 contraction.
        hbuf_ref[pl.ds(s * Bp, Bp), :] = jnp.maximum(h_cat, 0.0)

    # --- test1 (flatten @ W1^T) out of the recurrence: T dependence-free
    # matmuls that pipeline freely through the MXU.
    f1 = jnp.broadcast_to(b1_ref[...], (Bp, BDp))
    for s in range(T):
        hr = hbuf_ref[pl.ds(s * Bp, Bp), :].astype(jnp.bfloat16)
        f1 = f1 + jnp.dot(hr, w1_ref[pl.ds(s * H2, H2), :],
                          preferred_element_type=jnp.float32)

    # BatchNorm1d, training-mode batch statistics over the REAL rows only
    # (biased variance, eps=1e-5).
    fr = f1[0:n_valid, :]
    mean = jnp.mean(fr, axis=0, keepdims=True)
    var = jnp.mean(jnp.square(fr - mean), axis=0, keepdims=True)
    f2 = (f1 - mean) * lax.rsqrt(var + 1e-5) * gamma_ref[...] + beta_ref[...]
    fout = jnp.maximum(f2, 0.0)
    f_ref[...] = fout
    y_ref[...] = (jnp.dot(fout.astype(jnp.bfloat16), wd_ref[...],
                          preferred_element_type=jnp.float32) + bd_ref[...])


# -------------------------------- wrapper ------------------------------------

_VMEM = pl.BlockSpec(memory_space=pltpu.MemorySpace.VMEM)


def lstm_forward(x, kp, *, num_classes, bottleneck_dim):
    """x: (B, T, F) float32. Returns (y_s, f) like the PyTorch module."""
    B, T, F = x.shape
    Bp = ((B + 7) // 8) * 8            # f32 sublane floor
    G = kp["w_ih"].shape[1]            # 8H
    H2 = kp["w_hh"].shape[0]           # 2H
    BDp = kp["b1"].shape[1]
    Cp = kp["bd"].shape[1]

    # Tiny glue ops: pad batch, build per-step [x_s | x_{T-1-s}] rows,
    # time-major 2D layout for the hoisted in-kernel projection matmul.
    xpad = jnp.zeros((Bp, T, F), x.dtype).at[:B].set(x)
    xpair = jnp.concatenate([xpad, xpad[:, ::-1, :]], axis=-1)   # (Bp, T, 2F)
    x2d = jnp.transpose(xpair, (1, 0, 2)).reshape(T * Bp, 2 * F)
    x2d = x2d.astype(jnp.bfloat16)

    kernel = functools.partial(_fused_bilstm_head_kernel, n_valid=B)
    y_p, f_p = pl.pallas_call(
        kernel,
        out_shape=(jax.ShapeDtypeStruct((Bp, Cp), jnp.float32),
                   jax.ShapeDtypeStruct((Bp, BDp), jnp.float32)),
        in_specs=[_VMEM] * 10,
        out_specs=(_VMEM, _VMEM),
        scratch_shapes=[pltpu.VMEM((T * Bp, G), jnp.float32),
                        pltpu.VMEM((T * Bp, H2), jnp.float32)],
    )(x2d, kp["w_ih"], kp["w_hh"], kp["b_cat"], kp["w1"], kp["b1"],
      kp["gamma"], kp["beta"], kp["wd"], kp["bd"])

    return y_p[:B, :num_classes], f_p[:B, :bottleneck_dim]


# -------------------------- params (PyTorch layout) --------------------------

def init_torch_params(key, input_feature_size, hidden_size, seq_len,
                      bottleneck_dim, num_classes):
    F, H, T = input_feature_size, hidden_size, seq_len
    ks = jax.random.split(key, 12)

    def u(k, shape, bound):
        return jax.random.uniform(k, shape, jnp.float32, -bound, bound)

    s_lstm = 1.0 / float(H) ** 0.5
    s_t1 = 1.0 / float(2 * H * T) ** 0.5
    s_dec = 1.0 / float(bottleneck_dim) ** 0.5
    return {
        # nn.LSTM params, PyTorch layout; gate row order (i, f, g, o).
        "w_ih_f": u(ks[0], (4 * H, F), s_lstm),
        "w_hh_f": u(ks[1], (4 * H, H), s_lstm),
        "b_ih_f": u(ks[2], (4 * H,), s_lstm),
        "b_hh_f": u(ks[3], (4 * H,), s_lstm),
        "w_ih_b": u(ks[4], (4 * H, F), s_lstm),
        "w_hh_b": u(ks[5], (4 * H, H), s_lstm),
        "b_ih_b": u(ks[6], (4 * H,), s_lstm),
        "b_hh_b": u(ks[7], (4 * H,), s_lstm),
        # test1: Linear(2H*T -> bottleneck)
        "w1": u(ks[8], (bottleneck_dim, 2 * H * T), s_t1),
        "b1": u(ks[9], (bottleneck_dim,), s_t1),
        # test2: BatchNorm1d default init
        "gamma": jnp.ones((bottleneck_dim,), jnp.float32),
        "beta": jnp.zeros((bottleneck_dim,), jnp.float32),
        # decoder: Linear(bottleneck -> num_classes)
        "wd": u(ks[10], (num_classes, bottleneck_dim), s_dec),
        "bd": u(ks[11], (num_classes,), s_dec),
    }


def pack_params(tp, input_feature_size, hidden_size, seq_len, bottleneck_dim,
                num_classes, lane=128):
    """Repack PyTorch-layout params into the fused-kernel layout."""
    F, H, T = input_feature_size, hidden_size, seq_len
    BD, C = bottleneck_dim, num_classes
    H2, G = 2 * H, 8 * H
    BDp = ((BD + lane - 1) // lane) * lane
    Cp = ((C + lane - 1) // lane) * lane

    # Column H-blocks of the fused gate matmul: [i | f | o | g], each [fwd|bwd].
    order = [("i", "f"), ("i", "b"), ("f", "f"), ("f", "b"),
             ("o", "f"), ("o", "b"), ("g", "f"), ("g", "b")]
    gidx = {"i": 0, "f": 1, "g": 2, "o": 3}   # PyTorch gate row order

    w_ih = jnp.zeros((2 * F, G), jnp.float32)
    w_hh = jnp.zeros((H2, G), jnp.float32)
    b_cat = jnp.zeros((G,), jnp.float32)
    for blk, (gate, d) in enumerate(order):
        gi = gidx[gate]
        # Bake the 0.5 sigmoid pre-scale (exact power of 2) into i/f/o columns.
        scale = 1.0 if gate == "g" else 0.5
        wih = tp[f"w_ih_{d}"][gi * H:(gi + 1) * H, :] * scale          # (H, F)
        whh = tp[f"w_hh_{d}"][gi * H:(gi + 1) * H, :] * scale          # (H, H)
        bias = (tp[f"b_ih_{d}"] + tp[f"b_hh_{d}"])[gi * H:(gi + 1) * H] * scale
        xr0 = 0 if d == "f" else F
        hr0 = 0 if d == "f" else H
        c0, c1 = blk * H, (blk + 1) * H
        w_ih = w_ih.at[xr0:xr0 + F, c0:c1].set(wih.T)
        w_hh = w_hh.at[hr0:hr0 + H, c0:c1].set(whh.T)
        b_cat = b_cat.at[c0:c1].set(bias)

    # test1 weight -> (T*2H, BDp): row block s = [fwd rows for time s ;
    # bwd rows for time T-1-s], matching the fused-step h layout; lane-padded.
    w1t = tp["w1"].T                                                   # (2H*T, BD)
    slabs = []
    for s in range(T):
        fwd_rows = w1t[s * H2: s * H2 + H, :]
        tb = T - 1 - s
        bwd_rows = w1t[tb * H2 + H: tb * H2 + 2 * H, :]
        slabs.append(jnp.concatenate([fwd_rows, bwd_rows], axis=0))
    w1k = jnp.concatenate(slabs, axis=0)                               # (T*2H, BD)
    w1p = jnp.zeros((T * H2, BDp), jnp.float32).at[:, :BD].set(w1k)

    def pad_row(v, n):
        return jnp.zeros((1, n), jnp.float32).at[0, :v.shape[0]].set(v)

    wdp = jnp.zeros((BDp, Cp), jnp.float32).at[:BD, :C].set(tp["wd"].T)

    return {
        "w_ih": w_ih.astype(jnp.bfloat16),           # (2F, 8H)
        "w_hh": w_hh.astype(jnp.bfloat16),           # (2H, 8H)
        "b_cat": b_cat.reshape(1, G),                # (1, 8H)
        "w1": w1p.astype(jnp.bfloat16),              # (T*2H, BDp)
        "b1": pad_row(tp["b1"], BDp),
        "gamma": pad_row(tp["gamma"], BDp),
        "beta": pad_row(tp["beta"], BDp),
        "wd": wdp.astype(jnp.bfloat16),              # (BDp, Cp)
        "bd": pad_row(tp["bd"], Cp),
    }


# ---------------------------------- main -------------------------------------

if __name__ == "__main__":
    # Shapes implied by the module: seq_len = 23 (from test1's in_features),
    # bidirectional single-layer LSTM.
    B = 4
    T = 23
    INPUT_FEATURES = 8
    HIDDEN = 32
    BOTTLENECK = 64
    NUM_CLASSES = 5

    key = jax.random.PRNGKey(0)
    kx, kp = jax.random.split(key)
    x = jax.random.normal(kx, (B, T, INPUT_FEATURES), jnp.float32)
    torch_params = init_torch_params(kp, INPUT_FEATURES, HIDDEN, T,
                                     BOTTLENECK, NUM_CLASSES)
    kparams = pack_params(torch_params, INPUT_FEATURES, HIDDEN, T,
                          BOTTLENECK, NUM_CLASSES)

    fwd = jax.jit(functools.partial(lstm_forward, num_classes=NUM_CLASSES,
                                    bottleneck_dim=BOTTLENECK))
    y_s, f = fwd(x, kparams)
    jax.block_until_ready((y_s, f))

    assert y_s.shape == (B, NUM_CLASSES), y_s.shape
    assert f.shape == (B, BOTTLENECK), f.shape
    assert bool(jnp.all(jnp.isfinite(y_s))) and bool(jnp.all(jnp.isfinite(f)))
    print("KERNEL_OK")
</pallas_src>

<mosaic_0001>
module attributes {stable_mosaic.version = 11 : i64} {
  func.func @_fused_bilstm_head_kernel(%arg0: memref<184x16xbf16, #tpu.memory_space<vmem>>, %arg1: memref<16x256xbf16, #tpu.memory_space<vmem>>, %arg2: memref<64x256xbf16, #tpu.memory_space<vmem>>, %arg3: memref<1x256xf32, #tpu.memory_space<vmem>>, %arg4: memref<1472x128xbf16, #tpu.memory_space<vmem>>, %arg5: memref<1x128xf32, #tpu.memory_space<vmem>>, %arg6: memref<1x128xf32, #tpu.memory_space<vmem>>, %arg7: memref<1x128xf32, #tpu.memory_space<vmem>>, %arg8: memref<128x128xbf16, #tpu.memory_space<vmem>>, %arg9: memref<1x128xf32, #tpu.memory_space<vmem>>, %arg10: memref<8x128xf32, #tpu.memory_space<vmem>>, %arg11: memref<8x128xf32, #tpu.memory_space<vmem>>, %arg12: memref<184x256xf32, #tpu.memory_space<vmem>>, %arg13: memref<184x64xf32, #tpu.memory_space<vmem>>) attributes {dimension_semantics = [], scalar_prefetch = 0 : i64, scratch_operands = 2 : i64, tpu.core_type = #tpu.core_type<tc>} {
    %c0 = arith.constant 0 : index
    %c0_0 = arith.constant 0 : index
    %0 = vector.load %arg0[%c0, %c0_0] : memref<184x16xbf16, #tpu.memory_space<vmem>>, vector<184x16xbf16>
    %c0_1 = arith.constant 0 : index
    %c0_2 = arith.constant 0 : index
    %1 = vector.load %arg1[%c0_1, %c0_2] : memref<16x256xbf16, #tpu.memory_space<vmem>>, vector<16x256xbf16>
    %cst = arith.constant dense<0.000000e+00> : vector<184x256xf32>
    %2 = tpu.matmul %0, %1, %cst {dimension_numbers = #tpu.dot_dimension_numbers<[1], [0], [0], [1], [0, 0, 1, 1], [], []>} : vector<184x16xbf16>, vector<16x256xbf16>, vector<184x256xf32> -> vector<184x256xf32>
    %c0_3 = arith.constant 0 : index
    %c0_4 = arith.constant 0 : index
    %3 = vector.load %arg3[%c0_3, %c0_4] : memref<1x256xf32, #tpu.memory_space<vmem>>, vector<1x256xf32>
    %4 = vector.broadcast %3 : vector<1x256xf32> to vector<184x256xf32>
    %5 = arith.addf %2, %4 : vector<184x256xf32>
    %c0_5 = arith.constant 0 : index
    %c0_6 = arith.constant 0 : index
    %6 = vector.load %arg12[%c0_5, %c0_6] : memref<184x256xf32, #tpu.memory_space<vmem>>, vector<184x256xf32>
    tpu.vector_store %arg12[%c0_5, %c0_6], %5 {strides = array<i32>} : memref<184x256xf32, #tpu.memory_space<vmem>>, vector<184x256xf32>,
    %c0_7 = arith.constant 0 : index
    %c0_8 = arith.constant 0 : index
    %7 = vector.load %arg2[%c0_7, %c0_8] : memref<64x256xbf16, #tpu.memory_space<vmem>>, vector<64x256xbf16>
    %8 = tpu.iota {dimensions = array<i32: 1>} : vector<1x256xi32>
    %c192_i32 = arith.constant 192 : i32
    %9 = vector.broadcast %c192_i32 : i32 to vector<1x256xi32>
    %10 = arith.cmpi slt, %8, %9 : vector<1x256xi32>
    %cst_9 = arith.constant 5.000000e-01 : f32
    %cst_10 = arith.constant 1.000000e+00 : f32
    %11 = vector.broadcast %cst_9 : f32 to vector<1x256xf32>
    %12 = vector.broadcast %cst_10 : f32 to vector<1x256xf32>
    %13 = arith.select %10, %11, %12 : vector<1x256xi1>, vector<1x256xf32>
    %14 = vector.shape_cast %13 : vector<1x256xf32> to vector<1x256xf32>
    %15 = vector.broadcast %14 : vector<1x256xf32> to vector<8x256xf32>
    %cst_11 = arith.constant 5.000000e-01 : f32
    %cst_12 = arith.constant 0.000000e+00 : f32
    %16 = vector.broadcast %cst_11 : f32 to vector<1x256xf32>
    %17 = vector.broadcast %cst_12 : f32 to vector<1x256xf32>
    %18 = arith.select %10, %16, %17 : vector<1x256xi1>, vector<1x256xf32>
    %19 = vector.shape_cast %18 : vector<1x256xf32> to vector<1x256xf32>
    %20 = vector.broadcast %19 : vector<1x256xf32> to vector<8x256xf32>
    %cst_13 = arith.constant 0.000000e+00 : f32
    %21 = vector.broadcast %cst_13 : f32 to vector<8x64xf32>
    %cst_14 = arith.constant 0.000000e+00 : f32
    %22 = vector.broadcast %cst_14 : f32 to vector<8x64xf32>
    %c0_15 = arith.constant 0 : index
    %c0_16 = arith.constant 0 : index
    %23 = vector.load %arg12[%c0_15, %c0_16] : memref<184x256xf32, #tpu.memory_space<vmem>>, vector<8x256xf32>
    %24 = arith.truncf %21 : vector<8x64xf32> to vector<8x64xbf16>
    %cst_17 = arith.constant dense<0.000000e+00> : vector<8x256xf32>
    %25 = tpu.matmul %24, %7, %cst_17 {dimension_numbers = #tpu.dot_dimension_numbers<[1], [0], [0], [1], [0, 0, 1, 1], [], []>} : vector<8x64xbf16>, vector<64x256xbf16>, vector<8x256xf32> -> vector<8x256xf32>
    %26 = arith.addf %23, %25 : vector<8x256xf32>
    %27 = math.tanh %26 : vector<8x256xf32>
    %28 = arith.mulf %27, %15 : vector<8x256xf32>
    %29 = arith.addf %28, %20 : vector<8x256xf32>
    %30 = vector.extract_strided_slice %29 {offsets = [0, 0], sizes = [8, 64], strides = [1, 1]} : vector<8x256xf32> to vector<8x64xf32>
    %31 = vector.extract_strided_slice %29 {offsets = [0, 128], sizes = [8, 64], strides = [1, 1]} : vector<8x256xf32> to vector<8x64xf32>
    %c192_i32_18 = arith.constant 192 : i32
    %32 = tpu.dynamic_rotate %29 by %c192_i32_18 dim 1 : vector<8x256xf32>, i32 -> vector<8x256xf32>
    %33 = vector.extract_strided_slice %32 {offsets = [0, 0], sizes = [8, 64], strides = [1, 1]} : vector<8x256xf32> to vector<8x64xf32>
    %34 = vector.extract_strided_slice %32 {offsets = [0, 128], sizes = [8, 64], strides = [1, 1]} : vector<8x256xf32> to vector<8x64xf32>
    %35 = arith.mulf %33, %22 : vector<8x64xf32>
    %36 = arith.mulf %30, %34 : vector<8x64xf32>
    %37 = arith.addf %35, %36 : vector<8x64xf32>
    %38 = math.tanh %37 : vector<8x64xf32>
    %39 = arith.mulf %31, %38 : vector<8x64xf32>
    %cst_19 = arith.constant 0.000000e+00 : f32
    %40 = vector.broadcast %cst_19 : f32 to vector<8x64xf32>
    %41 = arith.maximumf %39, %40 : vector<8x64xf32>
    %c0_20 = arith.constant 0 : index
    %c0_21 = arith.constant 0 : index
    %42 = vector.load %arg13[%c0_20, %c0_21] : memref<184x64xf32, #tpu.memory_space<vmem>>, vector<8x64xf32>
    tpu.vector_store %arg13[%c0_20, %c0_21], %41 {strides = array<i32>} : memref<184x64xf32, #tpu.memory_space<vmem>>, vector<8x64xf32>,
    %c8 = arith.constant 8 : index
    %c0_22 = arith.constant 0 : index
    %43 = vector.load %arg12[%c8, %c0_22] : memref<184x256xf32, #tpu.memory_space<vmem>>, vector<8x256xf32>
    %44 = arith.truncf %39 : vector<8x64xf32> to vector<8x64xbf16>
    %cst_23 = arith.constant dense<0.000000e+00> : vector<8x256xf32>
    %45 = tpu.matmul %44, %7, %cst_23 {dimension_numbers = #tpu.dot_dimension_numbers<[1], [0], [0], [1], [0, 0, 1, 1], [], []>} : vector<8x64xbf16>, vector<64x256xbf16>, vector<8x256xf32> -> vector<8x256xf32>
    %46 = arith.addf %43, %45 : vector<8x256xf32>
    %47 = math.tanh %46 : vector<8x256xf32>
    %48 = arith.mulf %47, %15 : vector<8x256xf32>
    %49 = arith.addf %48, %20 : vector<8x256xf32>
    %50 = vector.extract_strided_slice %49 {offsets = [0, 0], sizes = [8, 64], strides = [1, 1]} : vector<8x256xf32> to vector<8x64xf32>
    %51 = vector.extract_strided_slice %49 {offsets = [0, 128], sizes = [8, 64], strides = [1, 1]} : vector<8x256xf32> to vector<8x64xf32>
    %c192_i32_24 = arith.constant 192 : i32
    %52 = tpu.dynamic_rotate %49 by %c192_i32_24 dim 1 : vector<8x256xf32>, i32 -> vector<8x256xf32>
    %53 = vector.extract_strided_slice %52 {offsets = [0, 0], sizes = [8, 64], strides = [1, 1]} : vector<8x256xf32> to vector<8x64xf32>
    %54 = vector.extract_strided_slice %52 {offsets = [0, 128], sizes = [8, 64], strides = [1, 1]} : vector<8x256xf32> to vector<8x64xf32>
    %55 = arith.mulf %53, %37 : vector<8x64xf32>
    %56 = arith.mulf %50, %54 : vector<8x64xf32>
    %57 = arith.addf %55, %56 : vector<8x64xf32>
    %58 = math.tanh %57 : vector<8x64xf32>
    %59 = arith.mulf %51, %58 : vector<8x64xf32>
    %cst_25 = arith.constant 0.000000e+00 : f32
    %60 = vector.broadcast %cst_25 : f32 to vector<8x64xf32>
    %61 = arith.maximumf %59, %60 : vector<8x64xf32>
    %c8_26 = arith.constant 8 : index
    %c0_27 = arith.constant 0 : index
    %62 = vector.load %arg13[%c8_26, %c0_27] : memref<184x64xf32, #tpu.memory_space<vmem>>, vector<8x64xf32>
    tpu.vector_store %arg13[%c8_26, %c0_27], %61 {strides = array<i32>} : memref<184x64xf32, #tpu.memory_space<vmem>>, vector<8x64xf32>,
    %c16 = arith.constant 16 : index
    %c0_28 = arith.constant 0 : index
    %63 = vector.load %arg12[%c16, %c0_28] : memref<184x256xf32, #tpu.memory_space<vmem>>, vector<8x256xf32>
    %64 = arith.truncf %59 : vector<8x64xf32> to vector<8x64xbf16>
    %cst_29 = arith.constant dense<0.000000e+00> : vector<8x256xf32>
    %65 = tpu.matmul %64, %7, %cst_29 {dimension_numbers = #tpu.dot_dimension_numbers<[1], [0], [0], [1], [0, 0, 1, 1], [], []>} : vector<8x64xbf16>, vector<64x256xbf16>, vector<8x256xf32> -> vector<8x256xf32>
    %66 = arith.addf %63, %65 : vector<8x256xf32>
    %67 = math.tanh %66 : vector<8x256xf32>
    %68 = arith.mulf %67, %15 : vector<8x256xf32>
    %69 = arith.addf %68, %20 : vector<8x256xf32>
    %70 = vector.extract_strided_slice %69 {offsets = [0, 0], sizes = [8, 64], strides = [1, 1]} : vector<8x256xf32> to vector<8x64xf32>
    %71 = vector.extract_strided_slice %69 {offsets = [0, 128], sizes = [8, 64], strides = [1, 1]} : vector<8x256xf32> to vector<8x64xf32>
    %c192_i32_30 = arith.constant 192 : i32
    %72 = tpu.dynamic_rotate %69 by %c192_i32_30 dim 1 : vector<8x256xf32>, i32 -> vector<8x256xf32>
    %73 = vector.extract_strided_slice %72 {offsets = [0, 0], sizes = [8, 64], strides = [1, 1]} : vector<8x256xf32> to vector<8x64xf32>
    %74 = vector.extract_strided_slice %72 {offsets = [0, 128], sizes = [8, 64], strides = [1, 1]} : vector<8x256xf32> to vector<8x64xf32>
    %75 = arith.mulf %73, %57 : vector<8x64xf32>
    %76 = arith.mulf %70, %74 : vector<8x64xf32>
    %77 = arith.addf %75, %76 : vector<8x64xf32>
    %78 = math.tanh %77 : vector<8x64xf32>
    %79 = arith.mulf %71, %78 : vector<8x64xf32>
    %cst_31 = arith.constant 0.000000e+00 : f32
    %80 = vector.broadcast %cst_31 : f32 to vector<8x64xf32>
    %81 = arith.maximumf %79, %80 : vector<8x64xf32>
    %c16_32 = arith.constant 16 : index
    %c0_33 = arith.constant 0 : index
    %82 = vector.load %arg13[%c16_32, %c0_33] : memref<184x64xf32, #tpu.memory_space<vmem>>, vector<8x64xf32>
    tpu.vector_store %arg13[%c16_32, %c0_33], %81 {strides = array<i32>} : memref<184x64xf32, #tpu.memory_space<vmem>>, vector<8x64xf32>,
    %c24 = arith.constant 24 : index
    %c0_34 = arith.constant 0 : index
    %83 = vector.load %arg12[%c24, %c0_34] : memref<184x256xf32, #tpu.memory_space<vmem>>, vector<8x256xf32>
    %84 = arith.truncf %79 : vector<8x64xf32> to vector<8x64xbf16>
    %cst_35 = arith.constant dense<0.000000e+00> : vector<8x256xf32>
    %85 = tpu.matmul %84, %7, %cst_35 {dimension_numbers = #tpu.dot_dimension_numbers<[1], [0], [0], [1], [0, 0, 1, 1], [], []>} : vector<8x64xbf16>, vector<64x256xbf16>, vector<8x256xf32> -> vector<8x256xf32>
    %86 = arith.addf %83, %85 : vector<8x256xf32>
    %87 = math.tanh %86 : vector<8x256xf32>
    %88 = arith.mulf %87, %15 : vector<8x256xf32>
    %89 = arith.addf %88, %20 : vector<8x256xf32>
    %90 = vector.extract_strided_slice %89 {offsets = [0, 0], sizes = [8, 64], strides = [1, 1]} : vector<8x256xf32> to vector<8x64xf32>
    %91 = vector.extract_strided_slice %89 {offsets = [0, 128], sizes = [8, 64], strides = [1, 1]} : vector<8x256xf32> to vector<8x64xf32>
    %c192_i32_36 = arith.constant 192 : i32
    %92 = tpu.dynamic_rotate %89 by %c192_i32_36 dim 1 : vector<8x256xf32>, i32 -> vector<8x256xf32>
    %93 = vector.extract_strided_slice %92 {offsets = [0, 0], sizes = [8, 64], strides = [1, 1]} : vector<8x256xf32> to vector<8x64xf32>
    %94 = vector.extract_strided_slice %92 {offsets = [0, 128], sizes = [8, 64], strides = [1, 1]} : vector<8x256xf32> to vector<8x64xf32>
    %95 = arith.mulf %93, %77 : vector<8x64xf32>
    %96 = arith.mulf %90, %94 : vector<8x64xf32>
    %97 = arith.addf %95, %96 : vector<8x64xf32>
    %98 = math.tanh %97 : vector<8x64xf32>
    %99 = arith.mulf %91, %98 : vector<8x64xf32>
    %cst_37 = arith.constant 0.000000e+00 : f32
    %100 = vector.broadcast %cst_37 : f32 to vector<8x64xf32>
    %101 = arith.maximumf %99, %100 : vector<8x64xf32>
    %c24_38 = arith.constant 24 : index
    %c0_39 = arith.constant 0 : index
    %102 = vector.load %arg13[%c24_38, %c0_39] : memref<184x64xf32, #tpu.memory_space<vmem>>, vector<8x64xf32>
    tpu.vector_store %arg13[%c24_38, %c0_39], %101 {strides = array<i32>} : memref<184x64xf32, #tpu.memory_space<vmem>>, vector<8x64xf32>,
    %c32 = arith.constant 32 : index
    %c0_40 = arith.constant 0 : index
    %103 = vector.load %arg12[%c32, %c0_40] : memref<184x256xf32, #tpu.memory_space<vmem>>, vector<8x256xf32>
    %104 = arith.truncf %99 : vector<8x64xf32> to vector<8x64xbf16>
    %cst_41 = arith.constant dense<0.000000e+00> : vector<8x256xf32>
    %105 = tpu.matmul %104, %7, %cst_41 {dimension_numbers = #tpu.dot_dimension_numbers<[1], [0], [0], [1], [0, 0, 1, 1], [], []>} : vector<8x64xbf16>, vector<64x256xbf16>, vector<8x256xf32> -> vector<8x256xf32>
    %106 = arith.addf %103, %105 : vector<8x256xf32>
    %107 = math.tanh %106 : vector<8x256xf32>
    %108 = arith.mulf %107, %15 : vector<8x256xf32>
    %109 = arith.addf %108, %20 : vector<8x256xf32>
    %110 = vector.extract_strided_slice %109 {offsets = [0, 0], sizes = [8, 64], strides = [1, 1]} : vector<8x256xf32> to vector<8x64xf32>
    %111 = vector.extract_strided_slice %109 {offsets = [0, 128], sizes = [8, 64], strides = [1, 1]} : vector<8x256xf32> to vector<8x64xf32>
    %c192_i32_42 = arith.constant 192 : i32
    %112 = tpu.dynamic_rotate %109 by %c192_i32_42 dim 1 : vector<8x256xf32>, i32 -> vector<8x256xf32>
    %113 = vector.extract_strided_slice %112 {offsets = [0, 0], sizes = [8, 64], strides = [1, 1]} : vector<8x256xf32> to vector<8x64xf32>
    %114 = vector.extract_strided_slice %112 {offsets = [0, 128], sizes = [8, 64], strides = [1, 1]} : vector<8x256xf32> to vector<8x64xf32>
    %115 = arith.mulf %113, %97 : vector<8x64xf32>
    %116 = arith.mulf %110, %114 : vector<8x64xf32>
    %117 = arith.addf %115, %116 : vector<8x64xf32>
    %118 = math.tanh %117 : vector<8x64xf32>
    %119 = arith.mulf %111, %118 : vector<8x64xf32>
    %cst_43 = arith.constant 0.000000e+00 : f32
    %120 = vector.broadcast %cst_43 : f32 to vector<8x64xf32>
    %121 = arith.maximumf %119, %120 : vector<8x64xf32>
    %c32_44 = arith.constant 32 : index
    %c0_45 = arith.constant 0 : index
    %122 = vector.load %arg13[%c32_44, %c0_45] : memref<184x64xf32, #tpu.memory_space<vmem>>, vector<8x64xf32>
    tpu.vector_store %arg13[%c32_44, %c0_45], %121 {strides = array<i32>} : memref<184x64xf32, #tpu.memory_space<vmem>>, vector<8x64xf32>,
    %c40 = arith.constant 40 : index
    %c0_46 = arith.constant 0 : index
    %123 = vector.load %arg12[%c40, %c0_46] : memref<184x256xf32, #tpu.memory_space<vmem>>, vector<8x256xf32>
    %124 = arith.truncf %119 : vector<8x64xf32> to vector<8x64xbf16>
    %cst_47 = arith.constant dense<0.000000e+00> : vector<8x256xf32>
    %125 = tpu.matmul %124, %7, %cst_47 {dimension_numbers = #tpu.dot_dimension_numbers<[1], [0], [0], [1], [0, 0, 1, 1], [], []>} : vector<8x64xbf16>, vector<64x256xbf16>, vector<8x256xf32> -> vector<8x256xf32>
    %126 = arith.addf %123, %125 : vector<8x256xf32>
    %127 = math.tanh %126 : vector<8x256xf32>
    %128 = arith.mulf %127, %15 : vector<8x256xf32>
    %129 = arith.addf %128, %20 : vector<8x256xf32>
    %130 = vector.extract_strided_slice %129 {offsets = [0, 0], sizes = [8, 64], strides = [1, 1]} : vector<8x256xf32> to vector<8x64xf32>
    %131 = vector.extract_strided_slice %129 {offsets = [0, 128], sizes = [8, 64], strides = [1, 1]} : vector<8x256xf32> to vector<8x64xf32>
    %c192_i32_48 = arith.constant 192 : i32
    %132 = tpu.dynamic_rotate %129 by %c192_i32_48 dim 1 : vector<8x256xf32>, i32 -> vector<8x256xf32>
    %133 = vector.extract_strided_slice %132 {offsets = [0, 0], sizes = [8, 64], strides = [1, 1]} : vector<8x256xf32> to vector<8x64xf32>
    %134 = vector.extract_strided_slice %132 {offsets = [0, 128], sizes = [8, 64], strides = [1, 1]} : vector<8x256xf32> to vector<8x64xf32>
    %135 = arith.mulf %133, %117 : vector<8x64xf32>
    %136 = arith.mulf %130, %134 : vector<8x64xf32>
    %137 = arith.addf %135, %136 : vector<8x64xf32>
    %138 = math.tanh %137 : vector<8x64xf32>
    %139 = arith.mulf %131, %138 : vector<8x64xf32>
    %cst_49 = arith.constant 0.000000e+00 : f32
    %140 = vector.broadcast %cst_49 : f32 to vector<8x64xf32>
    %141 = arith.maximumf %139, %140 : vector<8x64xf32>
    %c40_50 = arith.constant 40 : index
    %c0_51 = arith.constant 0 : index
    %142 = vector.load %arg13[%c40_50, %c0_51] : memref<184x64xf32, #tpu.memory_space<vmem>>, vector<8x64xf32>
    tpu.vector_store %arg13[%c40_50, %c0_51], %141 {strides = array<i32>} : memref<184x64xf32, #tpu.memory_space<vmem>>, vector<8x64xf32>,
    %c48 = arith.constant 48 : index
    %c0_52 = arith.constant 0 : index
    %143 = vector.load %arg12[%c48, %c0_52] : memref<184x256xf32, #tpu.memory_space<vmem>>, vector<8x256xf32>
    %144 = arith.truncf %139 : vector<8x64xf32> to vector<8x64xbf16>
    %cst_53 = arith.constant dense<0.000000e+00> : vector<8x256xf32>
    %145 = tpu.matmul %144, %7, %cst_53 {dimension_numbers = #tpu.dot_dimension_numbers<[1], [0], [0], [1], [0, 0, 1, 1], [], []>} : vector<8x64xbf16>, vector<64x256xbf16>, vector<8x256xf32> -> vector<8x256xf32>
    %146 = arith.addf %143, %145 : vector<8x256xf32>
    %147 = math.tanh %146 : vector<8x256xf32>
    %148 = arith.mulf %147, %15 : vector<8x256xf32>
    %149 = arith.addf %148, %20 : vector<8x256xf32>
    %150 = vector.extract_strided_slice %149 {offsets = [0, 0], sizes = [8, 64], strides = [1, 1]} : vector<8x256xf32> to vector<8x64xf32>
    %151 = vector.extract_strided_slice %149 {offsets = [0, 128], sizes = [8, 64], strides = [1, 1]} : vector<8x256xf32> to vector<8x64xf32>
    %c192_i32_54 = arith.constant 192 : i32
    %152 = tpu.dynamic_rotate %149 by %c192_i32_54 dim 1 : vector<8x256xf32>, i32 -> vector<8x256xf32>
    %153 = vector.extract_strided_slice %152 {offsets = [0, 0], sizes = [8, 64], strides = [1, 1]} : vector<8x256xf32> to vector<8x64xf32>
    %154 = vector.extract_strided_slice %152 {offsets = [0, 128], sizes = [8, 64], strides = [1, 1]} : vector<8x256xf32> to vector<8x64xf32>
    %155 = arith.mulf %153, %137 : vector<8x64xf32>
    %156 = arith.mulf %150, %154 : vector<8x64xf32>
    %157 = arith.addf %155, %156 : vector<8x64xf32>
    %158 = math.tanh %157 : vector<8x64xf32>
    %159 = arith.mulf %151, %158 : vector<8x64xf32>
    %cst_55 = arith.constant 0.000000e+00 : f32
    %160 = vector.broadcast %cst_55 : f32 to vector<8x64xf32>
    %161 = arith.maximumf %159, %160 : vector<8x64xf32>
    %c48_56 = arith.constant 48 : index
    %c0_57 = arith.constant 0 : index
    %162 = vector.load %arg13[%c48_56, %c0_57] : memref<184x64xf32, #tpu.memory_space<vmem>>, vector<8x64xf32>
    tpu.vector_store %arg13[%c48_56, %c0_57], %161 {strides = array<i32>} : memref<184x64xf32, #tpu.memory_space<vmem>>, vector<8x64xf32>,
    %c56 = arith.constant 56 : index
    %c0_58 = arith.constant 0 : index
    %163 = vector.load %arg12[%c56, %c0_58] : memref<184x256xf32, #tpu.memory_space<vmem>>, vector<8x256xf32>
    %164 = arith.truncf %159 : vector<8x64xf32> to vector<8x64xbf16>
    %cst_59 = arith.constant dense<0.000000e+00> : vector<8x256xf32>
    %165 = tpu.matmul %164, %7, %cst_59 {dimension_numbers = #tpu.dot_dimension_numbers<[1], [0], [0], [1], [0, 0, 1, 1], [], []>} : vector<8x64xbf16>, vector<64x256xbf16>, vector<8x256xf32> -> vector<8x256xf32>
    %166 = arith.addf %163, %165 : vector<8x256xf32>
    %167 = math.tanh %166 : vector<8x256xf32>
    %168 = arith.mulf %167, %15 : vector<8x256xf32>
    %169 = arith.addf %168, %20 : vector<8x256xf32>
    %170 = vector.extract_strided_slice %169 {offsets = [0, 0], sizes = [8, 64], strides = [1, 1]} : vector<8x256xf32> to vector<8x64xf32>
    %171 = vector.extract_strided_slice %169 {offsets = [0, 128], sizes = [8, 64], strides = [1, 1]} : vector<8x256xf32> to vector<8x64xf32>
    %c192_i32_60 = arith.constant 192 : i32
    %172 = tpu.dynamic_rotate %169 by %c192_i32_60 dim 1 : vector<8x256xf32>, i32 -> vector<8x256xf32>
    %173 = vector.extract_strided_slice %172 {offsets = [0, 0], sizes = [8, 64], strides = [1, 1]} : vector<8x256xf32> to vector<8x64xf32>
    %174 = vector.extract_strided_slice %172 {offsets = [0, 128], sizes = [8, 64], strides = [1, 1]} : vector<8x256xf32> to vector<8x64xf32>
    %175 = arith.mulf %173, %157 : vector<8x64xf32>
    %176 = arith.mulf %170, %174 : vector<8x64xf32>
    %177 = arith.addf %175, %176 : vector<8x64xf32>
    %178 = math.tanh %177 : vector<8x64xf32>
    %179 = arith.mulf %171, %178 : vector<8x64xf32>
    %cst_61 = arith.constant 0.000000e+00 : f32
    %180 = vector.broadcast %cst_61 : f32 to vector<8x64xf32>
    %181 = arith.maximumf %179, %180 : vector<8x64xf32>
    %c56_62 = arith.constant 56 : index
    %c0_63 = arith.constant 0 : index
    %182 = vector.load %arg13[%c56_62, %c0_63] : memref<184x64xf32, #tpu.memory_space<vmem>>, vector<8x64xf32>
    tpu.vector_store %arg13[%c56_62, %c0_63], %181 {strides = array<i32>} : memref<184x64xf32, #tpu.memory_space<vmem>>, vector<8x64xf32>,
    %c64 = arith.constant 64 : index
    %c0_64 = arith.constant 0 : index
    %183 = vector.load %arg12[%c64, %c0_64] : memref<184x256xf32, #tpu.memory_space<vmem>>, vector<8x256xf32>
    %184 = arith.truncf %179 : vector<8x64xf32> to vector<8x64xbf16>
    %cst_65 = arith.constant dense<0.000000e+00> : vector<8x256xf32>
    %185 = tpu.matmul %184, %7, %cst_65 {dimension_numbers = #tpu.dot_dimension_numbers<[1], [0], [0], [1], [0, 0, 1, 1], [], []>} : vector<8x64xbf16>, vector<64x256xbf16>, vector<8x256xf32> -> vector<8x256xf32>
    %186 = arith.addf %183, %185 : vector<8x256xf32>
    %187 = math.tanh %186 : vector<8x256xf32>
    %188 = arith.mulf %187, %15 : vector<8x256xf32>
    %189 = arith.addf %188, %20 : vector<8x256xf32>
    %190 = vector.extract_strided_slice %189 {offsets = [0, 0], sizes = [8, 64], strides = [1, 1]} : vector<8x256xf32> to vector<8x64xf32>
    %191 = vector.extract_strided_slice %189 {offsets = [0, 128], sizes = [8, 64], strides = [1, 1]} : vector<8x256xf32> to vector<8x64xf32>
    %c192_i32_66 = arith.constant 192 : i32
    %192 = tpu.dynamic_rotate %189 by %c192_i32_66 dim 1 : vector<8x256xf32>, i32 -> vector<8x256xf32>
    %193 = vector.extract_strided_slice %192 {offsets = [0, 0], sizes = [8, 64], strides = [1, 1]} : vector<8x256xf32> to vector<8x64xf32>
    %194 = vector.extract_strided_slice %192 {offsets = [0, 128], sizes = [8, 64], strides = [1, 1]} : vector<8x256xf32> to vector<8x64xf32>
    %195 = arith.mulf %193, %177 : vector<8x64xf32>
    %196 = arith.mulf %190, %194 : vector<8x64xf32>
    %197 = arith.addf %195, %196 : vector<8x64xf32>
    %198 = math.tanh %197 : vector<8x64xf32>
    %199 = arith.mulf %191, %198 : vector<8x64xf32>
    %cst_67 = arith.constant 0.000000e+00 : f32
    %200 = vector.broadcast %cst_67 : f32 to vector<8x64xf32>
    %201 = arith.maximumf %199, %200 : vector<8x64xf32>
    %c64_68 = arith.constant 64 : index
    %c0_69 = arith.constant 0 : index
    %202 = vector.load %arg13[%c64_68, %c0_69] : memref<184x64xf32, #tpu.memory_space<vmem>>, vector<8x64xf32>
    tpu.vector_store %arg13[%c64_68, %c0_69], %201 {strides = array<i32>} : memref<184x64xf32, #tpu.memory_space<vmem>>, vector<8x64xf32>,
    %c72 = arith.constant 72 : index
    %c0_70 = arith.constant 0 : index
    %203 = vector.load %arg12[%c72, %c0_70] : memref<184x256xf32, #tpu.memory_space<vmem>>, vector<8x256xf32>
    %204 = arith.truncf %199 : vector<8x64xf32> to vector<8x64xbf16>
    %cst_71 = arith.constant dense<0.000000e+00> : vector<8x256xf32>
    %205 = tpu.matmul %204, %7, %cst_71 {dimension_numbers = #tpu.dot_dimension_numbers<[1], [0], [0], [1], [0, 0, 1, 1], [], []>} : vector<8x64xbf16>, vector<64x256xbf16>, vector<8x256xf32> -> vector<8x256xf32>
    %206 = arith.addf %203, %205 : vector<8x256xf32>
    %207 = math.tanh %206 : vector<8x256xf32>
    %208 = arith.mulf %207, %15 : vector<8x256xf32>
    %209 = arith.addf %208, %20 : vector<8x256xf32>
    %210 = vector.extract_strided_slice %209 {offsets = [0, 0], sizes = [8, 64], strides = [1, 1]} : vector<8x256xf32> to vector<8x64xf32>
    %211 = vector.extract_strided_slice %209 {offsets = [0, 128], sizes = [8, 64], strides = [1, 1]} : vector<8x256xf32> to vector<8x64xf32>
    %c192_i32_72 = arith.constant 192 : i32
    %212 = tpu.dynamic_rotate %209 by %c192_i32_72 dim 1 : vector<8x256xf32>, i32 -> vector<8x256xf32>
    %213 = vector.extract_strided_slice %212 {offsets = [0, 0], sizes = [8, 64], strides = [1, 1]} : vector<8x256xf32> to vector<8x64xf32>
    %214 = vector.extract_strided_slice %212 {offsets = [0, 128], sizes = [8, 64], strides = [1, 1]} : vector<8x256xf32> to vector<8x64xf32>
    %215 = arith.mulf %213, %197 : vector<8x64xf32>
    %216 = arith.mulf %210, %214 : vector<8x64xf32>
    %217 = arith.addf %215, %216 : vector<8x64xf32>
    %218 = math.tanh %217 : vector<8x64xf32>
    %219 = arith.mulf %211, %218 : vector<8x64xf32>
    %cst_73 = arith.constant 0.000000e+00 : f32
    %220 = vector.broadcast %cst_73 : f32 to vector<8x64xf32>
    %221 = arith.maximumf %219, %220 : vector<8x64xf32>
    %c72_74 = arith.constant 72 : index
    %c0_75 = arith.constant 0 : index
    %222 = vector.load %arg13[%c72_74, %c0_75] : memref<184x64xf32, #tpu.memory_space<vmem>>, vector<8x64xf32>
    tpu.vector_store %arg13[%c72_74, %c0_75], %221 {strides = array<i32>} : memref<184x64xf32, #tpu.memory_space<vmem>>, vector<8x64xf32>,
    %c80 = arith.constant 80 : index
    %c0_76 = arith.constant 0 : index
    %223 = vector.load %arg12[%c80, %c0_76] : memref<184x256xf32, #tpu.memory_space<vmem>>, vector<8x256xf32>
    %224 = arith.truncf %219 : vector<8x64xf32> to vector<8x64xbf16>
    %cst_77 = arith.constant dense<0.000000e+00> : vector<8x256xf32>
    %225 = tpu.matmul %224, %7, %cst_77 {dimension_numbers = #tpu.dot_dimension_numbers<[1], [0], [0], [1], [0, 0, 1, 1], [], []>} : vector<8x64xbf16>, vector<64x256xbf16>, vector<8x256xf32> -> vector<8x256xf32>
    %226 = arith.addf %223, %225 : vector<8x256xf32>
    %227 = math.tanh %226 : vector<8x256xf32>
    %228 = arith.mulf %227, %15 : vector<8x256xf32>
    %229 = arith.addf %228, %20 : vector<8x256xf32>
    %230 = vector.extract_strided_slice %229 {offsets = [0, 0], sizes = [8, 64], strides = [1, 1]} : vector<8x256xf32> to vector<8x64xf32>
    %231 = vector.extract_strided_slice %229 {offsets = [0, 128], sizes = [8, 64], strides = [1, 1]} : vector<8x256xf32> to vector<8x64xf32>
    %c192_i32_78 = arith.constant 192 : i32
    %232 = tpu.dynamic_rotate %229 by %c192_i32_78 dim 1 : vector<8x256xf32>, i32 -> vector<8x256xf32>
    %233 = vector.extract_strided_slice %232 {offsets = [0, 0], sizes = [8, 64], strides = [1, 1]} : vector<8x256xf32> to vector<8x64xf32>
    %234 = vector.extract_strided_slice %232 {offsets = [0, 128], sizes = [8, 64], strides = [1, 1]} : vector<8x256xf32> to vector<8x64xf32>
    %235 = arith.mulf %233, %217 : vector<8x64xf32>
    %236 = arith.mulf %230, %234 : vector<8x64xf32>
    %237 = arith.addf %235, %236 : vector<8x64xf32>
    %238 = math.tanh %237 : vector<8x64xf32>
    %239 = arith.mulf %231, %238 : vector<8x64xf32>
    %cst_79 = arith.constant 0.000000e+00 : f32
    %240 = vector.broadcast %cst_79 : f32 to vector<8x64xf32>
    %241 = arith.maximumf %239, %240 : vector<8x64xf32>
    %c80_80 = arith.constant 80 : index
    %c0_81 = arith.constant 0 : index
    %242 = vector.load %arg13[%c80_80, %c0_81] : memref<184x64xf32, #tpu.memory_space<vmem>>, vector<8x64xf32>
    tpu.vector_store %arg13[%c80_80, %c0_81], %241 {strides = array<i32>} : memref<184x64xf32, #tpu.memory_space<vmem>>, vector<8x64xf32>,
    %c88 = arith.constant 88 : index
    %c0_82 = arith.constant 0 : index
    %243 = vector.load %arg12[%c88, %c0_82] : memref<184x256xf32, #tpu.memory_space<vmem>>, vector<8x256xf32>
    %244 = arith.truncf %239 : vector<8x64xf32> to vector<8x64xbf16>
    %cst_83 = arith.constant dense<0.000000e+00> : vector<8x256xf32>
    %245 = tpu.matmul %244, %7, %cst_83 {dimension_numbers = #tpu.dot_dimension_numbers<[1], [0], [0], [1], [0, 0, 1, 1], [], []>} : vector<8x64xbf16>, vector<64x256xbf16>, vector<8x256xf32> -> vector<8x256xf32>
    %246 = arith.addf %243, %245 : vector<8x256xf32>
    %247 = math.tanh %246 : vector<8x256xf32>
    %248 = arith.mulf %247, %15 : vector<8x256xf32>
    %249 = arith.addf %248, %20 : vector<8x256xf32>
    %250 = vector.extract_strided_slice %249 {offsets = [0, 0], sizes = [8, 64], strides = [1, 1]} : vector<8x256xf32> to vector<8x64xf32>
    %251 = vector.extract_strided_slice %249 {offsets = [0, 128], sizes = [8, 64], strides = [1, 1]} : vector<8x256xf32> to vector<8x64xf32>
    %c192_i32_84 = arith.constant 192 : i32
    %252 = tpu.dynamic_rotate %249 by %c192_i32_84 dim 1 : vector<8x256xf32>, i32 -> vector<8x256xf32>
    %253 = vector.extract_strided_slice %252 {offsets = [0, 0], sizes = [8, 64], strides = [1, 1]} : vector<8x256xf32> to vector<8x64xf32>
    %254 = vector.extract_strided_slice %252 {offsets = [0, 128], sizes = [8, 64], strides = [1, 1]} : vector<8x256xf32> to vector<8x64xf32>
    %255 = arith.mulf %253, %237 : vector<8x64xf32>
    %256 = arith.mulf %250, %254 : vector<8x64xf32>
    %257 = arith.addf %255, %256 : vector<8x64xf32>
    %258 = math.tanh %257 : vector<8x64xf32>
    %259 = arith.mulf %251, %258 : vector<8x64xf32>
    %cst_85 = arith.constant 0.000000e+00 : f32
    %260 = vector.broadcast %cst_85 : f32 to vector<8x64xf32>
    %261 = arith.maximumf %259, %260 : vector<8x64xf32>
    %c88_86 = arith.constant 88 : index
    %c0_87 = arith.constant 0 : index
    %262 = vector.load %arg13[%c88_86, %c0_87] : memref<184x64xf32, #tpu.memory_space<vmem>>, vector<8x64xf32>
    tpu.vector_store %arg13[%c88_86, %c0_87], %261 {strides = array<i32>} : memref<184x64xf32, #tpu.memory_space<vmem>>, vector<8x64xf32>,
    %c96 = arith.constant 96 : index
    %c0_88 = arith.constant 0 : index
    %263 = vector.load %arg12[%c96, %c0_88] : memref<184x256xf32, #tpu.memory_space<vmem>>, vector<8x256xf32>
    %264 = arith.truncf %259 : vector<8x64xf32> to vector<8x64xbf16>
    %cst_89 = arith.constant dense<0.000000e+00> : vector<8x256xf32>
    %265 = tpu.matmul %264, %7, %cst_89 {dimension_numbers = #tpu.dot_dimension_numbers<[1], [0], [0], [1], [0, 0, 1, 1], [], []>} : vector<8x64xbf16>, vector<64x256xbf16>, vector<8x256xf32> -> vector<8x256xf32>
    %266 = arith.addf %263, %265 : vector<8x256xf32>
    %267 = math.tanh %266 : vector<8x256xf32>
    %268 = arith.mulf %267, %15 : vector<8x256xf32>
    %269 = arith.addf %268, %20 : vector<8x256xf32>
    %270 = vector.extract_strided_slice %269 {offsets = [0, 0], sizes = [8, 64], strides = [1, 1]} : vector<8x256xf32> to vector<8x64xf32>
    %271 = vector.extract_strided_slice %269 {offsets = [0, 128], sizes = [8, 64], strides = [1, 1]} : vector<8x256xf32> to vector<8x64xf32>
    %c192_i32_90 = arith.constant 192 : i32
    %272 = tpu.dynamic_rotate %269 by %c192_i32_90 dim 1 : vector<8x256xf32>, i32 -> vector<8x256xf32>
    %273 = vector.extract_strided_slice %272 {offsets = [0, 0], sizes = [8, 64], strides = [1, 1]} : vector<8x256xf32> to vector<8x64xf32>
    %274 = vector.extract_strided_slice %272 {offsets = [0, 128], sizes = [8, 64], strides = [1, 1]} : vector<8x256xf32> to vector<8x64xf32>
    %275 = arith.mulf %273, %257 : vector<8x64xf32>
    %276 = arith.mulf %270, %274 : vector<8x64xf32>
    %277 = arith.addf %275, %276 : vector<8x64xf32>
    %278 = math.tanh %277 : vector<8x64xf32>
    %279 = arith.mulf %271, %278 : vector<8x64xf32>
    %cst_91 = arith.constant 0.000000e+00 : f32
    %280 = vector.broadcast %cst_91 : f32 to vector<8x64xf32>
    %281 = arith.maximumf %279, %280 : vector<8x64xf32>
    %c96_92 = arith.constant 96 : index
    %c0_93 = arith.constant 0 : index
    %282 = vector.load %arg13[%c96_92, %c0_93] : memref<184x64xf32, #tpu.memory_space<vmem>>, vector<8x64xf32>
    tpu.vector_store %arg13[%c96_92, %c0_93], %281 {strides = array<i32>} : memref<184x64xf32, #tpu.memory_space<vmem>>, vector<8x64xf32>,
    %c104 = arith.constant 104 : index
    %c0_94 = arith.constant 0 : index
    %283 = vector.load %arg12[%c104, %c0_94] : memref<184x256xf32, #tpu.memory_space<vmem>>, vector<8x256xf32>
    %284 = arith.truncf %279 : vector<8x64xf32> to vector<8x64xbf16>
    %cst_95 = arith.constant dense<0.000000e+00> : vector<8x256xf32>
    %285 = tpu.matmul %284, %7, %cst_95 {dimension_numbers = #tpu.dot_dimension_numbers<[1], [0], [0], [1], [0, 0, 1, 1], [], []>} : vector<8x64xbf16>, vector<64x256xbf16>, vector<8x256xf32> -> vector<8x256xf32>
    %286 = arith.addf %283, %285 : vector<8x256xf32>
    %287 = math.tanh %286 : vector<8x256xf32>
    %288 = arith.mulf %287, %15 : vector<8x256xf32>
    %289 = arith.addf %288, %20 : vector<8x256xf32>
    %290 = vector.extract_strided_slice %289 {offsets = [0, 0], sizes = [8, 64], strides = [1, 1]} : vector<8x256xf32> to vector<8x64xf32>
    %291 = vector.extract_strided_slice %289 {offsets = [0, 128], sizes = [8, 64], strides = [1, 1]} : vector<8x256xf32> to vector<8x64xf32>
    %c192_i32_96 = arith.constant 192 : i32
    %292 = tpu.dynamic_rotate %289 by %c192_i32_96 dim 1 : vector<8x256xf32>, i32 -> vector<8x256xf32>
    %293 = vector.extract_strided_slice %292 {offsets = [0, 0], sizes = [8, 64], strides = [1, 1]} : vector<8x256xf32> to vector<8x64xf32>
    %294 = vector.extract_strided_slice %292 {offsets = [0, 128], sizes = [8, 64], strides = [1, 1]} : vector<8x256xf32> to vector<8x64xf32>
    %295 = arith.mulf %293, %277 : vector<8x64xf32>
    %296 = arith.mulf %290, %294 : vector<8x64xf32>
    %297 = arith.addf %295, %296 : vector<8x64xf32>
    %298 = math.tanh %297 : vector<8x64xf32>
    %299 = arith.mulf %291, %298 : vector<8x64xf32>
    %cst_97 = arith.constant 0.000000e+00 : f32
    %300 = vector.broadcast %cst_97 : f32 to vector<8x64xf32>
    %301 = arith.maximumf %299, %300 : vector<8x64xf32>
    %c104_98 = arith.constant 104 : index
    %c0_99 = arith.constant 0 : index
    %302 = vector.load %arg13[%c104_98, %c0_99] : memref<184x64xf32, #tpu.memory_space<vmem>>, vector<8x64xf32>
    tpu.vector_store %arg13[%c104_98, %c0_99], %301 {strides = array<i32>} : memref<184x64xf32, #tpu.memory_space<vmem>>, vector<8x64xf32>,
    %c112 = arith.constant 112 : index
    %c0_100 = arith.constant 0 : index
    %303 = vector.load %arg12[%c112, %c0_100] : memref<184x256xf32, #tpu.memory_space<vmem>>, vector<8x256xf32>
    %304 = arith.truncf %299 : vector<8x64xf32> to vector<8x64xbf16>
    %cst_101 = arith.constant dense<0.000000e+00> : vector<8x256xf32>
    %305 = tpu.matmul %304, %7, %cst_101 {dimension_numbers = #tpu.dot_dimension_numbers<[1], [0], [0], [1], [0, 0, 1, 1], [], []>} : vector<8x64xbf16>, vector<64x256xbf16>, vector<8x256xf32> -> vector<8x256xf32>
    %306 = arith.addf %303, %305 : vector<8x256xf32>
    %307 = math.tanh %306 : vector<8x256xf32>
    %308 = arith.mulf %307, %15 : vector<8x256xf32>
    %309 = arith.addf %308, %20 : vector<8x256xf32>
    %310 = vector.extract_strided_slice %309 {offsets = [0, 0], sizes = [8, 64], strides = [1, 1]} : vector<8x256xf32> to vector<8x64xf32>
    %311 = vector.extract_strided_slice %309 {offsets = [0, 128], sizes = [8, 64], strides = [1, 1]} : vector<8x256xf32> to vector<8x64xf32>
    %c192_i32_102 = arith.constant 192 : i32
    %312 = tpu.dynamic_rotate %309 by %c192_i32_102 dim 1 : vector<8x256xf32>, i32 -> vector<8x256xf32>
    %313 = vector.extract_strided_slice %312 {offsets = [0, 0], sizes = [8, 64], strides = [1, 1]} : vector<8x256xf32> to vector<8x64xf32>
    %314 = vector.extract_strided_slice %312 {offsets = [0, 128], sizes = [8, 64], strides = [1, 1]} : vector<8x256xf32> to vector<8x64xf32>
    %315 = arith.mulf %313, %297 : vector<8x64xf32>
    %316 = arith.mulf %310, %314 : vector<8x64xf32>
    %317 = arith.addf %315, %316 : vector<8x64xf32>
    %318 = math.tanh %317 : vector<8x64xf32>
    %319 = arith.mulf %311, %318 : vector<8x64xf32>
    %cst_103 = arith.constant 0.000000e+00 : f32
    %320 = vector.broadcast %cst_103 : f32 to vector<8x64xf32>
    %321 = arith.maximumf %319, %320 : vector<8x64xf32>
    %c112_104 = arith.constant 112 : index
    %c0_105 = arith.constant 0 : index
    %322 = vector.load %arg13[%c112_104, %c0_105] : memref<184x64xf32, #tpu.memory_space<vmem>>, vector<8x64xf32>
    tpu.vector_store %arg13[%c112_104, %c0_105], %321 {strides = array<i32>} : memref<184x64xf32, #tpu.memory_space<vmem>>, vector<8x64xf32>,
    %c120 = arith.constant 120 : index
    %c0_106 = arith.constant 0 : index
    %323 = vector.load %arg12[%c120, %c0_106] : memref<184x256xf32, #tpu.memory_space<vmem>>, vector<8x256xf32>
    %324 = arith.truncf %319 : vector<8x64xf32> to vector<8x64xbf16>
    %cst_107 = arith.constant dense<0.000000e+00> : vector<8x256xf32>
    %325 = tpu.matmul %324, %7, %cst_107 {dimension_numbers = #tpu.dot_dimension_numbers<[1], [0], [0], [1], [0, 0, 1, 1], [], []>} : vector<8x64xbf16>, vector<64x256xbf16>, vector<8x256xf32> -> vector<8x256xf32>
    %326 = arith.addf %323, %325 : vector<8x256xf32>
    %327 = math.tanh %326 : vector<8x256xf32>
    %328 = arith.mulf %327, %15 : vector<8x256xf32>
    %329 = arith.addf %328, %20 : vector<8x256xf32>
    %330 = vector.extract_strided_slice %329 {offsets = [0, 0], sizes = [8, 64], strides = [1, 1]} : vector<8x256xf32> to vector<8x64xf32>
    %331 = vector.extract_strided_slice %329 {offsets = [0, 128], sizes = [8, 64], strides = [1, 1]} : vector<8x256xf32> to vector<8x64xf32>
    %c192_i32_108 = arith.constant 192 : i32
    %332 = tpu.dynamic_rotate %329 by %c192_i32_108 dim 1 : vector<8x256xf32>, i32 -> vector<8x256xf32>
    %333 = vector.extract_strided_slice %332 {offsets = [0, 0], sizes = [8, 64], strides = [1, 1]} : vector<8x256xf32> to vector<8x64xf32>
    %334 = vector.extract_strided_slice %332 {offsets = [0, 128], sizes = [8, 64], strides = [1, 1]} : vector<8x256xf32> to vector<8x64xf32>
    %335 = arith.mulf %333, %317 : vector<8x64xf32>
    %336 = arith.mulf %330, %334 : vector<8x64xf32>
    %337 = arith.addf %335, %336 : vector<8x64xf32>
    %338 = math.tanh %337 : vector<8x64xf32>
    %339 = arith.mulf %331, %338 : vector<8x64xf32>
    %cst_109 = arith.constant 0.000000e+00 : f32
    %340 = vector.broadcast %cst_109 : f32 to vector<8x64xf32>
    %341 = arith.maximumf %339, %340 : vector<8x64xf32>
    %c120_110 = arith.constant 120 : index
    %c0_111 = arith.constant 0 : index
    %342 = vector.load %arg13[%c120_110, %c0_111] : memref<184x64xf32, #tpu.memory_space<vmem>>, vector<8x64xf32>
    tpu.vector_store %arg13[%c120_110, %c0_111], %341 {strides = array<i32>} : memref<184x64xf32, #tpu.memory_space<vmem>>, vector<8x64xf32>,
    %c128 = arith.constant 128 : index
    %c0_112 = arith.constant 0 : index
    %343 = vector.load %arg12[%c128, %c0_112] : memref<184x256xf32, #tpu.memory_space<vmem>>, vector<8x256xf32>
    %344 = arith.truncf %339 : vector<8x64xf32> to vector<8x64xbf16>
    %cst_113 = arith.constant dense<0.000000e+00> : vector<8x256xf32>
    %345 = tpu.matmul %344, %7, %cst_113 {dimension_numbers = #tpu.dot_dimension_numbers<[1], [0], [0], [1], [0, 0, 1, 1], [], []>} : vector<8x64xbf16>, vector<64x256xbf16>, vector<8x256xf32> -> vector<8x256xf32>
    %346 = arith.addf %343, %345 : vector<8x256xf32>
    %347 = math.tanh %346 : vector<8x256xf32>
    %348 = arith.mulf %347, %15 : vector<8x256xf32>
    %349 = arith.addf %348, %20 : vector<8x256xf32>
    %350 = vector.extract_strided_slice %349 {offsets = [0, 0], sizes = [8, 64], strides = [1, 1]} : vector<8x256xf32> to vector<8x64xf32>
    %351 = vector.extract_strided_slice %349 {offsets = [0, 128], sizes = [8, 64], strides = [1, 1]} : vector<8x256xf32> to vector<8x64xf32>
    %c192_i32_114 = arith.constant 192 : i32
    %352 = tpu.dynamic_rotate %349 by %c192_i32_114 dim 1 : vector<8x256xf32>, i32 -> vector<8x256xf32>
    %353 = vector.extract_strided_slice %352 {offsets = [0, 0], sizes = [8, 64], strides = [1, 1]} : vector<8x256xf32> to vector<8x64xf32>
    %354 = vector.extract_strided_slice %352 {offsets = [0, 128], sizes = [8, 64], strides = [1, 1]} : vector<8x256xf32> to vector<8x64xf32>
    %355 = arith.mulf %353, %337 : vector<8x64xf32>
    %356 = arith.mulf %350, %354 : vector<8x64xf32>
    %357 = arith.addf %355, %356 : vector<8x64xf32>
    %358 = math.tanh %357 : vector<8x64xf32>
    %359 = arith.mulf %351, %358 : vector<8x64xf32>
    %cst_115 = arith.constant 0.000000e+00 : f32
    %360 = vector.broadcast %cst_115 : f32 to vector<8x64xf32>
    %361 = arith.maximumf %359, %360 : vector<8x64xf32>
    %c128_116 = arith.constant 128 : index
    %c0_117 = arith.constant 0 : index
    %362 = vector.load %arg13[%c128_116, %c0_117] : memref<184x64xf32, #tpu.memory_space<vmem>>, vector<8x64xf32>
    tpu.vector_store %arg13[%c128_116, %c0_117], %361 {strides = array<i32>} : memref<184x64xf32, #tpu.memory_space<vmem>>, vector<8x64xf32>,
    %c136 = arith.constant 136 : index
    %c0_118 = arith.constant 0 : index
    %363 = vector.load %arg12[%c136, %c0_118] : memref<184x256xf32, #tpu.memory_space<vmem>>, vector<8x256xf32>
    %364 = arith.truncf %359 : vector<8x64xf32> to vector<8x64xbf16>
    %cst_119 = arith.constant dense<0.000000e+00> : vector<8x256xf32>
    %365 = tpu.matmul %364, %7, %cst_119 {dimension_numbers = #tpu.dot_dimension_numbers<[1], [0], [0], [1], [0, 0, 1, 1], [], []>} : vector<8x64xbf16>, vector<64x256xbf16>, vector<8x256xf32> -> vector<8x256xf32>
    %366 = arith.addf %363, %365 : vector<8x256xf32>
    %367 = math.tanh %366 : vector<8x256xf32>
    %368 = arith.mulf %367, %15 : vector<8x256xf32>
    %369 = arith.addf %368, %20 : vector<8x256xf32>
    %370 = vector.extract_strided_slice %369 {offsets = [0, 0], sizes = [8, 64], strides = [1, 1]} : vector<8x256xf32> to vector<8x64xf32>
    %371 = vector.extract_strided_slice %369 {offsets = [0, 128], sizes = [8, 64], strides = [1, 1]} : vector<8x256xf32> to vector<8x64xf32>
    %c192_i32_120 = arith.constant 192 : i32
    %372 = tpu.dynamic_rotate %369 by %c192_i32_120 dim 1 : vector<8x256xf32>, i32 -> vector<8x256xf32>
    %373 = vector.extract_strided_slice %372 {offsets = [0, 0], sizes = [8, 64], strides = [1, 1]} : vector<8x256xf32> to vector<8x64xf32>
    %374 = vector.extract_strided_slice %372 {offsets = [0, 128], sizes = [8, 64], strides = [1, 1]} : vector<8x256xf32> to vector<8x64xf32>
    %375 = arith.mulf %373, %357 : vector<8x64xf32>
    %376 = arith.mulf %370, %374 : vector<8x64xf32>
    %377 = arith.addf %375, %376 : vector<8x64xf32>
    %378 = math.tanh %377 : vector<8x64xf32>
    %379 = arith.mulf %371, %378 : vector<8x64xf32>
    %cst_121 = arith.constant 0.000000e+00 : f32
    %380 = vector.broadcast %cst_121 : f32 to vector<8x64xf32>
    %381 = arith.maximumf %379, %380 : vector<8x64xf32>
    %c136_122 = arith.constant 136 : index
    %c0_123 = arith.constant 0 : index
    %382 = vector.load %arg13[%c136_122, %c0_123] : memref<184x64xf32, #tpu.memory_space<vmem>>, vector<8x64xf32>
    tpu.vector_store %arg13[%c136_122, %c0_123], %381 {strides = array<i32>} : memref<184x64xf32, #tpu.memory_space<vmem>>, vector<8x64xf32>,
    %c144 = arith.constant 144 : index
    %c0_124 = arith.constant 0 : index
    %383 = vector.load %arg12[%c144, %c0_124] : memref<184x256xf32, #tpu.memory_space<vmem>>, vector<8x256xf32>
    %384 = arith.truncf %379 : vector<8x64xf32> to vector<8x64xbf16>
    %cst_125 = arith.constant dense<0.000000e+00> : vector<8x256xf32>
    %385 = tpu.matmul %384, %7, %cst_125 {dimension_numbers = #tpu.dot_dimension_numbers<[1], [0], [0], [1], [0, 0, 1, 1], [], []>} : vector<8x64xbf16>, vector<64x256xbf16>, vector<8x256xf32> -> vector<8x256xf32>
    %386 = arith.addf %383, %385 : vector<8x256xf32>
    %387 = math.tanh %386 : vector<8x256xf32>
    %388 = arith.mulf %387, %15 : vector<8x256xf32>
    %389 = arith.addf %388, %20 : vector<8x256xf32>
    %390 = vector.extract_strided_slice %389 {offsets = [0, 0], sizes = [8, 64], strides = [1, 1]} : vector<8x256xf32> to vector<8x64xf32>
    %391 = vector.extract_strided_slice %389 {offsets = [0, 128], sizes = [8, 64], strides = [1, 1]} : vector<8x256xf32> to vector<8x64xf32>
    %c192_i32_126 = arith.constant 192 : i32
    %392 = tpu.dynamic_rotate %389 by %c192_i32_126 dim 1 : vector<8x256xf32>, i32 -> vector<8x256xf32>
    %393 = vector.extract_strided_slice %392 {offsets = [0, 0], sizes = [8, 64], strides = [1, 1]} : vector<8x256xf32> to vector<8x64xf32>
    %394 = vector.extract_strided_slice %392 {offsets = [0, 128], sizes = [8, 64], strides = [1, 1]} : vector<8x256xf32> to vector<8x64xf32>
    %395 = arith.mulf %393, %377 : vector<8x64xf32>
    %396 = arith.mulf %390, %394 : vector<8x64xf32>
    %397 = arith.addf %395, %396 : vector<8x64xf32>
    %398 = math.tanh %397 : vector<8x64xf32>
    %399 = arith.mulf %391, %398 : vector<8x64xf32>
    %cst_127 = arith.constant 0.000000e+00 : f32
    %400 = vector.broadcast %cst_127 : f32 to vector<8x64xf32>
    %401 = arith.maximumf %399, %400 : vector<8x64xf32>
    %c144_128 = arith.constant 144 : index
    %c0_129 = arith.constant 0 : index
    %402 = vector.load %arg13[%c144_128, %c0_129] : memref<184x64xf32, #tpu.memory_space<vmem>>, vector<8x64xf32>
    tpu.vector_store %arg13[%c144_128, %c0_129], %401 {strides = array<i32>} : memref<184x64xf32, #tpu.memory_space<vmem>>, vector<8x64xf32>,
    %c152 = arith.constant 152 : index
    %c0_130 = arith.constant 0 : index
    %403 = vector.load %arg12[%c152, %c0_130] : memref<184x256xf32, #tpu.memory_space<vmem>>, vector<8x256xf32>
    %404 = arith.truncf %399 : vector<8x64xf32> to vector<8x64xbf16>
    %cst_131 = arith.constant dense<0.000000e+00> : vector<8x256xf32>
    %405 = tpu.matmul %404, %7, %cst_131 {dimension_numbers = #tpu.dot_dimension_numbers<[1], [0], [0], [1], [0, 0, 1, 1], [], []>} : vector<8x64xbf16>, vector<64x256xbf16>, vector<8x256xf32> -> vector<8x256xf32>
    %406 = arith.addf %403, %405 : vector<8x256xf32>
    %407 = math.tanh %406 : vector<8x256xf32>
    %408 = arith.mulf %407, %15 : vector<8x256xf32>
    %409 = arith.addf %408, %20 : vector<8x256xf32>
    %410 = vector.extract_strided_slice %409 {offsets = [0, 0], sizes = [8, 64], strides = [1, 1]} : vector<8x256xf32> to vector<8x64xf32>
    %411 = vector.extract_strided_slice %409 {offsets = [0, 128], sizes = [8, 64], strides = [1, 1]} : vector<8x256xf32> to vector<8x64xf32>
    %c192_i32_132 = arith.constant 192 : i32
    %412 = tpu.dynamic_rotate %409 by %c192_i32_132 dim 1 : vector<8x256xf32>, i32 -> vector<8x256xf32>
    %413 = vector.extract_strided_slice %412 {offsets = [0, 0], sizes = [8, 64], strides = [1, 1]} : vector<8x256xf32> to vector<8x64xf32>
    %414 = vector.extract_strided_slice %412 {offsets = [0, 128], sizes = [8, 64], strides = [1, 1]} : vector<8x256xf32> to vector<8x64xf32>
    %415 = arith.mulf %413, %397 : vector<8x64xf32>
    %416 = arith.mulf %410, %414 : vector<8x64xf32>
    %417 = arith.addf %415, %416 : vector<8x64xf32>
    %418 = math.tanh %417 : vector<8x64xf32>
    %419 = arith.mulf %411, %418 : vector<8x64xf32>
    %cst_133 = arith.constant 0.000000e+00 : f32
    %420 = vector.broadcast %cst_133 : f32 to vector<8x64xf32>
    %421 = arith.maximumf %419, %420 : vector<8x64xf32>
    %c152_134 = arith.constant 152 : index
    %c0_135 = arith.constant 0 : index
    %422 = vector.load %arg13[%c152_134, %c0_135] : memref<184x64xf32, #tpu.memory_space<vmem>>, vector<8x64xf32>
    tpu.vector_store %arg13[%c152_134, %c0_135], %421 {strides = array<i32>} : memref<184x64xf32, #tpu.memory_space<vmem>>, vector<8x64xf32>,
    %c160 = arith.constant 160 : index
    %c0_136 = arith.constant 0 : index
    %423 = vector.load %arg12[%c160, %c0_136] : memref<184x256xf32, #tpu.memory_space<vmem>>, vector<8x256xf32>
    %424 = arith.truncf %419 : vector<8x64xf32> to vector<8x64xbf16>
    %cst_137 = arith.constant dense<0.000000e+00> : vector<8x256xf32>
    %425 = tpu.matmul %424, %7, %cst_137 {dimension_numbers = #tpu.dot_dimension_numbers<[1], [0], [0], [1], [0, 0, 1, 1], [], []>} : vector<8x64xbf16>, vector<64x256xbf16>, vector<8x256xf32> -> vector<8x256xf32>
    %426 = arith.addf %423, %425 : vector<8x256xf32>
    %427 = math.tanh %426 : vector<8x256xf32>
    %428 = arith.mulf %427, %15 : vector<8x256xf32>
    %429 = arith.addf %428, %20 : vector<8x256xf32>
    %430 = vector.extract_strided_slice %429 {offsets = [0, 0], sizes = [8, 64], strides = [1, 1]} : vector<8x256xf32> to vector<8x64xf32>
    %431 = vector.extract_strided_slice %429 {offsets = [0, 128], sizes = [8, 64], strides = [1, 1]} : vector<8x256xf32> to vector<8x64xf32>
    %c192_i32_138 = arith.constant 192 : i32
    %432 = tpu.dynamic_rotate %429 by %c192_i32_138 dim 1 : vector<8x256xf32>, i32 -> vector<8x256xf32>
    %433 = vector.extract_strided_slice %432 {offsets = [0, 0], sizes = [8, 64], strides = [1, 1]} : vector<8x256xf32> to vector<8x64xf32>
    %434 = vector.extract_strided_slice %432 {offsets = [0, 128], sizes = [8, 64], strides = [1, 1]} : vector<8x256xf32> to vector<8x64xf32>
    %435 = arith.mulf %433, %417 : vector<8x64xf32>
    %436 = arith.mulf %430, %434 : vector<8x64xf32>
    %437 = arith.addf %435, %436 : vector<8x64xf32>
    %438 = math.tanh %437 : vector<8x64xf32>
    %439 = arith.mulf %431, %438 : vector<8x64xf32>
    %cst_139 = arith.constant 0.000000e+00 : f32
    %440 = vector.broadcast %cst_139 : f32 to vector<8x64xf32>
    %441 = arith.maximumf %439, %440 : vector<8x64xf32>
    %c160_140 = arith.constant 160 : index
    %c0_141 = arith.constant 0 : index
    %442 = vector.load %arg13[%c160_140, %c0_141] : memref<184x64xf32, #tpu.memory_space<vmem>>, vector<8x64xf32>
    tpu.vector_store %arg13[%c160_140, %c0_141], %441 {strides = array<i32>} : memref<184x64xf32, #tpu.memory_space<vmem>>, vector<8x64xf32>,
    %c168 = arith.constant 168 : index
    %c0_142 = arith.constant 0 : index
    %443 = vector.load %arg12[%c168, %c0_142] : memref<184x256xf32, #tpu.memory_space<vmem>>, vector<8x256xf32>
    %444 = arith.truncf %439 : vector<8x64xf32> to vector<8x64xbf16>
    %cst_143 = arith.constant dense<0.000000e+00> : vector<8x256xf32>
    %445 = tpu.matmul %444, %7, %cst_143 {dimension_numbers = #tpu.dot_dimension_numbers<[1], [0], [0], [1], [0, 0, 1, 1], [], []>} : vector<8x64xbf16>, vector<64x256xbf16>, vector<8x256xf32> -> vector<8x256xf32>
    %446 = arith.addf %443, %445 : vector<8x256xf32>
    %447 = math.tanh %446 : vector<8x256xf32>
    %448 = arith.mulf %447, %15 : vector<8x256xf32>
    %449 = arith.addf %448, %20 : vector<8x256xf32>
    %450 = vector.extract_strided_slice %449 {offsets = [0, 0], sizes = [8, 64], strides = [1, 1]} : vector<8x256xf32> to vector<8x64xf32>
    %451 = vector.extract_strided_slice %449 {offsets = [0, 128], sizes = [8, 64], strides = [1, 1]} : vector<8x256xf32> to vector<8x64xf32>
    %c192_i32_144 = arith.constant 192 : i32
    %452 = tpu.dynamic_rotate %449 by %c192_i32_144 dim 1 : vector<8x256xf32>, i32 -> vector<8x256xf32>
    %453 = vector.extract_strided_slice %452 {offsets = [0, 0], sizes = [8, 64], strides = [1, 1]} : vector<8x256xf32> to vector<8x64xf32>
    %454 = vector.extract_strided_slice %452 {offsets = [0, 128], sizes = [8, 64], strides = [1, 1]} : vector<8x256xf32> to vector<8x64xf32>
    %455 = arith.mulf %453, %437 : vector<8x64xf32>
    %456 = arith.mulf %450, %454 : vector<8x64xf32>
    %457 = arith.addf %455, %456 : vector<8x64xf32>
    %458 = math.tanh %457 : vector<8x64xf32>
    %459 = arith.mulf %451, %458 : vector<8x64xf32>
    %cst_145 = arith.constant 0.000000e+00 : f32
    %460 = vector.broadcast %cst_145 : f32 to vector<8x64xf32>
    %461 = arith.maximumf %459, %460 : vector<8x64xf32>
    %c168_146 = arith.constant 168 : index
    %c0_147 = arith.constant 0 : index
    %462 = vector.load %arg13[%c168_146, %c0_147] : memref<184x64xf32, #tpu.memory_space<vmem>>, vector<8x64xf32>
    tpu.vector_store %arg13[%c168_146, %c0_147], %461 {strides = array<i32>} : memref<184x64xf32, #tpu.memory_space<vmem>>, vector<8x64xf32>,
    %c176 = arith.constant 176 : index
    %c0_148 = arith.constant 0 : index
    %463 = vector.load %arg12[%c176, %c0_148] : memref<184x256xf32, #tpu.memory_space<vmem>>, vector<8x256xf32>
    %464 = arith.truncf %459 : vector<8x64xf32> to vector<8x64xbf16>
    %cst_149 = arith.constant dense<0.000000e+00> : vector<8x256xf32>
    %465 = tpu.matmul %464, %7, %cst_149 {dimension_numbers = #tpu.dot_dimension_numbers<[1], [0], [0], [1], [0, 0, 1, 1], [], []>} : vector<8x64xbf16>, vector<64x256xbf16>, vector<8x256xf32> -> vector<8x256xf32>
    %466 = arith.addf %463, %465 : vector<8x256xf32>
    %467 = math.tanh %466 : vector<8x256xf32>
    %468 = arith.mulf %467, %15 : vector<8x256xf32>
    %469 = arith.addf %468, %20 : vector<8x256xf32>
    %470 = vector.extract_strided_slice %469 {offsets = [0, 0], sizes = [8, 64], strides = [1, 1]} : vector<8x256xf32> to vector<8x64xf32>
    %471 = vector.extract_strided_slice %469 {offsets = [0, 128], sizes = [8, 64], strides = [1, 1]} : vector<8x256xf32> to vector<8x64xf32>
    %c192_i32_150 = arith.constant 192 : i32
    %472 = tpu.dynamic_rotate %469 by %c192_i32_150 dim 1 : vector<8x256xf32>, i32 -> vector<8x256xf32>
    %473 = vector.extract_strided_slice %472 {offsets = [0, 0], sizes = [8, 64], strides = [1, 1]} : vector<8x256xf32> to vector<8x64xf32>
    %474 = vector.extract_strided_slice %472 {offsets = [0, 128], sizes = [8, 64], strides = [1, 1]} : vector<8x256xf32> to vector<8x64xf32>
    %475 = arith.mulf %473, %457 : vector<8x64xf32>
    %476 = arith.mulf %470, %474 : vector<8x64xf32>
    %477 = arith.addf %475, %476 : vector<8x64xf32>
    %478 = math.tanh %477 : vector<8x64xf32>
    %479 = arith.mulf %471, %478 : vector<8x64xf32>
    %cst_151 = arith.constant 0.000000e+00 : f32
    %480 = vector.broadcast %cst_151 : f32 to vector<8x64xf32>
    %481 = arith.maximumf %479, %480 : vector<8x64xf32>
    %c176_152 = arith.constant 176 : index
    %c0_153 = arith.constant 0 : index
    %482 = vector.load %arg13[%c176_152, %c0_153] : memref<184x64xf32, #tpu.memory_space<vmem>>, vector<8x64xf32>
    tpu.vector_store %arg13[%c176_152, %c0_153], %481 {strides = array<i32>} : memref<184x64xf32, #tpu.memory_space<vmem>>, vector<8x64xf32>,
    %c0_154 = arith.constant 0 : index
    %c0_155 = arith.constant 0 : index
    %483 = vector.load %arg5[%c0_154, %c0_155] : memref<1x128xf32, #tpu.memory_space<vmem>>, vector<1x128xf32>
    %484 = vector.shape_cast %483 : vector<1x128xf32> to vector<1x128xf32>
    %485 = vector.broadcast %484 : vector<1x128xf32> to vector<8x128xf32>
    %c0_156 = arith.constant 0 : index
    %c0_157 = arith.constant 0 : index
    %486 = vector.load %arg13[%c0_156, %c0_157] : memref<184x64xf32, #tpu.memory_space<vmem>>, vector<8x64xf32>
    %487 = arith.truncf %486 : vector<8x64xf32> to vector<8x64xbf16>
    %c0_158 = arith.constant 0 : index
    %c0_159 = arith.constant 0 : index
    %488 = vector.load %arg4[%c0_158, %c0_159] : memref<1472x128xbf16, #tpu.memory_space<vmem>>, vector<64x128xbf16>
    %cst_160 = arith.constant dense<0.000000e+00> : vector<8x128xf32>
    %489 = tpu.matmul %487, %488, %cst_160 {dimension_numbers = #tpu.dot_dimension_numbers<[1], [0], [0], [1], [0, 0, 1, 1], [], []>} : vector<8x64xbf16>, vector<64x128xbf16>, vector<8x128xf32> -> vector<8x128xf32>
    %490 = arith.addf %485, %489 : vector<8x128xf32>
    %c8_161 = arith.constant 8 : index
    %c0_162 = arith.constant 0 : index
    %491 = vector.load %arg13[%c8_161, %c0_162] : memref<184x64xf32, #tpu.memory_space<vmem>>, vector<8x64xf32>
    %492 = arith.truncf %491 : vector<8x64xf32> to vector<8x64xbf16>
    %c64_163 = arith.constant 64 : index
    %c0_164 = arith.constant 0 : index
    %493 = vector.load %arg4[%c64_163, %c0_164] : memref<1472x128xbf16, #tpu.memory_space<vmem>>, vector<64x128xbf16>
    %cst_165 = arith.constant dense<0.000000e+00> : vector<8x128xf32>
    %494 = tpu.matmul %492, %493, %cst_165 {dimension_numbers = #tpu.dot_dimension_numbers<[1], [0], [0], [1], [0, 0, 1, 1], [], []>} : vector<8x64xbf16>, vector<64x128xbf16>, vector<8x128xf32> -> vector<8x128xf32>
    %495 = arith.addf %490, %494 : vector<8x128xf32>
    %c16_166 = arith.constant 16 : index
    %c0_167 = arith.constant 0 : index
    %496 = vector.load %arg13[%c16_166, %c0_167] : memref<184x64xf32, #tpu.memory_space<vmem>>, vector<8x64xf32>
    %497 = arith.truncf %496 : vector<8x64xf32> to vector<8x64xbf16>
    %c128_168 = arith.constant 128 : index
    %c0_169 = arith.constant 0 : index
    %498 = vector.load %arg4[%c128_168, %c0_169] : memref<1472x128xbf16, #tpu.memory_space<vmem>>, vector<64x128xbf16>
    %cst_170 = arith.constant dense<0.000000e+00> : vector<8x128xf32>
    %499 = tpu.matmul %497, %498, %cst_170 {dimension_numbers = #tpu.dot_dimension_numbers<[1], [0], [0], [1], [0, 0, 1, 1], [], []>} : vector<8x64xbf16>, vector<64x128xbf16>, vector<8x128xf32> -> vector<8x128xf32>
    %500 = arith.addf %495, %499 : vector<8x128xf32>
    %c24_171 = arith.constant 24 : index
    %c0_172 = arith.constant 0 : index
    %501 = vector.load %arg13[%c24_171, %c0_172] : memref<184x64xf32, #tpu.memory_space<vmem>>, vector<8x64xf32>
    %502 = arith.truncf %501 : vector<8x64xf32> to vector<8x64xbf16>
    %c192 = arith.constant 192 : index
    %c0_173 = arith.constant 0 : index
    %503 = vector.load %arg4[%c192, %c0_173] : memref<1472x128xbf16, #tpu.memory_space<vmem>>, vector<64x128xbf16>
    %cst_174 = arith.constant dense<0.000000e+00> : vector<8x128xf32>
    %504 = tpu.matmul %502, %503, %cst_174 {dimension_numbers = #tpu.dot_dimension_numbers<[1], [0], [0], [1], [0, 0, 1, 1], [], []>} : vector<8x64xbf16>, vector<64x128xbf16>, vector<8x128xf32> -> vector<8x128xf32>
    %505 = arith.addf %500, %504 : vector<8x128xf32>
    %c32_175 = arith.constant 32 : index
    %c0_176 = arith.constant 0 : index
    %506 = vector.load %arg13[%c32_175, %c0_176] : memref<184x64xf32, #tpu.memory_space<vmem>>, vector<8x64xf32>
    %507 = arith.truncf %506 : vector<8x64xf32> to vector<8x64xbf16>
    %c256 = arith.constant 256 : index
    %c0_177 = arith.constant 0 : index
    %508 = vector.load %arg4[%c256, %c0_177] : memref<1472x128xbf16, #tpu.memory_space<vmem>>, vector<64x128xbf16>
    %cst_178 = arith.constant dense<0.000000e+00> : vector<8x128xf32>
    %509 = tpu.matmul %507, %508, %cst_178 {dimension_numbers = #tpu.dot_dimension_numbers<[1], [0], [0], [1], [0, 0, 1, 1], [], []>} : vector<8x64xbf16>, vector<64x128xbf16>, vector<8x128xf32> -> vector<8x128xf32>
    %510 = arith.addf %505, %509 : vector<8x128xf32>
    %c40_179 = arith.constant 40 : index
    %c0_180 = arith.constant 0 : index
    %511 = vector.load %arg13[%c40_179, %c0_180] : memref<184x64xf32, #tpu.memory_space<vmem>>, vector<8x64xf32>
    %512 = arith.truncf %511 : vector<8x64xf32> to vector<8x64xbf16>
    %c320 = arith.constant 320 : index
    %c0_181 = arith.constant 0 : index
    %513 = vector.load %arg4[%c320, %c0_181] : memref<1472x128xbf16, #tpu.memory_space<vmem>>, vector<64x128xbf16>
    %cst_182 = arith.constant dense<0.000000e+00> : vector<8x128xf32>
    %514 = tpu.matmul %512, %513, %cst_182 {dimension_numbers = #tpu.dot_dimension_numbers<[1], [0], [0], [1], [0, 0, 1, 1], [], []>} : vector<8x64xbf16>, vector<64x128xbf16>, vector<8x128xf32> -> vector<8x128xf32>
    %515 = arith.addf %510, %514 : vector<8x128xf32>
    %c48_183 = arith.constant 48 : index
    %c0_184 = arith.constant 0 : index
    %516 = vector.load %arg13[%c48_183, %c0_184] : memref<184x64xf32, #tpu.memory_space<vmem>>, vector<8x64xf32>
    %517 = arith.truncf %516 : vector<8x64xf32> to vector<8x64xbf16>
    %c384 = arith.constant 384 : index
    %c0_185 = arith.constant 0 : index
    %518 = vector.load %arg4[%c384, %c0_185] : memref<1472x128xbf16, #tpu.memory_space<vmem>>, vector<64x128xbf16>
    %cst_186 = arith.constant dense<0.000000e+00> : vector<8x128xf32>
    %519 = tpu.matmul %517, %518, %cst_186 {dimension_numbers = #tpu.dot_dimension_numbers<[1], [0], [0], [1], [0, 0, 1, 1], [], []>} : vector<8x64xbf16>, vector<64x128xbf16>, vector<8x128xf32> -> vector<8x128xf32>
    %520 = arith.addf %515, %519 : vector<8x128xf32>
    %c56_187 = arith.constant 56 : index
    %c0_188 = arith.constant 0 : index
    %521 = vector.load %arg13[%c56_187, %c0_188] : memref<184x64xf32, #tpu.memory_space<vmem>>, vector<8x64xf32>
    %522 = arith.truncf %521 : vector<8x64xf32> to vector<8x64xbf16>
    %c448 = arith.constant 448 : index
    %c0_189 = arith.constant 0 : index
    %523 = vector.load %arg4[%c448, %c0_189] : memref<1472x128xbf16, #tpu.memory_space<vmem>>, vector<64x128xbf16>
    %cst_190 = arith.constant dense<0.000000e+00> : vector<8x128xf32>
    %524 = tpu.matmul %522, %523, %cst_190 {dimension_numbers = #tpu.dot_dimension_numbers<[1], [0], [0], [1], [0, 0, 1, 1], [], []>} : vector<8x64xbf16>, vector<64x128xbf16>, vector<8x128xf32> -> vector<8x128xf32>
    %525 = arith.addf %520, %524 : vector<8x128xf32>
    %c64_191 = arith.constant 64 : index
    %c0_192 = arith.constant 0 : index
    %526 = vector.load %arg13[%c64_191, %c0_192] : memref<184x64xf32, #tpu.memory_space<vmem>>, vector<8x64xf32>
    %527 = arith.truncf %526 : vector<8x64xf32> to vector<8x64xbf16>
    %c512 = arith.constant 512 : index
    %c0_193 = arith.constant 0 : index
    %528 = vector.load %arg4[%c512, %c0_193] : memref<1472x128xbf16, #tpu.memory_space<vmem>>, vector<64x128xbf16>
    %cst_194 = arith.constant dense<0.000000e+00> : vector<8x128xf32>
    %529 = tpu.matmul %527, %528, %cst_194 {dimension_numbers = #tpu.dot_dimension_numbers<[1], [0], [0], [1], [0, 0, 1, 1], [], []>} : vector<8x64xbf16>, vector<64x128xbf16>, vector<8x128xf32> -> vector<8x128xf32>
    %530 = arith.addf %525, %529 : vector<8x128xf32>
    %c72_195 = arith.constant 72 : index
    %c0_196 = arith.constant 0 : index
    %531 = vector.load %arg13[%c72_195, %c0_196] : memref<184x64xf32, #tpu.memory_space<vmem>>, vector<8x64xf32>
    %532 = arith.truncf %531 : vector<8x64xf32> to vector<8x64xbf16>
    %c576 = arith.constant 576 : index
    %c0_197 = arith.constant 0 : index
    %533 = vector.load %arg4[%c576, %c0_197] : memref<1472x128xbf16, #tpu.memory_space<vmem>>, vector<64x128xbf16>
    %cst_198 = arith.constant dense<0.000000e+00> : vector<8x128xf32>
    %534 = tpu.matmul %532, %533, %cst_198 {dimension_numbers = #tpu.dot_dimension_numbers<[1], [0], [0], [1], [0, 0, 1, 1], [], []>} : vector<8x64xbf16>, vector<64x128xbf16>, vector<8x128xf32> -> vector<8x128xf32>
    %535 = arith.addf %530, %534 : vector<8x128xf32>
    %c80_199 = arith.constant 80 : index
    %c0_200 = arith.constant 0 : index
    %536 = vector.load %arg13[%c80_199, %c0_200] : memref<184x64xf32, #tpu.memory_space<vmem>>, vector<8x64xf32>
    %537 = arith.truncf %536 : vector<8x64xf32> to vector<8x64xbf16>
    %c640 = arith.constant 640 : index
    %c0_201 = arith.constant 0 : index
    %538 = vector.load %arg4[%c640, %c0_201] : memref<1472x128xbf16, #tpu.memory_space<vmem>>, vector<64x128xbf16>
    %cst_202 = arith.constant dense<0.000000e+00> : vector<8x128xf32>
    %539 = tpu.matmul %537, %538, %cst_202 {dimension_numbers = #tpu.dot_dimension_numbers<[1], [0], [0], [1], [0, 0, 1, 1], [], []>} : vector<8x64xbf16>, vector<64x128xbf16>, vector<8x128xf32> -> vector<8x128xf32>
    %540 = arith.addf %535, %539 : vector<8x128xf32>
    %c88_203 = arith.constant 88 : index
    %c0_204 = arith.constant 0 : index
    %541 = vector.load %arg13[%c88_203, %c0_204] : memref<184x64xf32, #tpu.memory_space<vmem>>, vector<8x64xf32>
    %542 = arith.truncf %541 : vector<8x64xf32> to vector<8x64xbf16>
    %c704 = arith.constant 704 : index
    %c0_205 = arith.constant 0 : index
    %543 = vector.load %arg4[%c704, %c0_205] : memref<1472x128xbf16, #tpu.memory_space<vmem>>, vector<64x128xbf16>
    %cst_206 = arith.constant dense<0.000000e+00> : vector<8x128xf32>
    %544 = tpu.matmul %542, %543, %cst_206 {dimension_numbers = #tpu.dot_dimension_numbers<[1], [0], [0], [1], [0, 0, 1, 1], [], []>} : vector<8x64xbf16>, vector<64x128xbf16>, vector<8x128xf32> -> vector<8x128xf32>
    %545 = arith.addf %540, %544 : vector<8x128xf32>
    %c96_207 = arith.constant 96 : index
    %c0_208 = arith.constant 0 : index
    %546 = vector.load %arg13[%c96_207, %c0_208] : memref<184x64xf32, #tpu.memory_space<vmem>>, vector<8x64xf32>
    %547 = arith.truncf %546 : vector<8x64xf32> to vector<8x64xbf16>
    %c768 = arith.constant 768 : index
    %c0_209 = arith.constant 0 : index
    %548 = vector.load %arg4[%c768, %c0_209] : memref<1472x128xbf16, #tpu.memory_space<vmem>>, vector<64x128xbf16>
    %cst_210 = arith.constant dense<0.000000e+00> : vector<8x128xf32>
    %549 = tpu.matmul %547, %548, %cst_210 {dimension_numbers = #tpu.dot_dimension_numbers<[1], [0], [0], [1], [0, 0, 1, 1], [], []>} : vector<8x64xbf16>, vector<64x128xbf16>, vector<8x128xf32> -> vector<8x128xf32>
    %550 = arith.addf %545, %549 : vector<8x128xf32>
    %c104_211 = arith.constant 104 : index
    %c0_212 = arith.constant 0 : index
    %551 = vector.load %arg13[%c104_211, %c0_212] : memref<184x64xf32, #tpu.memory_space<vmem>>, vector<8x64xf32>
    %552 = arith.truncf %551 : vector<8x64xf32> to vector<8x64xbf16>
    %c832 = arith.constant 832 : index
    %c0_213 = arith.constant 0 : index
    %553 = vector.load %arg4[%c832, %c0_213] : memref<1472x128xbf16, #tpu.memory_space<vmem>>, vector<64x128xbf16>
    %cst_214 = arith.constant dense<0.000000e+00> : vector<8x128xf32>
    %554 = tpu.matmul %552, %553, %cst_214 {dimension_numbers = #tpu.dot_dimension_numbers<[1], [0], [0], [1], [0, 0, 1, 1], [], []>} : vector<8x64xbf16>, vector<64x128xbf16>, vector<8x128xf32> -> vector<8x128xf32>
    %555 = arith.addf %550, %554 : vector<8x128xf32>
    %c112_215 = arith.constant 112 : index
    %c0_216 = arith.constant 0 : index
    %556 = vector.load %arg13[%c112_215, %c0_216] : memref<184x64xf32, #tpu.memory_space<vmem>>, vector<8x64xf32>
    %557 = arith.truncf %556 : vector<8x64xf32> to vector<8x64xbf16>
    %c896 = arith.constant 896 : index
    %c0_217 = arith.constant 0 : index
    %558 = vector.load %arg4[%c896, %c0_217] : memref<1472x128xbf16, #tpu.memory_space<vmem>>, vector<64x128xbf16>
    %cst_218 = arith.constant dense<0.000000e+00> : vector<8x128xf32>
    %559 = tpu.matmul %557, %558, %cst_218 {dimension_numbers = #tpu.dot_dimension_numbers<[1], [0], [0], [1], [0, 0, 1, 1], [], []>} : vector<8x64xbf16>, vector<64x128xbf16>, vector<8x128xf32> -> vector<8x128xf32>
    %560 = arith.addf %555, %559 : vector<8x128xf32>
    %c120_219 = arith.constant 120 : index
    %c0_220 = arith.constant 0 : index
    %561 = vector.load %arg13[%c120_219, %c0_220] : memref<184x64xf32, #tpu.memory_space<vmem>>, vector<8x64xf32>
    %562 = arith.truncf %561 : vector<8x64xf32> to vector<8x64xbf16>
    %c960 = arith.constant 960 : index
    %c0_221 = arith.constant 0 : index
    %563 = vector.load %arg4[%c960, %c0_221] : memref<1472x128xbf16, #tpu.memory_space<vmem>>, vector<64x128xbf16>
    %cst_222 = arith.constant dense<0.000000e+00> : vector<8x128xf32>
    %564 = tpu.matmul %562, %563, %cst_222 {dimension_numbers = #tpu.dot_dimension_numbers<[1], [0], [0], [1], [0, 0, 1, 1], [], []>} : vector<8x64xbf16>, vector<64x128xbf16>, vector<8x128xf32> -> vector<8x128xf32>
    %565 = arith.addf %560, %564 : vector<8x128xf32>
    %c128_223 = arith.constant 128 : index
    %c0_224 = arith.constant 0 : index
    %566 = vector.load %arg13[%c128_223, %c0_224] : memref<184x64xf32, #tpu.memory_space<vmem>>, vector<8x64xf32>
    %567 = arith.truncf %566 : vector<8x64xf32> to vector<8x64xbf16>
    %c1024 = arith.constant 1024 : index
    %c0_225 = arith.constant 0 : index
    %568 = vector.load %arg4[%c1024, %c0_225] : memref<1472x128xbf16, #tpu.memory_space<vmem>>, vector<64x128xbf16>
    %cst_226 = arith.constant dense<0.000000e+00> : vector<8x128xf32>
    %569 = tpu.matmul %567, %568, %cst_226 {dimension_numbers = #tpu.dot_dimension_numbers<[1], [0], [0], [1], [0, 0, 1, 1], [], []>} : vector<8x64xbf16>, vector<64x128xbf16>, vector<8x128xf32> -> vector<8x128xf32>
    %570 = arith.addf %565, %569 : vector<8x128xf32>
    %c136_227 = arith.constant 136 : index
    %c0_228 = arith.constant 0 : index
    %571 = vector.load %arg13[%c136_227, %c0_228] : memref<184x64xf32, #tpu.memory_space<vmem>>, vector<8x64xf32>
    %572 = arith.truncf %571 : vector<8x64xf32> to vector<8x64xbf16>
    %c1088 = arith.constant 1088 : index
    %c0_229 = arith.constant 0 : index
    %573 = vector.load %arg4[%c1088, %c0_229] : memref<1472x128xbf16, #tpu.memory_space<vmem>>, vector<64x128xbf16>
    %cst_230 = arith.constant dense<0.000000e+00> : vector<8x128xf32>
    %574 = tpu.matmul %572, %573, %cst_230 {dimension_numbers = #tpu.dot_dimension_numbers<[1], [0], [0], [1], [0, 0, 1, 1], [], []>} : vector<8x64xbf16>, vector<64x128xbf16>, vector<8x128xf32> -> vector<8x128xf32>
    %575 = arith.addf %570, %574 : vector<8x128xf32>
    %c144_231 = arith.constant 144 : index
    %c0_232 = arith.constant 0 : index
    %576 = vector.load %arg13[%c144_231, %c0_232] : memref<184x64xf32, #tpu.memory_space<vmem>>, vector<8x64xf32>
    %577 = arith.truncf %576 : vector<8x64xf32> to vector<8x64xbf16>
    %c1152 = arith.constant 1152 : index
    %c0_233 = arith.constant 0 : index
    %578 = vector.load %arg4[%c1152, %c0_233] : memref<1472x128xbf16, #tpu.memory_space<vmem>>, vector<64x128xbf16>
    %cst_234 = arith.constant dense<0.000000e+00> : vector<8x128xf32>
    %579 = tpu.matmul %577, %578, %cst_234 {dimension_numbers = #tpu.dot_dimension_numbers<[1], [0], [0], [1], [0, 0, 1, 1], [], []>} : vector<8x64xbf16>, vector<64x128xbf16>, vector<8x128xf32> -> vector<8x128xf32>
    %580 = arith.addf %575, %579 : vector<8x128xf32>
    %c152_235 = arith.constant 152 : index
    %c0_236 = arith.constant 0 : index
    %581 = vector.load %arg13[%c152_235, %c0_236] : memref<184x64xf32, #tpu.memory_space<vmem>>, vector<8x64xf32>
    %582 = arith.truncf %581 : vector<8x64xf32> to vector<8x64xbf16>
    %c1216 = arith.constant 1216 : index
    %c0_237 = arith.constant 0 : index
    %583 = vector.load %arg4[%c1216, %c0_237] : memref<1472x128xbf16, #tpu.memory_space<vmem>>, vector<64x128xbf16>
    %cst_238 = arith.constant dense<0.000000e+00> : vector<8x128xf32>
    %584 = tpu.matmul %582, %583, %cst_238 {dimension_numbers = #tpu.dot_dimension_numbers<[1], [0], [0], [1], [0, 0, 1, 1], [], []>} : vector<8x64xbf16>, vector<64x128xbf16>, vector<8x128xf32> -> vector<8x128xf32>
    %585 = arith.addf %580, %584 : vector<8x128xf32>
    %c160_239 = arith.constant 160 : index
    %c0_240 = arith.constant 0 : index
    %586 = vector.load %arg13[%c160_239, %c0_240] : memref<184x64xf32, #tpu.memory_space<vmem>>, vector<8x64xf32>
    %587 = arith.truncf %586 : vector<8x64xf32> to vector<8x64xbf16>
    %c1280 = arith.constant 1280 : index
    %c0_241 = arith.constant 0 : index
    %588 = vector.load %arg4[%c1280, %c0_241] : memref<1472x128xbf16, #tpu.memory_space<vmem>>, vector<64x128xbf16>
    %cst_242 = arith.constant dense<0.000000e+00> : vector<8x128xf32>
    %589 = tpu.matmul %587, %588, %cst_242 {dimension_numbers = #tpu.dot_dimension_numbers<[1], [0], [0], [1], [0, 0, 1, 1], [], []>} : vector<8x64xbf16>, vector<64x128xbf16>, vector<8x128xf32> -> vector<8x128xf32>
    %590 = arith.addf %585, %589 : vector<8x128xf32>
    %c168_243 = arith.constant 168 : index
    %c0_244 = arith.constant 0 : index
    %591 = vector.load %arg13[%c168_243, %c0_244] : memref<184x64xf32, #tpu.memory_space<vmem>>, vector<8x64xf32>
    %592 = arith.truncf %591 : vector<8x64xf32> to vector<8x64xbf16>
    %c1344 = arith.constant 1344 : index
    %c0_245 = arith.constant 0 : index
    %593 = vector.load %arg4[%c1344, %c0_245] : memref<1472x128xbf16, #tpu.memory_space<vmem>>, vector<64x128xbf16>
    %cst_246 = arith.constant dense<0.000000e+00> : vector<8x128xf32>
    %594 = tpu.matmul %592, %593, %cst_246 {dimension_numbers = #tpu.dot_dimension_numbers<[1], [0], [0], [1], [0, 0, 1, 1], [], []>} : vector<8x64xbf16>, vector<64x128xbf16>, vector<8x128xf32> -> vector<8x128xf32>
    %595 = arith.addf %590, %594 : vector<8x128xf32>
    %c176_247 = arith.constant 176 : index
    %c0_248 = arith.constant 0 : index
    %596 = vector.load %arg13[%c176_247, %c0_248] : memref<184x64xf32, #tpu.memory_space<vmem>>, vector<8x64xf32>
    %597 = arith.truncf %596 : vector<8x64xf32> to vector<8x64xbf16>
    %c1408 = arith.constant 1408 : index
    %c0_249 = arith.constant 0 : index
    %598 = vector.load %arg4[%c1408, %c0_249] : memref<1472x128xbf16, #tpu.memory_space<vmem>>, vector<64x128xbf16>
    %cst_250 = arith.constant dense<0.000000e+00> : vector<8x128xf32>
    %599 = tpu.matmul %597, %598, %cst_250 {dimension_numbers = #tpu.dot_dimension_numbers<[1], [0], [0], [1], [0, 0, 1, 1], [], []>} : vector<8x64xbf16>, vector<64x128xbf16>, vector<8x128xf32> -> vector<8x128xf32>
    %600 = arith.addf %595, %599 : vector<8x128xf32>
    %601 = vector.extract_strided_slice %600 {offsets = [0, 0], sizes = [4, 128], strides = [1, 1]} : vector<8x128xf32> to vector<4x128xf32>
    %cst_251 = arith.constant dense<0.000000e+00> : vector<128xf32>
    %602 = vector.multi_reduction <add>, %601, %cst_251 [0] : vector<4x128xf32> to vector<128xf32>
    %603 = vector.shape_cast %602 : vector<128xf32> to vector<1x128xf32>
    %cst_252 = arith.constant 4.000000e+00 : f32
    %604 = vector.broadcast %cst_252 : f32 to vector<1x128xf32>
    %605 = arith.divf %603, %604 : vector<1x128xf32>
    %606 = vector.broadcast %605 : vector<1x128xf32> to vector<4x128xf32>
    %607 = arith.subf %601, %606 : vector<4x128xf32>
    %608 = arith.mulf %607, %607 : vector<4x128xf32>
    %cst_253 = arith.constant dense<0.000000e+00> : vector<128xf32>
    %609 = vector.multi_reduction <add>, %608, %cst_253 [0] : vector<4x128xf32> to vector<128xf32>
    %610 = vector.shape_cast %609 : vector<128xf32> to vector<1x128xf32>
    %cst_254 = arith.constant 4.000000e+00 : f32
    %611 = vector.broadcast %cst_254 : f32 to vector<1x128xf32>
    %612 = arith.divf %610, %611 : vector<1x128xf32>
    %613 = vector.broadcast %605 : vector<1x128xf32> to vector<8x128xf32>
    %614 = arith.subf %600, %613 : vector<8x128xf32>
    %cst_255 = arith.constant 9.99999974E-6 : f32
    %615 = vector.broadcast %cst_255 : f32 to vector<1x128xf32>
    %616 = arith.addf %612, %615 : vector<1x128xf32>
    %617 = math.rsqrt %616 : vector<1x128xf32>
    %618 = vector.broadcast %617 : vector<1x128xf32> to vector<8x128xf32>
    %619 = arith.mulf %614, %618 : vector<8x128xf32>
    %c0_256 = arith.constant 0 : index
    %c0_257 = arith.constant 0 : index
    %620 = vector.load %arg6[%c0_256, %c0_257] : memref<1x128xf32, #tpu.memory_space<vmem>>, vector<1x128xf32>
    %621 = vector.broadcast %620 : vector<1x128xf32> to vector<8x128xf32>
    %622 = arith.mulf %619, %621 : vector<8x128xf32>
    %c0_258 = arith.constant 0 : index
    %c0_259 = arith.constant 0 : index
    %623 = vector.load %arg7[%c0_258, %c0_259] : memref<1x128xf32, #tpu.memory_space<vmem>>, vector<1x128xf32>
    %624 = vector.broadcast %623 : vector<1x128xf32> to vector<8x128xf32>
    %625 = arith.addf %622, %624 : vector<8x128xf32>
    %cst_260 = arith.constant 0.000000e+00 : f32
    %626 = vector.broadcast %cst_260 : f32 to vector<8x128xf32>
    %627 = arith.maximumf %625, %626 : vector<8x128xf32>
    %c0_261 = arith.constant 0 : index
    %c0_262 = arith.constant 0 : index
    %628 = vector.load %arg11[%c0_261, %c0_262] : memref<8x128xf32, #tpu.memory_space<vmem>>, vector<8x128xf32>
    tpu.vector_store %arg11[%c0_261, %c0_262], %627 {strides = array<i32>} : memref<8x128xf32, #tpu.memory_space<vmem>>, vector<8x128xf32>,
    %629 = arith.truncf %627 : vector<8x128xf32> to vector<8x128xbf16>
    %c0_263 = arith.constant 0 : index
    %c0_264 = arith.constant 0 : index
    %630 = vector.load %arg8[%c0_263, %c0_264] : memref<128x128xbf16, #tpu.memory_space<vmem>>, vector<128x128xbf16>
    %cst_265 = arith.constant dense<0.000000e+00> : vector<8x128xf32>
    %631 = tpu.matmul %629, %630, %cst_265 {dimension_numbers = #tpu.dot_dimension_numbers<[1], [0], [0], [1], [0, 0, 1, 1], [], []>} : vector<8x128xbf16>, vector<128x128xbf16>, vector<8x128xf32> -> vector<8x128xf32>
    %c0_266 = arith.constant 0 : index
    %c0_267 = arith.constant 0 : index
    %632 = vector.load %arg9[%c0_266, %c0_267] : memref<1x128xf32, #tpu.memory_space<vmem>>, vector<1x128xf32>
    %633 = vector.broadcast %632 : vector<1x128xf32> to vector<8x128xf32>
    %634 = arith.addf %631, %633 : vector<8x128xf32>
    %c0_268 = arith.constant 0 : index
    %c0_269 = arith.constant 0 : index
    %635 = vector.load %arg10[%c0_268, %c0_269] : memref<8x128xf32, #tpu.memory_space<vmem>>, vector<8x128xf32>
    tpu.vector_store %arg10[%c0_268, %c0_269], %634 {strides = array<i32>} : memref<8x128xf32, #tpu.memory_space<vmem>>, vector<8x128xf32>,
    return
  }
}

</mosaic_0001>

<bundles_post_ra>
// kernel: lstm_forward.1
= control target key start
LH: loop header
LB: loop body
LE: loop exit
PB: predicated region body
PF: predicated region fallthrough
CT: control target
= control target key end

     0   :  { %17 = vsyncpa [#allocation5], 0  ;;  %s3844_s20 = smov [#allocation4]   ;;  %s3845_s22 = smov 64   ;;  %s4714_s0 = inlined_call_operand.vmem [shape: bf16[184,16], index: 0, kind: input, shape index: {}]   ;;  %s4715_s1 = inlined_call_operand.vmem [shape: bf16[16,256], index: 1, kind: input, shape index: {}]   ;;  %s4716_s2 = inlined_call_operand.vmem [shape: bf16[64,256], index: 2, kind: input, shape index: {}]   ;;  %s4717_s3 = inlined_call_operand.vmem [shape: f32[1,256], index: 3, kind: input, shape index: {}]   ;;  %s4718_s4 = inlined_call_operand.hbm [shape: bf16[1472,128], index: 4, kind: input, shape index: {}]   ;;  %s4719_s5 = inlined_call_operand.vmem [shape: f32[1,128], index: 5, kind: input, shape index: {}]   ;;  %s4720_s6 = inlined_call_operand.vmem [shape: f32[1,128], index: 6, kind: input, shape index: {}]   ;;  %s4721_s7 = inlined_call_operand.vmem [shape: f32[1,128], index: 7, kind: input, shape index: {}]   ;;  %s4722_s8 = inlined_call_operand.vmem [shape: bf16[128,128], index: 8, kind: input, shape index: {}]   ;;  %s4723_s9 = inlined_call_operand.vmem [shape: f32[1,128], index: 9, kind: input, shape index: {}]   ;;  %s4724_s10 = inlined_call_operand.vmem [shape: f32[8,128], index: 10, kind: output, shape index: {0}]   ;;  %s4725_s11 = inlined_call_operand.vmem [shape: f32[8,128], index: 11, kind: output, shape index: {1}]  }
   0x1   :  { %s30_s19 = sshll.u32 %s4718_s4, 4  ;;  %s32_s21 = sshll.u32 %s3844_s20, 4  ;;  %s31_s19 = int_to_ptr.hbm [resolvable:$true] %s30_s19  ;;  %s33_s21 = int_to_ptr.vmem [resolvable:$true] %s32_s21 }
   0x2   :  { %s3846_s23 = smov 4  }
   0x3   :  { %38 = dma.hbm_to_vmem [thread:$0]  %s31_s19, 11776, %s33_s21, [#allocation5], %s3845_s22, %s3845_s22, %s3846_s23  }
   0x4   :  { %3842 = dma.done.wait [#allocation5], 11776  }
   0x5   :  { %3843 = vsyncadd [#allocation5], 4294955520  ;;  %v3554_v0 = vld [vmem:[%s4715_s1 + $0x4] sm:$0xf]  ;;  %v3016_v1 = vld [vmem:[%s4715_s1 + $0x8] sm:$0xf0]  ;;  %v380_v42 = vlaneseq }
   0x6   :  { %v76_v2 = vld [vmem:[%s4714_s0 + $0x58] sm:$0xf]  ;;  %v3019_v3 = vor.u32 %v3554_v0, %v3016_v1  ;;  %v3070_v5 = vld [vmem:[%s4716_s2 + $0x30] sm:$0xf]  ;;  %v3562_v7 = vld [vmem:[%s4716_s2 + $0x34] sm:$0xf] }
   0x7   :  { %v130_v4 = vunpack.c.l.b16 %v76_v2  ;;  %v3563_v6 = vld [vmem:[%s4716_s2 + $0x34] sm:$0xf0]  ;;  %v3072_v9 = vld [vmem:[%s4716_s2 + $0x38] sm:$0xf0]  ;;  %v3062_v10 = vld [vmem:[%s4716_s2 + $0x20] sm:$0xf] }
   0x8   :  { %v3934_v8 = vor.u32 %v3563_v6, %v3070_v5  ;;  %v3561_v11 = vld [vmem:[%s4716_s2 + $0x24] sm:$0xf0]  ;;  %3664 = vmatpush.bf16.msra.mxu2 %v3019_v3  ;;  %vm153_vm0 = vcmask 130048   ;;  %v3947_v13 = vor.u32 %v3562_v7, %v3072_v9  ;;  %v3560_v14 = vld [vmem:[%s4716_s2 + $0x24] sm:$0xf]  ;;  %265 = vmatpush.bf16.msra.mxu1 %v3019_v3  ;;  %v3847_v34 = vmov 0  }
   0x9   :  { %v3945_v12 = vpack.c.b16 %v130_v4, %v130_v4  ;;  %v3064_v15 = vld [vmem:[%s4716_s2 + $0x28] sm:$0xf0]  ;;  %v3956_v16 = vor.u32 %v3561_v11, %v3062_v10  ;;  %v3014_v17 = vld [vmem:[%s4715_s1] sm:$0xf]  ;;  %v3555_v18 = vld [vmem:[%s4715_s1 + $0x4] sm:$0xf0] }
   0xa   :  { %452 = vmatpush.bf16.msra.mxu3 %v3947_v13  ;;  %v3965_v19 = vor.u32 %v3560_v14, %v3064_v15  ;;  %v3054_v20 = vld [vmem:[%s4716_s2 + $0x10] sm:$0xf]  ;;  %v3559_v21 = vld [vmem:[%s4716_s2 + $0x14] sm:$0xf0]  ;;  %v3015_v22 = vor.u32 %v3555_v18, %v3014_v17  ;;  %v3543_v23 = vld [vmem:[%s4714_s0] sm:$0xff]  ;;  %v4055_v47 = vand.u32 127, %v380_v42 }
   0xb   :  { %3043 = vmatmul.msk.bf16.vlgmr.msra.gmra.mxu2 %vm153_vm0, %v3945_v12  ;;  %v3558_v24 = vld [vmem:[%s4716_s2 + $0x14] sm:$0xf]  ;;  %v3056_v25 = vld [vmem:[%s4716_s2 + $0x18] sm:$0xf0]  ;;  %3032 = vmatmul.msk.bf16.vlgmr.msra.gmra.mxu1 %vm153_vm0, %v3543_v23  ;;  %v3987_v26 = vor.u32 %v3559_v21, %v3054_v20  ;;  %v3046_v28 = vld [vmem:[%s4716_s2] sm:$0xf] }
   0xc   :  { %439 = vmatpush.bf16.msrb.mxu2 %v3934_v8  ;;  %1089 = vmatpush.bf16.msrb.mxu1 %v3947_v13  ;;  %v3991_v27 = vor.u32 %v3558_v24, %v3056_v25  ;;  %v3557_v29 = vld [vmem:[%s4716_s2 + $0x4] sm:$0xf0]  ;;  %v3556_v30 = vld [vmem:[%s4716_s2 + $0x4] sm:$0xf]  ;;  %v3048_v31 = vld [vmem:[%s4716_s2 + $0x8] sm:$0xf0] }
   0xd   :  { %197 = vmatpush.bf16.msra.mxu0 %v3015_v22  ;;  %v4008_v32 = vor.u32 %v3557_v29, %v3046_v28  ;;  %v4012_v33 = vor.u32 %v3556_v30, %v3048_v31  ;;  %v79_v36 = vld [vmem:[%s4717_s3] sm:$0x3]  ;;  %v382_v50 = vadd.s32 128, %v4055_v47  ;;  %v3848_v56 = vmov 1.0  }
   0xe   :  { %453 = vmatpush.bf16.msra.mxu3 %v3965_v19  ;;  %v4049_v38 = vperm.slane %v79_v36, 0  ;;  %v4051_v39 = vperm.slane %v79_v36, 1  ;;  %v3849_v60 = vmov 0.0   ;;  %vm473_vm2 = vcmp.lt.s32.totalorder %v4055_v47, 64  ;;  %v3544_v36 = vld [vmem:[%s4714_s0 + $0x8] sm:$0xff] }
   0xf   :  { %vm384_vm1 = vcmp.lt.s32.totalorder %v382_v50, 192  ;;  %vm431_vm3 = vcmask 523264   ;;  %vm2826_vm4 = vcmask 1043456  }
  0x10   :  { %440 = vmatpush.bf16.msrb.mxu2 %v3956_v16  ;;  %1090 = vmatpush.bf16.msrb.mxu1 %v3965_v19  ;;  %v4058_v57 = vsel %vm384_vm1, 0.5, %v3848_v56  ;;  %v4062_v61 = vsel %vm384_vm1, 0.5, %v3849_v60 }
  0x11   :  { %1076 = vmatpush.bf16.msrb.mxu0 %v3934_v8 }
  0x12   :  { %3020 = vmatmul.msk.bf16.vlgmr.msra.gmra.mxu0 %vm153_vm0, %v3543_v23  ;;  %454 = vmatpush.bf16.msra.mxu3 %v3991_v27 }
  0x14   :  { %441 = vmatpush.bf16.msrb.mxu2 %v3987_v26  ;;  %1091 = vmatpush.bf16.msrb.mxu1 %v3991_v27 }
  0x15   :  { %1077 = vmatpush.bf16.msrb.mxu0 %v3956_v16 }
  0x16   :  { %455 = vmatpush.bf16.msra.mxu3 %v4012_v33 }
  0x18   :  { %442 = vmatpush.bf16.msrb.mxu2 %v4008_v32  ;;  %1092 = vmatpush.bf16.msrb.mxu1 %v4012_v33 }
  0x19   :  { %1078 = vmatpush.bf16.msrb.mxu0 %v3987_v26  ;;  %456 = vmatmul.bf16.vlgmr.msra.gmra.mxu3 %v3847_v34 }
  0x1a   :  { %506 = vmatpush.bf16.msrb.mxu3 %v3947_v13 }
  0x1b   :  { %443 = vmatmul.bf16.vlgmr.msrb.gmra.mxu2 %v3847_v34  ;;  %3033 = vmatmul.msk.bf16.gmra.mxu1 %vm153_vm0, %v3544_v36 }
  0x1c   :  { %493 = vmatpush.bf16.msra.mxu2 %v3934_v8  ;;  %1195 = vmatpush.bf16.msra.mxu1 %v3947_v13 }
  0x1d   :  { %1079 = vmatpush.bf16.msrb.mxu0 %v4008_v32 }
  0x1e   :  { %507 = vmatpush.bf16.msrb.mxu3 %v3965_v19 }
  0x20   :  { %494 = vmatpush.bf16.msra.mxu2 %v3956_v16  ;;  %1196 = vmatpush.bf16.msra.mxu1 %v3965_v19 }
  0x21   :  { %1182 = vmatpush.bf16.msra.mxu0 %v3934_v8 }
  0x22   :  { %508 = vmatpush.bf16.msrb.mxu3 %v3991_v27  ;;  %3021 = vmatmul.msk.bf16.gmra.mxu0 %vm153_vm0, %v3544_v36 }
  0x24   :  { %495 = vmatpush.bf16.msra.mxu2 %v3987_v26  ;;  %1197 = vmatpush.bf16.msra.mxu1 %v3991_v27 }
  0x25   :  { %1183 = vmatpush.bf16.msra.mxu0 %v3956_v16 }
  0x26   :  { %509 = vmatpush.bf16.msrb.mxu3 %v4012_v33 }
  0x28   :  { %496 = vmatpush.bf16.msra.mxu2 %v4008_v32  ;;  %1198 = vmatpush.bf16.msra.mxu1 %v4012_v33 }
  0x29   :  { %1184 = vmatpush.bf16.msra.mxu0 %v3987_v26 }
  0x2a   :  { %559 = vmatpush.bf16.msra.mxu3 %v3947_v13 }
  0x2c   :  { %546 = vmatpush.bf16.msrb.mxu2 %v3934_v8 }
  0x2d   :  { %1185 = vmatpush.bf16.msra.mxu0 %v4008_v32 }
  0x2e   :  { %560 = vmatpush.bf16.msra.mxu3 %v3965_v19 }
  0x30   :  { %547 = vmatpush.bf16.msrb.mxu2 %v3956_v16 }
  0x32   :  { %561 = vmatpush.bf16.msra.mxu3 %v3991_v27 }
  0x34   :  { %548 = vmatpush.bf16.msrb.mxu2 %v3987_v26 }
  0x36   :  { %562 = vmatpush.bf16.msra.mxu3 %v4012_v33 }
  0x38   :  { %549 = vmatpush.bf16.msrb.mxu2 %v4008_v32 }
  0x88   :  { %v267_v41 = vpop.f32.mrf.mxu1 }
  0x89   :  { %v268_v44 = vadd.f32 %v267_v41, %v4051_v39 }
  0x8e   :  { %v4044_v35 = vpop.f32.mrf.mxu2 }
  0x8f   :  { %v199_v40 = vpop.f32.mrf.mxu0 }
  0x90   :  { %v200_v43 = vadd.f32 %v199_v40, %v4049_v38  ;;  %v269_v14 = vpop.f32.mrf.mxu1 }
  0x91   :  { %v270_v20 = vadd.f32 %v269_v14, %v4051_v39 }
  0x96   :  { %v324_v37 = vpop.f32.mrf.mxu2 }
  0x97   :  { %v201_v11 = vpop.f32.mrf.mxu0 }
  0x98   :  { %v202_v15 = vadd.f32 %v201_v11, %v4049_v38 }
  0x9c   :  { %v457_v45 = vpop.f32.mrf.mxu3 }
  0x9d   :  { %v462_v49 = vadd.f32 %v457_v45, %v268_v44 }
  0x9e   :  { %v444_v46 = vpop.f32.mrf.mxu2 }
  0x9f   :  { %v461_v48 = vadd.f32 %v444_v46, %v200_v43 }
  0xa1   :  { %3676 = vtanh.f32 %v461_v48 }
  0xa2   :  { %3678 = vtanh.f32 %v462_v49 }
  0xa4   :  { %v459_v51 = vpop.f32.mrf.mxu3 }
  0xa5   :  { %v204_v51 = vpop.f32.mrf.mxu0 }
  0xa6   :  { %v446_v52 = vpop.f32.mrf.mxu2 }
  0xa7   :  { %v3677_v53 = vpop.eup %3676  ;;  %v272_v52 = vpop.f32.mrf.mxu1 }
  0xa8   :  { %v465_v54 = vmul.f32 0.5, %v3677_v53  ;;  %v3679_v55 = vpop.eup %3678  ;;  %v205_v53 = vadd.f32 %v204_v51, %v4049_v38 }
  0xa9   :  { %v466_v59 = vmul.f32 %v3679_v55, %v4058_v57 }
  0xaa   :  { %v467_v58 = vadd.f32 0.5, %v465_v54  ;;  %v273_v54 = vadd.f32 %v272_v52, %v4051_v39 }
  0xab   :  { %v468_v62 = vadd.f32 %v466_v59, %v4062_v61 }
  0xac   :  { %469 = vrot.lane.b32.xlu0 %v467_v58, %s3845_s22 }
  0xb4   :  { %471 = vrot.lane.b32.xlu0 %v468_v62, %s3845_s22 }
 0x11e   :  { %v470_v63 = vpop.permute.xlu0 %469 }
 0x126   :  { %v472_v0 = vpop.permute.xlu0 %471 }
 0x127   :  { %v474_v1 = vsel %vm473_vm2, %v470_v63, %v472_v0  ;;  %v475_v2 = vsel %vm473_vm2, %v472_v0, %v470_v63 }
 0x128   :  { %v476_v3 = vmul.f32 0.0, %v474_v1  ;;  %v477_v4 = vmul.f32 %v475_v2, %v467_v58 }
 0x12a   :  { %v478_v5 = vadd.f32 %v477_v4, %v476_v3 }
 0x12c   :  { %3680 = vtanh.f32 %v478_v5 }
 0x132   :  { %v3681_v6 = vpop.eup %3680 }
 0x133   :  { %v480_v7 = vmul.f32 %v3681_v6, %v468_v62 }
 0x135   :  { %v481_v9 = vmax.f32 %v480_v7, 0.0  ;;  %v485_v10 = vpack.c.bf16 %v480_v7, %v480_v7 }
 0x137   :  { %482 = vst.msk [vmem:[#allocation3] sm:$0xff] %vm431_vm3, %v481_v9  ;;  %3076 = vmatmul.msk.bf16.vlgmr.msra.gmra.mxu2 %vm431_vm3, %v485_v10  ;;  %3077 = vmatmul.msk.bf16.vlgmr.msrb.gmra.mxu3 %vm431_vm3, %v485_v10 }
 0x138   :  { %599 = vmatpush.bf16.msra.mxu2 %v3934_v8  ;;  %612 = vmatpush.bf16.msrb.mxu3 %v3947_v13 }
 0x13c   :  { %600 = vmatpush.bf16.msra.mxu2 %v3956_v16  ;;  %613 = vmatpush.bf16.msrb.mxu3 %v3965_v19 }
 0x140   :  { %601 = vmatpush.bf16.msra.mxu2 %v3987_v26  ;;  %614 = vmatpush.bf16.msrb.mxu3 %v3991_v27 }
 0x144   :  { %602 = vmatpush.bf16.msra.mxu2 %v4008_v32  ;;  %615 = vmatpush.bf16.msrb.mxu3 %v4012_v33 }
 0x1ba   :  { %v498_v17 = vpop.f32.mrf.mxu2  ;;  %v511_v18 = vpop.f32.mrf.mxu3 }
 0x1bb   :  { %v515_v21 = vadd.f32 %v498_v17, %v202_v15  ;;  %v516_v22 = vadd.f32 %v511_v18, %v270_v20 }
 0x1bd   :  { %3682 = vtanh.f32 %v515_v21  ;;  %v206_v21 = vpop.f32.mrf.mxu0 }
 0x1be   :  { %3684 = vtanh.f32 %v516_v22  ;;  %v274_v22 = vpop.f32.mrf.mxu1 }
 0x1c2   :  { %v500_v23 = vpop.f32.mrf.mxu2  ;;  %v513_v24 = vpop.f32.mrf.mxu3 }
 0x1c3   :  { %v3683_v25 = vpop.eup %3682  ;;  %v207_v23 = vadd.f32 %v206_v21, %v4049_v38  ;;  %v275_v24 = vadd.f32 %v274_v22, %v4051_v39 }
 0x1c4   :  { %v519_v28 = vmul.f32 0.5, %v3683_v25  ;;  %v3685_v30 = vpop.eup %3684 }
 0x1c5   :  { %v520_v31 = vmul.f32 %v3685_v30, %v4058_v57 }
 0x1c6   :  { %v521_v29 = vadd.f32 0.5, %v519_v28 }
 0x1c7   :  { %v522_v34 = vadd.f32 %v520_v31, %v4062_v61 }
 0x1c8   :  { %523 = vrot.lane.b32.xlu1 %v521_v29, %s3845_s22 }
 0x1d0   :  { %525 = vrot.lane.b32.xlu1 %v522_v34, %s3845_s22 }
 0x23a   :  { %v524_v37 = vpop.permute.xlu1 %523 }
 0x242   :  { %v526_v40 = vpop.permute.xlu1 %525 }
 0x243   :  { %v527_v41 = vsel %vm473_vm2, %v524_v37, %v526_v40  ;;  %v528_v42 = vsel %vm473_vm2, %v526_v40, %v524_v37 }
 0x244   :  { %v529_v43 = vmul.f32 %v527_v41, %v478_v5  ;;  %v530_v44 = vmul.f32 %v528_v42, %v521_v29 }
 0x246   :  { %v531_v45 = vadd.f32 %v530_v44, %v529_v43  ;;  %v3545_v44 = vld [vmem:[%s4714_s0 + $0x10] sm:$0xff] }
 0x247   :  { %3034 = vmatmul.msk.bf16.gmra.mxu1 %vm153_vm0, %v3545_v44  ;;  %3022 = vmatmul.msk.bf16.gmra.mxu0 %vm153_vm0, %v3545_v44 }
 0x248   :  { %3686 = vtanh.f32 %v531_v45 }
 0x24e   :  { %v3687_v46 = vpop.eup %3686 }
 0x24f   :  { %v533_v48 = vmul.f32 %v3687_v46, %v522_v34 }
 0x251   :  { %v534_v49 = vmax.f32 %v533_v48, 0.0  ;;  %v538_v50 = vpack.c.bf16 %v533_v48, %v533_v48 }
 0x253   :  { %535 = vst.msk [vmem:[#allocation3 + $0x8] sm:$0xff] %vm431_vm3, %v534_v49  ;;  %3078 = vmatmul.msk.bf16.vlgmr.msrb.gmra.mxu2 %vm431_vm3, %v538_v50  ;;  %3079 = vmatmul.msk.bf16.vlgmr.msra.gmra.mxu3 %vm431_vm3, %v538_v50 }
 0x254   :  { %665 = vmatpush.bf16.msra.mxu3 %v3947_v13  ;;  %652 = vmatpush.bf16.msrb.mxu2 %v3934_v8 }
 0x258   :  { %666 = vmatpush.bf16.msra.mxu3 %v3965_v19  ;;  %653 = vmatpush.bf16.msrb.mxu2 %v3956_v16 }
 0x25c   :  { %667 = vmatpush.bf16.msra.mxu3 %v3991_v27  ;;  %654 = vmatpush.bf16.msrb.mxu2 %v3987_v26 }
 0x260   :  { %668 = vmatpush.bf16.msra.mxu3 %v4012_v33  ;;  %655 = vmatpush.bf16.msrb.mxu2 %v4008_v32 }
 0x2d6   :  { %v551_v55 = vpop.f32.mrf.mxu2  ;;  %v564_v56 = vpop.f32.mrf.mxu3 }
 0x2d7   :  { %v568_v58 = vadd.f32 %v551_v55, %v205_v53  ;;  %v569_v59 = vadd.f32 %v564_v56, %v273_v54 }
 0x2d9   :  { %3688 = vtanh.f32 %v568_v58  ;;  %v209_v58 = vpop.f32.mrf.mxu0 }
 0x2da   :  { %3690 = vtanh.f32 %v569_v59  ;;  %v277_v59 = vpop.f32.mrf.mxu1 }
 0x2de   :  { %v553_v60 = vpop.f32.mrf.mxu2  ;;  %v566_v62 = vpop.f32.mrf.mxu3 }
 0x2df   :  { %v3689_v63 = vpop.eup %3688  ;;  %v278_v60 = vadd.f32 %v277_v59, %v4051_v39  ;;  %v210_v62 = vadd.f32 %v209_v58, %v4049_v38 }
 0x2e0   :  { %v572_v0 = vmul.f32 0.5, %v3689_v63  ;;  %v3691_v2 = vpop.eup %3690 }
 0x2e1   :  { %v573_v3 = vmul.f32 %v3691_v2, %v4058_v57 }
 0x2e2   :  { %v574_v1 = vadd.f32 0.5, %v572_v0 }
 0x2e3   :  { %v575_v4 = vadd.f32 %v573_v3, %v4062_v61 }
 0x2e4   :  { %576 = vrot.lane.b32.xlu2 %v574_v1, %s3845_s22 }
 0x2ec   :  { %578 = vrot.lane.b32.xlu2 %v575_v4, %s3845_s22 }
 0x33e   :  { %v577_v5 = vpop.permute.xlu2 %576 }
 0x346   :  { %v579_v6 = vpop.permute.xlu2 %578 }
 0x347   :  { %v580_v7 = vsel %vm473_vm2, %v577_v5, %v579_v6  ;;  %v581_v9 = vsel %vm473_vm2, %v579_v6, %v577_v5 }
 0x348   :  { %v582_v10 = vmul.f32 %v580_v7, %v531_v45  ;;  %v583_v11 = vmul.f32 %v581_v9, %v574_v1 }
 0x34a   :  { %v584_v14 = vadd.f32 %v583_v11, %v582_v10 }
 0x34c   :  { %3692 = vtanh.f32 %v584_v14 }
 0x352   :  { %v3693_v15 = vpop.eup %3692 }
 0x353   :  { %v586_v17 = vmul.f32 %v3693_v15, %v575_v4 }
 0x355   :  { %v587_v18 = vmax.f32 %v586_v17, 0.0  ;;  %v591_v20 = vpack.c.bf16 %v586_v17, %v586_v17 }
 0x357   :  { %588 = vst.msk [vmem:[#allocation3 + $0x10] sm:$0xff] %vm431_vm3, %v587_v18  ;;  %3080 = vmatmul.msk.bf16.vlgmr.msra.gmra.mxu2 %vm431_vm3, %v591_v20  ;;  %3081 = vmatmul.msk.bf16.vlgmr.msrb.gmra.mxu3 %vm431_vm3, %v591_v20 }
 0x358   :  { %705 = vmatpush.bf16.msra.mxu2 %v3934_v8  ;;  %718 = vmatpush.bf16.msrb.mxu3 %v3947_v13 }
 0x35c   :  { %706 = vmatpush.bf16.msra.mxu2 %v3956_v16  ;;  %719 = vmatpush.bf16.msrb.mxu3 %v3965_v19 }
 0x360   :  { %707 = vmatpush.bf16.msra.mxu2 %v3987_v26  ;;  %720 = vmatpush.bf16.msrb.mxu3 %v3991_v27 }
 0x364   :  { %708 = vmatpush.bf16.msra.mxu2 %v4008_v32  ;;  %721 = vmatpush.bf16.msrb.mxu3 %v4012_v33 }
 0x3da   :  { %v604_v25 = vpop.f32.mrf.mxu2  ;;  %v617_v28 = vpop.f32.mrf.mxu3 }
 0x3db   :  { %v621_v29 = vadd.f32 %v604_v25, %v207_v23  ;;  %v622_v30 = vadd.f32 %v617_v28, %v275_v24 }
 0x3dd   :  { %3694 = vtanh.f32 %v621_v29  ;;  %v279_v29 = vpop.f32.mrf.mxu1 }
 0x3de   :  { %3696 = vtanh.f32 %v622_v30  ;;  %v211_v30 = vpop.f32.mrf.mxu0 }
 0x3e2   :  { %v606_v31 = vpop.f32.mrf.mxu2  ;;  %v619_v34 = vpop.f32.mrf.mxu3 }
 0x3e3   :  { %v3695_v36 = vpop.eup %3694  ;;  %v280_v31 = vadd.f32 %v279_v29, %v4051_v39  ;;  %v212_v34 = vadd.f32 %v211_v30, %v4049_v38 }
 0x3e4   :  { %v3697_v37 = vpop.eup %3696  ;;  %v625_v40 = vmul.f32 0.5, %v3695_v36 }
 0x3e5   :  { %v626_v41 = vmul.f32 %v3697_v37, %v4058_v57 }
 0x3e6   :  { %v627_v42 = vadd.f32 0.5, %v625_v40 }
 0x3e7   :  { %v628_v43 = vadd.f32 %v626_v41, %v4062_v61 }
 0x3e8   :  { %629 = vrot.lane.b32.xlu0 %v627_v42, %s3845_s22 }
 0x3e9   :  { %631 = vrot.lane.b32.xlu1 %v628_v43, %s3845_s22 }
 0x45a   :  { %v630_v45 = vpop.permute.xlu0 %629 }
 0x45b   :  { %v632_v46 = vpop.permute.xlu1 %631 }
 0x45c   :  { %v633_v48 = vsel %vm473_vm2, %v630_v45, %v632_v46  ;;  %v634_v49 = vsel %vm473_vm2, %v632_v46, %v630_v45 }
 0x45d   :  { %v635_v50 = vmul.f32 %v633_v48, %v584_v14  ;;  %v636_v51 = vmul.f32 %v634_v49, %v627_v42 }
 0x45f   :  { %v637_v52 = vadd.f32 %v636_v51, %v635_v50  ;;  %v3546_v51 = vld [vmem:[%s4714_s0 + $0x18] sm:$0xff] }
 0x460   :  { %3023 = vmatmul.msk.bf16.gmra.mxu0 %vm153_vm0, %v3546_v51  ;;  %3035 = vmatmul.msk.bf16.gmra.mxu1 %vm153_vm0, %v3546_v51 }
 0x461   :  { %3698 = vtanh.f32 %v637_v52 }
 0x467   :  { %v3699_v53 = vpop.eup %3698 }
 0x468   :  { %v639_v54 = vmul.f32 %v3699_v53, %v628_v43 }
 0x46a   :  { %v640_v55 = vmax.f32 %v639_v54, 0.0  ;;  %v644_v56 = vpack.c.bf16 %v639_v54, %v639_v54 }
 0x46c   :  { %641 = vst.msk [vmem:[#allocation3 + $0x18] sm:$0xff] %vm431_vm3, %v640_v55  ;;  %3082 = vmatmul.msk.bf16.vlgmr.msrb.gmra.mxu2 %vm431_vm3, %v644_v56  ;;  %3083 = vmatmul.msk.bf16.vlgmr.msra.gmra.mxu3 %vm431_vm3, %v644_v56 }
 0x46d   :  { %758 = vmatpush.bf16.msrb.mxu2 %v3934_v8  ;;  %771 = vmatpush.bf16.msra.mxu3 %v3947_v13 }
 0x471   :  { %759 = vmatpush.bf16.msrb.mxu2 %v3956_v16  ;;  %772 = vmatpush.bf16.msra.mxu3 %v3965_v19 }
 0x475   :  { %760 = vmatpush.bf16.msrb.mxu2 %v3987_v26  ;;  %773 = vmatpush.bf16.msra.mxu3 %v3991_v27 }
 0x479   :  { %761 = vmatpush.bf16.msrb.mxu2 %v4008_v32  ;;  %774 = vmatpush.bf16.msra.mxu3 %v4012_v33 }
 0x4ef   :  { %v657_v63 = vpop.f32.mrf.mxu2  ;;  %v670_v0 = vpop.f32.mrf.mxu3 }
 0x4f0   :  { %v674_v1 = vadd.f32 %v657_v63, %v210_v62  ;;  %v675_v2 = vadd.f32 %v670_v0, %v278_v60 }
 0x4f2   :  { %3700 = vtanh.f32 %v674_v1  ;;  %v214_v1 = vpop.f32.mrf.mxu0 }
 0x4f3   :  { %3702 = vtanh.f32 %v675_v2  ;;  %v282_v2 = vpop.f32.mrf.mxu1 }
 0x4f7   :  { %v659_v3 = vpop.f32.mrf.mxu2  ;;  %v672_v4 = vpop.f32.mrf.mxu3 }
 0x4f8   :  { %v3701_v5 = vpop.eup %3700  ;;  %v215_v3 = vadd.f32 %v214_v1, %v4049_v38  ;;  %v283_v4 = vadd.f32 %v282_v2, %v4051_v39 }
 0x4f9   :  { %v3703_v6 = vpop.eup %3702  ;;  %v678_v7 = vmul.f32 0.5, %v3701_v5 }
 0x4fa   :  { %v679_v9 = vmul.f32 %v3703_v6, %v4058_v57 }
 0x4fb   :  { %v680_v10 = vadd.f32 0.5, %v678_v7 }
 0x4fc   :  { %v681_v11 = vadd.f32 %v679_v9, %v4062_v61 }
 0x4fd   :  { %682 = vrot.lane.b32.xlu2 %v680_v10, %s3845_s22 }
 0x4fe   :  { %684 = vrot.lane.b32.xlu0 %v681_v11, %s3845_s22 }
 0x557   :  { %v683_v14 = vpop.permute.xlu2 %682 }
 0x570   :  { %v685_v15 = vpop.permute.xlu0 %684 }
 0x571   :  { %v686_v17 = vsel %vm473_vm2, %v683_v14, %v685_v15  ;;  %v687_v18 = vsel %vm473_vm2, %v685_v15, %v683_v14 }
 0x572   :  { %v688_v20 = vmul.f32 %v686_v17, %v637_v52  ;;  %v689_v21 = vmul.f32 %v687_v18, %v680_v10 }
 0x574   :  { %v690_v22 = vadd.f32 %v689_v21, %v688_v20 }
 0x576   :  { %3704 = vtanh.f32 %v690_v22 }
 0x57c   :  { %v3705_v23 = vpop.eup %3704 }
 0x57d   :  { %v692_v24 = vmul.f32 %v3705_v23, %v681_v11 }
 0x57f   :  { %v693_v25 = vmax.f32 %v692_v24, 0.0  ;;  %v697_v28 = vpack.c.bf16 %v692_v24, %v692_v24 }
 0x581   :  { %694 = vst.msk [vmem:[#allocation3 + $0x20] sm:$0xff] %vm431_vm3, %v693_v25  ;;  %3084 = vmatmul.msk.bf16.vlgmr.msra.gmra.mxu2 %vm431_vm3, %v697_v28  ;;  %3085 = vmatmul.msk.bf16.vlgmr.msrb.gmra.mxu3 %vm431_vm3, %v697_v28 }
 0x582   :  { %824 = vmatpush.bf16.msrb.mxu3 %v3947_v13  ;;  %811 = vmatpush.bf16.msra.mxu2 %v3934_v8 }
 0x586   :  { %825 = vmatpush.bf16.msrb.mxu3 %v3965_v19  ;;  %812 = vmatpush.bf16.msra.mxu2 %v3956_v16 }
 0x58a   :  { %826 = vmatpush.bf16.msrb.mxu3 %v3991_v27  ;;  %813 = vmatpush.bf16.msra.mxu2 %v3987_v26 }
 0x58e   :  { %827 = vmatpush.bf16.msrb.mxu3 %v4012_v33  ;;  %814 = vmatpush.bf16.msra.mxu2 %v4008_v32 }
 0x604   :  { %v710_v36 = vpop.f32.mrf.mxu2  ;;  %v723_v37 = vpop.f32.mrf.mxu3 }
 0x605   :  { %v727_v40 = vadd.f32 %v710_v36, %v212_v34  ;;  %v728_v41 = vadd.f32 %v723_v37, %v280_v31 }
 0x607   :  { %3706 = vtanh.f32 %v727_v40  ;;  %v216_v40 = vpop.f32.mrf.mxu0 }
 0x608   :  { %3708 = vtanh.f32 %v728_v41  ;;  %v284_v41 = vpop.f32.mrf.mxu1 }
 0x60c   :  { %v712_v42 = vpop.f32.mrf.mxu2  ;;  %v725_v43 = vpop.f32.mrf.mxu3 }
 0x60d   :  { %v3707_v44 = vpop.eup %3706  ;;  %v217_v42 = vadd.f32 %v216_v40, %v4049_v38  ;;  %v285_v43 = vadd.f32 %v284_v41, %v4051_v39 }
 0x60e   :  { %v3709_v45 = vpop.eup %3708  ;;  %v731_v46 = vmul.f32 0.5, %v3707_v44 }
 0x60f   :  { %v732_v48 = vmul.f32 %v3709_v45, %v4058_v57 }
 0x610   :  { %v733_v49 = vadd.f32 0.5, %v731_v46 }
 0x611   :  { %v734_v50 = vadd.f32 %v732_v48, %v4062_v61 }
 0x612   :  { %735 = vrot.lane.b32.xlu1 %v733_v49, %s3845_s22 }
 0x613   :  { %737 = vrot.lane.b32.xlu2 %v734_v50, %s3845_s22 }
 0x66d   :  { %v738_v52 = vpop.permute.xlu2 %737 }
 0x684   :  { %v736_v53 = vpop.permute.xlu1 %735 }
 0x685   :  { %v739_v54 = vsel %vm473_vm2, %v736_v53, %v738_v52  ;;  %v740_v55 = vsel %vm473_vm2, %v738_v52, %v736_v53 }
 0x686   :  { %v741_v56 = vmul.f32 %v739_v54, %v690_v22  ;;  %v742_v58 = vmul.f32 %v740_v55, %v733_v49 }
 0x688   :  { %v743_v59 = vadd.f32 %v742_v58, %v741_v56  ;;  %v3547_v58 = vld [vmem:[%s4714_s0 + $0x20] sm:$0xff] }
 0x689   :  { %3024 = vmatmul.msk.bf16.gmra.mxu0 %vm153_vm0, %v3547_v58  ;;  %3036 = vmatmul.msk.bf16.gmra.mxu1 %vm153_vm0, %v3547_v58 }
 0x68a   :  { %3710 = vtanh.f32 %v743_v59 }
 0x690   :  { %v3711_v60 = vpop.eup %3710 }
 0x691   :  { %v745_v62 = vmul.f32 %v3711_v60, %v734_v50 }
 0x693   :  { %v746_v63 = vmax.f32 %v745_v62, 0.0  ;;  %v750_v0 = vpack.c.bf16 %v745_v62, %v745_v62 }
 0x695   :  { %747 = vst.msk [vmem:[#allocation3 + $0x28] sm:$0xff] %vm431_vm3, %v746_v63  ;;  %3086 = vmatmul.msk.bf16.vlgmr.msrb.gmra.mxu2 %vm431_vm3, %v750_v0  ;;  %3087 = vmatmul.msk.bf16.vlgmr.msra.gmra.mxu3 %vm431_vm3, %v750_v0 }
 0x696   :  { %864 = vmatpush.bf16.msrb.mxu2 %v3934_v8  ;;  %877 = vmatpush.bf16.msra.mxu3 %v3947_v13 }
 0x69a   :  { %865 = vmatpush.bf16.msrb.mxu2 %v3956_v16  ;;  %878 = vmatpush.bf16.msra.mxu3 %v3965_v19 }
 0x69e   :  { %866 = vmatpush.bf16.msrb.mxu2 %v3987_v26  ;;  %879 = vmatpush.bf16.msra.mxu3 %v3991_v27 }
 0x6a2   :  { %867 = vmatpush.bf16.msrb.mxu2 %v4008_v32  ;;  %880 = vmatpush.bf16.msra.mxu3 %v4012_v33 }
 0x718   :  { %v763_v5 = vpop.f32.mrf.mxu2  ;;  %v776_v6 = vpop.f32.mrf.mxu3 }
 0x719   :  { %v780_v7 = vadd.f32 %v763_v5, %v215_v3  ;;  %v781_v9 = vadd.f32 %v776_v6, %v283_v4 }
 0x71b   :  { %3712 = vtanh.f32 %v780_v7  ;;  %v287_v7 = vpop.f32.mrf.mxu1 }
 0x71c   :  { %3714 = vtanh.f32 %v781_v9  ;;  %v219_v9 = vpop.f32.mrf.mxu0 }
 0x720   :  { %v765_v10 = vpop.f32.mrf.mxu2  ;;  %v778_v11 = vpop.f32.mrf.mxu3 }
 0x721   :  { %v3713_v14 = vpop.eup %3712  ;;  %v220_v10 = vadd.f32 %v219_v9, %v4049_v38  ;;  %v288_v11 = vadd.f32 %v287_v7, %v4051_v39 }
 0x722   :  { %v3715_v15 = vpop.eup %3714  ;;  %v784_v17 = vmul.f32 0.5, %v3713_v14 }
 0x723   :  { %v785_v18 = vmul.f32 %v3715_v15, %v4058_v57 }
 0x724   :  { %v786_v20 = vadd.f32 0.5, %v784_v17 }
 0x725   :  { %v787_v21 = vadd.f32 %v785_v18, %v4062_v61 }
 0x726   :  { %788 = vrot.lane.b32.xlu0 %v786_v20, %s3845_s22 }
 0x727   :  { %790 = vrot.lane.b32.xlu1 %v787_v21, %s3845_s22 }
 0x798   :  { %v789_v22 = vpop.permute.xlu0 %788 }
 0x799   :  { %v791_v23 = vpop.permute.xlu1 %790 }
 0x79a   :  { %v792_v24 = vsel %vm473_vm2, %v789_v22, %v791_v23  ;;  %v793_v25 = vsel %vm473_vm2, %v791_v23, %v789_v22 }
 0x79b   :  { %v794_v28 = vmul.f32 %v792_v24, %v743_v59  ;;  %v795_v29 = vmul.f32 %v793_v25, %v786_v20 }
 0x79d   :  { %v796_v30 = vadd.f32 %v795_v29, %v794_v28 }
 0x79f   :  { %3716 = vtanh.f32 %v796_v30 }
 0x7a5   :  { %v3717_v31 = vpop.eup %3716 }
 0x7a6   :  { %v798_v34 = vmul.f32 %v3717_v31, %v787_v21 }
 0x7a8   :  { %v799_v36 = vmax.f32 %v798_v34, 0.0  ;;  %v803_v37 = vpack.c.bf16 %v798_v34, %v798_v34 }
 0x7aa   :  { %800 = vst.msk [vmem:[#allocation3 + $0x30] sm:$0xff] %vm431_vm3, %v799_v36  ;;  %3088 = vmatmul.msk.bf16.vlgmr.msra.gmra.mxu2 %vm431_vm3, %v803_v37  ;;  %3089 = vmatmul.msk.bf16.vlgmr.msrb.gmra.mxu3 %vm431_vm3, %v803_v37 }
 0x7ab   :  { %917 = vmatpush.bf16.msra.mxu2 %v3934_v8  ;;  %930 = vmatpush.bf16.msrb.mxu3 %v3947_v13 }
 0x7af   :  { %918 = vmatpush.bf16.msra.mxu2 %v3956_v16  ;;  %931 = vmatpush.bf16.msrb.mxu3 %v3965_v19 }
 0x7b3   :  { %919 = vmatpush.bf16.msra.mxu2 %v3987_v26  ;;  %932 = vmatpush.bf16.msrb.mxu3 %v3991_v27 }
 0x7b7   :  { %920 = vmatpush.bf16.msra.mxu2 %v4008_v32  ;;  %933 = vmatpush.bf16.msrb.mxu3 %v4012_v33 }
 0x82d   :  { %v816_v44 = vpop.f32.mrf.mxu2  ;;  %v829_v45 = vpop.f32.mrf.mxu3 }
 0x82e   :  { %v833_v46 = vadd.f32 %v816_v44, %v217_v42  ;;  %v834_v48 = vadd.f32 %v829_v45, %v285_v43 }
 0x830   :  { %3718 = vtanh.f32 %v833_v46  ;;  %v221_v46 = vpop.f32.mrf.mxu0 }
 0x831   :  { %3720 = vtanh.f32 %v834_v48  ;;  %v289_v48 = vpop.f32.mrf.mxu1 }
 0x835   :  { %v818_v49 = vpop.f32.mrf.mxu2  ;;  %v831_v50 = vpop.f32.mrf.mxu3 }
 0x836   :  { %v3719_v51 = vpop.eup %3718  ;;  %v222_v49 = vadd.f32 %v221_v46, %v4049_v38  ;;  %v290_v50 = vadd.f32 %v289_v48, %v4051_v39 }
 0x837   :  { %v3721_v52 = vpop.eup %3720  ;;  %v837_v53 = vmul.f32 0.5, %v3719_v51 }
 0x838   :  { %v838_v54 = vmul.f32 %v3721_v52, %v4058_v57 }
 0x839   :  { %v839_v55 = vadd.f32 0.5, %v837_v53 }
 0x83a   :  { %v840_v56 = vadd.f32 %v838_v54, %v4062_v61 }
 0x83b   :  { %841 = vrot.lane.b32.xlu2 %v839_v55, %s3845_s22 }
 0x83c   :  { %843 = vrot.lane.b32.xlu0 %v840_v56, %s3845_s22 }
 0x895   :  { %v842_v59 = vpop.permute.xlu2 %841 }
 0x8ae   :  { %v844_v60 = vpop.permute.xlu0 %843 }
 0x8af   :  { %v845_v62 = vsel %vm473_vm2, %v842_v59, %v844_v60  ;;  %v846_v63 = vsel %vm473_vm2, %v844_v60, %v842_v59 }
 0x8b0   :  { %v847_v0 = vmul.f32 %v845_v62, %v796_v30  ;;  %v848_v1 = vmul.f32 %v846_v63, %v839_v55 }
 0x8b2   :  { %v849_v2 = vadd.f32 %v848_v1, %v847_v0  ;;  %v3548_v1 = vld [vmem:[%s4714_s0 + $0x28] sm:$0xff] }
 0x8b3   :  { %3037 = vmatmul.msk.bf16.gmra.mxu1 %vm153_vm0, %v3548_v1  ;;  %3025 = vmatmul.msk.bf16.gmra.mxu0 %vm153_vm0, %v3548_v1 }
 0x8b4   :  { %3722 = vtanh.f32 %v849_v2 }
 0x8ba   :  { %v3723_v3 = vpop.eup %3722 }
 0x8bb   :  { %v851_v4 = vmul.f32 %v3723_v3, %v840_v56 }
 0x8bd   :  { %v852_v5 = vmax.f32 %v851_v4, 0.0  ;;  %v856_v6 = vpack.c.bf16 %v851_v4, %v851_v4 }
 0x8bf   :  { %853 = vst.msk [vmem:[#allocation3 + $0x38] sm:$0xff] %vm431_vm3, %v852_v5  ;;  %3090 = vmatmul.msk.bf16.vlgmr.msrb.gmra.mxu2 %vm431_vm3, %v856_v6  ;;  %3091 = vmatmul.msk.bf16.vlgmr.msra.gmra.mxu3 %vm431_vm3, %v856_v6 }
 0x8c0   :  { %983 = vmatpush.bf16.msra.mxu3 %v3947_v13  ;;  %970 = vmatpush.bf16.msrb.mxu2 %v3934_v8 }
 0x8c4   :  { %984 = vmatpush.bf16.msra.mxu3 %v3965_v19  ;;  %971 = vmatpush.bf16.msrb.mxu2 %v3956_v16 }
 0x8c8   :  { %985 = vmatpush.bf16.msra.mxu3 %v3991_v27  ;;  %972 = vmatpush.bf16.msrb.mxu2 %v3987_v26 }
 0x8cc   :  { %986 = vmatpush.bf16.msra.mxu3 %v4012_v33  ;;  %973 = vmatpush.bf16.msrb.mxu2 %v4008_v32 }
 0x942   :  { %v869_v14 = vpop.f32.mrf.mxu2  ;;  %v882_v15 = vpop.f32.mrf.mxu3 }
 0x943   :  { %v886_v17 = vadd.f32 %v869_v14, %v220_v10  ;;  %v887_v18 = vadd.f32 %v882_v15, %v288_v11 }
 0x945   :  { %3724 = vtanh.f32 %v886_v17  ;;  %v224_v17 = vpop.f32.mrf.mxu0 }
 0x946   :  { %3726 = vtanh.f32 %v887_v18  ;;  %v292_v18 = vpop.f32.mrf.mxu1 }
 0x94a   :  { %v871_v20 = vpop.f32.mrf.mxu2  ;;  %v884_v21 = vpop.f32.mrf.mxu3 }
 0x94b   :  { %v3725_v22 = vpop.eup %3724  ;;  %v293_v20 = vadd.f32 %v292_v18, %v4051_v39  ;;  %v225_v21 = vadd.f32 %v224_v17, %v4049_v38 }
 0x94c   :  { %v3727_v23 = vpop.eup %3726  ;;  %v890_v24 = vmul.f32 0.5, %v3725_v22 }
 0x94d   :  { %v891_v25 = vmul.f32 %v3727_v23, %v4058_v57 }
 0x94e   :  { %v892_v28 = vadd.f32 0.5, %v890_v24 }
 0x94f   :  { %v893_v29 = vadd.f32 %v891_v25, %v4062_v61 }
 0x950   :  { %894 = vrot.lane.b32.xlu1 %v892_v28, %s3845_s22 }
 0x951   :  { %896 = vrot.lane.b32.xlu2 %v893_v29, %s3845_s22 }
 0x9ab   :  { %v897_v30 = vpop.permute.xlu2 %896 }
 0x9c2   :  { %v895_v31 = vpop.permute.xlu1 %894 }
 0x9c3   :  { %v898_v34 = vsel %vm473_vm2, %v895_v31, %v897_v30  ;;  %v899_v36 = vsel %vm473_vm2, %v897_v30, %v895_v31 }
 0x9c4   :  { %v900_v37 = vmul.f32 %v898_v34, %v849_v2  ;;  %v901_v40 = vmul.f32 %v899_v36, %v892_v28 }
 0x9c6   :  { %v902_v41 = vadd.f32 %v901_v40, %v900_v37 }
 0x9c8   :  { %3728 = vtanh.f32 %v902_v41 }
 0x9ce   :  { %v3729_v42 = vpop.eup %3728 }
 0x9cf   :  { %v904_v43 = vmul.f32 %v3729_v42, %v893_v29 }
 0x9d1   :  { %v905_v44 = vmax.f32 %v904_v43, 0.0  ;;  %v909_v45 = vpack.c.bf16 %v904_v43, %v904_v43 }
 0x9d3   :  { %906 = vst.msk [vmem:[#allocation3 + $0x40] sm:$0xff] %vm431_vm3, %v905_v44  ;;  %3092 = vmatmul.msk.bf16.vlgmr.msra.gmra.mxu2 %vm431_vm3, %v909_v45  ;;  %3093 = vmatmul.msk.bf16.vlgmr.msrb.gmra.mxu3 %vm431_vm3, %v909_v45 }
 0x9d4   :  { %1023 = vmatpush.bf16.msra.mxu2 %v3934_v8  ;;  %1036 = vmatpush.bf16.msrb.mxu3 %v3947_v13 }
 0x9d8   :  { %1024 = vmatpush.bf16.msra.mxu2 %v3956_v16  ;;  %1037 = vmatpush.bf16.msrb.mxu3 %v3965_v19 }
 0x9dc   :  { %1025 = vmatpush.bf16.msra.mxu2 %v3987_v26  ;;  %1038 = vmatpush.bf16.msrb.mxu3 %v3991_v27 }
 0x9e0   :  { %1026 = vmatpush.bf16.msra.mxu2 %v4008_v32  ;;  %1039 = vmatpush.bf16.msrb.mxu3 %v4012_v33 }
 0xa56   :  { %v922_v51 = vpop.f32.mrf.mxu2  ;;  %v935_v52 = vpop.f32.mrf.mxu3 }
 0xa57   :  { %v939_v53 = vadd.f32 %v922_v51, %v222_v49  ;;  %v940_v54 = vadd.f32 %v935_v52, %v290_v50 }
 0xa59   :  { %3730 = vtanh.f32 %v939_v53  ;;  %v3549_v53 = vld [vmem:[%s4714_s0 + $0x30] sm:$0xff] }
 0xa5a   :  { %3732 = vtanh.f32 %v940_v54  ;;  %3026 = vmatmul.msk.bf16.gmra.mxu0 %vm153_vm0, %v3549_v53  ;;  %3038 = vmatmul.msk.bf16.gmra.mxu1 %vm153_vm0, %v3549_v53  ;;  %v294_v54 = vpop.f32.mrf.mxu1 }
 0xa5e   :  { %v924_v55 = vpop.f32.mrf.mxu2  ;;  %v937_v56 = vpop.f32.mrf.mxu3 }
 0xa5f   :  { %v3731_v58 = vpop.eup %3730  ;;  %v226_v55 = vpop.f32.mrf.mxu0  ;;  %v3550_v56 = vld [vmem:[%s4714_s0 + $0x38] sm:$0xff] }
 0xa60   :  { %v3733_v59 = vpop.eup %3732  ;;  %v943_v60 = vmul.f32 0.5, %v3731_v58  ;;  %v295_v58 = vadd.f32 %v294_v54, %v4051_v39 }
 0xa61   :  { %v944_v62 = vmul.f32 %v3733_v59, %v4058_v57  ;;  %v227_v59 = vadd.f32 %v226_v55, %v4049_v38 }
 0xa62   :  { %v945_v63 = vadd.f32 0.5, %v943_v60 }
 0xa63   :  { %v946_v0 = vadd.f32 %v944_v62, %v4062_v61 }
 0xa64   :  { %947 = vrot.lane.b32.xlu0 %v945_v63, %s3845_s22 }
 0xa65   :  { %949 = vrot.lane.b32.xlu1 %v946_v0, %s3845_s22 }
 0xa6a   :  { %3027 = vmatmul.msk.bf16.gmra.mxu0 %vm153_vm0, %v3550_v56  ;;  %3039 = vmatmul.msk.bf16.gmra.mxu1 %vm153_vm0, %v3550_v56 }
 0xad6   :  { %v948_v2 = vpop.permute.xlu0 %947 }
 0xad7   :  { %v950_v3 = vpop.permute.xlu1 %949 }
 0xad8   :  { %v951_v4 = vsel %vm473_vm2, %v948_v2, %v950_v3  ;;  %v952_v5 = vsel %vm473_vm2, %v950_v3, %v948_v2 }
 0xad9   :  { %v953_v6 = vmul.f32 %v951_v4, %v902_v41  ;;  %v954_v7 = vmul.f32 %v952_v5, %v945_v63 }
 0xadb   :  { %v955_v9 = vadd.f32 %v954_v7, %v953_v6 }
 0xadd   :  { %3734 = vtanh.f32 %v955_v9 }
 0xae3   :  { %v3735_v10 = vpop.eup %3734 }
 0xae4   :  { %v957_v11 = vmul.f32 %v3735_v10, %v946_v0  ;;  %v3551_v10 = vld [vmem:[%s4714_s0 + $0x40] sm:$0xff] }
 0xae5   :  { %3028 = vmatmul.msk.bf16.gmra.mxu0 %vm153_vm0, %v3551_v10  ;;  %3040 = vmatmul.msk.bf16.gmra.mxu1 %vm153_vm0, %v3551_v10 }
 0xae6   :  { %v958_v14 = vmax.f32 %v957_v11, 0.0  ;;  %v962_v15 = vpack.c.bf16 %v957_v11, %v957_v11  ;;  %v3552_v11 = vld [vmem:[%s4714_s0 + $0x48] sm:$0xff] }
 0xae8   :  { %959 = vst.msk [vmem:[#allocation3 + $0x48] sm:$0xff] %vm431_vm3, %v958_v14  ;;  %3094 = vmatmul.msk.bf16.vlgmr.msrb.gmra.mxu2 %vm431_vm3, %v962_v15  ;;  %3095 = vmatmul.msk.bf16.vlgmr.msra.gmra.mxu3 %vm431_vm3, %v962_v15  ;;  %v3553_v14 = vld [vmem:[%s4714_s0 + $0x50] sm:$0xff]  ;;  %v229_v15 = vpop.f32.mrf.mxu0 }
 0xae9   :  { %1142 = vmatpush.bf16.msra.mxu3 %v3947_v13  ;;  %1129 = vmatpush.bf16.msrb.mxu2 %v3934_v8 }
 0xaed   :  { %1143 = vmatpush.bf16.msra.mxu3 %v3965_v19  ;;  %1130 = vmatpush.bf16.msrb.mxu2 %v3956_v16 }
 0xaf1   :  { %1144 = vmatpush.bf16.msra.mxu3 %v3991_v27  ;;  %1131 = vmatpush.bf16.msrb.mxu2 %v3987_v26 }
 0xaf5   :  { %1145 = vmatpush.bf16.msra.mxu3 %v4012_v33  ;;  %1132 = vmatpush.bf16.msrb.mxu2 %v4008_v32 }
 0xaf6   :  { %3029 = vmatmul.msk.bf16.gmra.mxu0 %vm153_vm0, %v3552_v11  ;;  %3041 = vmatmul.msk.bf16.gmra.mxu1 %vm153_vm0, %v3552_v11 }
 0xb06   :  { %3030 = vmatmul.msk.bf16.gmra.mxu0 %vm153_vm0, %v3553_v14  ;;  %3042 = vmatmul.msk.bf16.gmra.mxu1 %vm153_vm0, %v3553_v14 }
 0xb16   :  { %3031 = vmatmul.msk.bf16.gmra.mxu0 %vm153_vm0, %v3945_v12 }
 0xb6b   :  { %v975_v22 = vpop.f32.mrf.mxu2  ;;  %v988_v23 = vpop.f32.mrf.mxu3 }
 0xb6c   :  { %v992_v24 = vadd.f32 %v975_v22, %v225_v21  ;;  %v993_v25 = vadd.f32 %v988_v23, %v293_v20  ;;  %v4354_v22 = vpop.f32.mrf.mxu0 }
 0xb6e   :  { %3736 = vtanh.f32 %v992_v24 }
 0xb6f   :  { %3738 = vtanh.f32 %v993_v25 }
 0xb73   :  { %v977_v28 = vpop.f32.mrf.mxu2  ;;  %v990_v29 = vpop.f32.mrf.mxu3 }
 0xb74   :  { %v3737_v30 = vpop.eup %3736  ;;  %v4356_v28 = vpop.f32.mrf.mxu0 }
 0xb75   :  { %v3739_v31 = vpop.eup %3738  ;;  %v996_v34 = vmul.f32 0.5, %v3737_v30 }
 0xb76   :  { %v997_v36 = vmul.f32 %v3739_v31, %v4058_v57 }
 0xb77   :  { %v998_v37 = vadd.f32 0.5, %v996_v34 }
 0xb78   :  { %v999_v40 = vadd.f32 %v997_v36, %v4062_v61 }
 0xb79   :  { %1000 = vrot.lane.b32.xlu2 %v998_v37, %s3845_s22 }
 0xb7a   :  { %1002 = vrot.lane.b32.xlu0 %v999_v40, %s3845_s22 }
 0xb7c   :  { %v4363_v34 = vpop.f32.mrf.mxu0 }
 0xb84   :  { %v4371_v36 = vpop.f32.mrf.mxu0 }
 0xbd3   :  { %v1001_v41 = vpop.permute.xlu2 %1000 }
 0xbec   :  { %v1003_v42 = vpop.permute.xlu0 %1002 }
 0xbed   :  { %v1004_v43 = vsel %vm473_vm2, %v1001_v41, %v1003_v42  ;;  %v1005_v44 = vsel %vm473_vm2, %v1003_v42, %v1001_v41 }
 0xbee   :  { %v1006_v45 = vmul.f32 %v1004_v43, %v955_v9  ;;  %v1007_v46 = vmul.f32 %v1005_v44, %v998_v37  ;;  %v4373_v37 = vpop.f32.mrf.mxu0 }
 0xbf0   :  { %v1008_v48 = vadd.f32 %v1007_v46, %v1006_v45 }
 0xbf2   :  { %3740 = vtanh.f32 %v1008_v48 }
 0xbf6   :  { %v4375_v41 = vpop.f32.mrf.mxu0 }
 0xbf8   :  { %v3741_v49 = vpop.eup %3740 }
 0xbf9   :  { %v1010_v50 = vmul.f32 %v3741_v49, %v999_v40  ;;  %v297_v40 = vpop.f32.mrf.mxu1 }
 0xbfb   :  { %v1011_v51 = vmax.f32 %v1010_v50, 0.0  ;;  %v1015_v52 = vpack.c.bf16 %v1010_v50, %v1010_v50 }
 0xbfd   :  { %1012 = vst.msk [vmem:[#allocation3 + $0x50] sm:$0xff] %vm431_vm3, %v1011_v51  ;;  %3096 = vmatmul.msk.bf16.vlgmr.msra.gmra.mxu2 %vm431_vm3, %v1015_v52  ;;  %3097 = vmatmul.msk.bf16.vlgmr.msrb.gmra.mxu3 %vm431_vm3, %v1015_v52 }
 0xbfe   :  { %1235 = vmatpush.bf16.msra.mxu2 %v3934_v8  ;;  %1248 = vmatpush.bf16.msrb.mxu3 %v3947_v13  ;;  %v4377_v43 = vpop.f32.mrf.mxu0 }
 0xc01   :  { %v299_v42 = vpop.f32.mrf.mxu1 }
 0xc02   :  { %1236 = vmatpush.bf16.msra.mxu2 %v3956_v16  ;;  %1249 = vmatpush.bf16.msrb.mxu3 %v3965_v19 }
 0xc06   :  { %1237 = vmatpush.bf16.msra.mxu2 %v3987_v26  ;;  %1250 = vmatpush.bf16.msrb.mxu3 %v3991_v27  ;;  %v4381_v45 = vpop.f32.mrf.mxu0 }
 0xc09   :  { %v4379_v44 = vpop.f32.mrf.mxu1 }
 0xc0a   :  { %1238 = vmatpush.bf16.msra.mxu2 %v4008_v32  ;;  %1251 = vmatpush.bf16.msrb.mxu3 %v4012_v33 }
 0xc11   :  { %v4383_v46 = vpop.f32.mrf.mxu1 }
 0xc19   :  { %v4387_v49 = vpop.f32.mrf.mxu1 }
 0xc21   :  { %v4391_v51 = vpop.f32.mrf.mxu1 }
 0xc29   :  { %v4393_v53 = vpop.f32.mrf.mxu1 }
 0xc31   :  { %v4395_v54 = vpop.f32.mrf.mxu1 }
 0xc39   :  { %v4397_v55 = vpop.f32.mrf.mxu1 }
 0xc41   :  { %v4399_v56 = vpop.f32.mrf.mxu1 }
 0xc80   :  { %v1028_v60 = vpop.f32.mrf.mxu2  ;;  %v1041_v62 = vpop.f32.mrf.mxu3 }
 0xc81   :  { %v1045_v63 = vadd.f32 %v1028_v60, %v227_v59  ;;  %v1046_v0 = vadd.f32 %v1041_v62, %v295_v58  ;;  %v230_v58 = vadd.f32 %v229_v15, %v4049_v38  ;;  %v298_v59 = vadd.f32 %v297_v40, %v4051_v39 }
 0xc83   :  { %3742 = vtanh.f32 %v1045_v63 }
 0xc84   :  { %3744 = vtanh.f32 %v1046_v0 }
 0xc88   :  { %v1030_v1 = vpop.f32.mrf.mxu2  ;;  %v1043_v2 = vpop.f32.mrf.mxu3 }
 0xc89   :  { %v3743_v3 = vpop.eup %3742 }
 0xc8a   :  { %v3745_v4 = vpop.eup %3744  ;;  %v1049_v5 = vmul.f32 0.5, %v3743_v3 }
 0xc8b   :  { %v1050_v6 = vmul.f32 %v3745_v4, %v4058_v57 }
 0xc8c   :  { %v1051_v7 = vadd.f32 0.5, %v1049_v5 }
 0xc8d   :  { %v1052_v9 = vadd.f32 %v1050_v6, %v4062_v61 }
 0xc8e   :  { %1053 = vrot.lane.b32.xlu1 %v1051_v7, %s3845_s22 }
 0xc8f   :  { %1055 = vrot.lane.b32.xlu2 %v1052_v9, %s3845_s22 }
 0xce9   :  { %v1056_v17 = vpop.permute.xlu2 %1055 }
 0xd00   :  { %v1054_v18 = vpop.permute.xlu1 %1053 }
 0xd01   :  { %v1057_v20 = vsel %vm473_vm2, %v1054_v18, %v1056_v17  ;;  %v1058_v21 = vsel %vm473_vm2, %v1056_v17, %v1054_v18 }
 0xd02   :  { %v1059_v23 = vmul.f32 %v1057_v20, %v1008_v48  ;;  %v1060_v24 = vmul.f32 %v1058_v21, %v1051_v7  ;;  %v4385_v48 = vpop.f32.mrf.mxu0 }
 0xd04   :  { %v1061_v25 = vadd.f32 %v1060_v24, %v1059_v23 }
 0xd06   :  { %3746 = vtanh.f32 %v1061_v25 }
 0xd0a   :  { %v4389_v50 = vpop.f32.mrf.mxu0 }
 0xd0c   :  { %v3747_v29 = vpop.eup %3746 }
 0xd0d   :  { %v1063_v30 = vmul.f32 %v3747_v29, %v1052_v9 }
 0xd0f   :  { %v1064_v12 = vmax.f32 %v1063_v30, 0.0  ;;  %v1068_v31 = vpack.c.bf16 %v1063_v30, %v1063_v30  ;;  %v300_v30 = vadd.f32 %v299_v42, %v4051_v39 }
 0xd11   :  { %1065 = vst.msk [vmem:[#allocation3 + $0x58] sm:$0xff] %vm431_vm3, %v1064_v12  ;;  %3098 = vmatmul.msk.bf16.vlgmr.msrb.gmra.mxu0 %vm431_vm3, %v1068_v31  ;;  %3099 = vmatmul.msk.bf16.vlgmr.msrb.gmra.mxu1 %vm431_vm3, %v1068_v31 }
 0xd12   :  { %1301 = vmatpush.bf16.msrb.mxu1 %v3947_v13  ;;  %1288 = vmatpush.bf16.msrb.mxu0 %v3934_v8  ;;  %v256_v52 = vpop.f32.mrf.mxu0 }
 0xd16   :  { %1302 = vmatpush.bf16.msrb.mxu1 %v3965_v19  ;;  %1289 = vmatpush.bf16.msrb.mxu0 %v3956_v16 }
 0xd1a   :  { %1303 = vmatpush.bf16.msrb.mxu1 %v3991_v27  ;;  %1290 = vmatpush.bf16.msrb.mxu0 %v3987_v26 }
 0xd1e   :  { %1304 = vmatpush.bf16.msrb.mxu1 %v4012_v33  ;;  %1291 = vmatpush.bf16.msrb.mxu0 %v4008_v32 }
 0xd8e   :  { %v1081_v60 = vpop.f32.mrf.mxu0  ;;  %v1094_v62 = vpop.f32.mrf.mxu1 }
 0xd8f   :  { %v1098_v63 = vadd.f32 %v1081_v60, %v230_v58  ;;  %v1099_v0 = vadd.f32 %v1094_v62, %v298_v59 }
 0xd91   :  { %3748 = vtanh.f32 %v1098_v63 }
 0xd92   :  { %3750 = vtanh.f32 %v1099_v0 }
 0xd96   :  { %v1083_v1 = vpop.f32.mrf.mxu0  ;;  %v1096_v2 = vpop.f32.mrf.mxu1 }
 0xd97   :  { %v3749_v3 = vpop.eup %3748 }
 0xd98   :  { %v3751_v4 = vpop.eup %3750  ;;  %v1102_v5 = vmul.f32 0.5, %v3749_v3 }
 0xd99   :  { %v1103_v6 = vmul.f32 %v3751_v4, %v4058_v57 }
 0xd9a   :  { %v1104_v7 = vadd.f32 0.5, %v1102_v5 }
 0xd9b   :  { %v1105_v9 = vadd.f32 %v1103_v6, %v4062_v61 }
 0xd9c   :  { %1106 = vrot.lane.b32.xlu0 %v1104_v7, %s3845_s22 }
 0xd9d   :  { %1108 = vrot.lane.b32.xlu1 %v1105_v9, %s3845_s22 }
 0xe0e   :  { %v1107_v10 = vpop.permute.xlu0 %1106 }
 0xe0f   :  { %v1109_v11 = vpop.permute.xlu1 %1108 }
 0xe10   :  { %v1110_v14 = vsel %vm473_vm2, %v1107_v10, %v1109_v11  ;;  %v1111_v15 = vsel %vm473_vm2, %v1109_v11, %v1107_v10 }
 0xe11   :  { %v1112_v17 = vmul.f32 %v1110_v14, %v1061_v25  ;;  %v1113_v18 = vmul.f32 %v1111_v15, %v1104_v7  ;;  %v232_v25 = vadd.f32 %v4354_v22, %v4049_v38  ;;  %v235_v15 = vadd.f32 %v4356_v28, %v4049_v38 }
 0xe13   :  { %v1114_v20 = vadd.f32 %v1113_v18, %v1112_v17  ;;  %v303_v17 = vadd.f32 %v4379_v44, %v4051_v39 }
 0xe15   :  { %3752 = vtanh.f32 %v1114_v20 }
 0xe1b   :  { %v3753_v21 = vpop.eup %3752 }
 0xe1c   :  { %v1116_v23 = vmul.f32 %v3753_v21, %v1105_v9 }
 0xe1e   :  { %v1117_v24 = vmax.f32 %v1116_v23, 0.0  ;;  %v1121_v29 = vpack.c.bf16 %v1116_v23, %v1116_v23 }
 0xe20   :  { %1118 = vst.msk [vmem:[#allocation3 + $0x60] sm:$0xff] %vm431_vm3, %v1117_v24  ;;  %3100 = vmatmul.msk.bf16.vlgmr.msrb.gmra.mxu2 %vm431_vm3, %v1121_v29  ;;  %3101 = vmatmul.msk.bf16.vlgmr.msra.gmra.mxu3 %vm431_vm3, %v1121_v29 }
 0xe21   :  { %1341 = vmatpush.bf16.msrb.mxu2 %v3934_v8  ;;  %1354 = vmatpush.bf16.msra.mxu3 %v3947_v13 }
 0xe25   :  { %1342 = vmatpush.bf16.msrb.mxu2 %v3956_v16  ;;  %1355 = vmatpush.bf16.msra.mxu3 %v3965_v19 }
 0xe29   :  { %1343 = vmatpush.bf16.msrb.mxu2 %v3987_v26  ;;  %1356 = vmatpush.bf16.msra.mxu3 %v3991_v27 }
 0xe2d   :  { %1344 = vmatpush.bf16.msrb.mxu2 %v4008_v32  ;;  %1357 = vmatpush.bf16.msra.mxu3 %v4012_v33 }
 0xea3   :  { %v1134_v12 = vpop.f32.mrf.mxu2  ;;  %v1147_v31 = vpop.f32.mrf.mxu3 }
 0xea4   :  { %v1151_v40 = vadd.f32 %v1134_v12, %v232_v25  ;;  %v1152_v52 = vadd.f32 %v1147_v31, %v300_v30 }
 0xea6   :  { %3754 = vtanh.f32 %v1151_v40 }
 0xea7   :  { %3756 = vtanh.f32 %v1152_v52 }
 0xeab   :  { %v1136_v58 = vpop.f32.mrf.mxu2  ;;  %v1149_v59 = vpop.f32.mrf.mxu3 }
 0xeac   :  { %v3755_v60 = vpop.eup %3754 }
 0xead   :  { %v3757_v62 = vpop.eup %3756  ;;  %v1155_v63 = vmul.f32 0.5, %v3755_v60 }
 0xeae   :  { %v1156_v0 = vmul.f32 %v3757_v62, %v4058_v57 }
 0xeaf   :  { %v1157_v1 = vadd.f32 0.5, %v1155_v63 }
 0xeb0   :  { %v1158_v2 = vadd.f32 %v1156_v0, %v4062_v61 }
 0xeb1   :  { %1159 = vrot.lane.b32.xlu2 %v1157_v1, %s3845_s22 }
 0xeb2   :  { %1161 = vrot.lane.b32.xlu0 %v1158_v2, %s3845_s22 }
 0xf0b   :  { %v1160_v22 = vpop.permute.xlu2 %1159 }
 0xf24   :  { %v1162_v42 = vpop.permute.xlu0 %1161 }
 0xf25   :  { %v1163_v3 = vsel %vm473_vm2, %v1160_v22, %v1162_v42  ;;  %v1164_v4 = vsel %vm473_vm2, %v1162_v42, %v1160_v22  ;;  %v237_v42 = vadd.f32 %v4363_v34, %v4049_v38 }
 0xf26   :  { %v1165_v5 = vmul.f32 %v1163_v3, %v1114_v20  ;;  %v1166_v6 = vmul.f32 %v1164_v4, %v1157_v1  ;;  %v305_v3 = vadd.f32 %v4383_v46, %v4051_v39 }
 0xf28   :  { %v1167_v7 = vadd.f32 %v1166_v6, %v1165_v5 }
 0xf2a   :  { %3758 = vtanh.f32 %v1167_v7 }
 0xf30   :  { %v3759_v9 = vpop.eup %3758 }
 0xf31   :  { %v1169_v10 = vmul.f32 %v3759_v9, %v1158_v2 }
 0xf33   :  { %v1170_v11 = vmax.f32 %v1169_v10, 0.0  ;;  %v1174_v14 = vpack.c.bf16 %v1169_v10, %v1169_v10 }
 0xf35   :  { %1171 = vst.msk [vmem:[#allocation3 + $0x68] sm:$0xff] %vm431_vm3, %v1170_v11  ;;  %3102 = vmatmul.msk.bf16.vlgmr.msra.gmra.mxu0 %vm431_vm3, %v1174_v14  ;;  %3103 = vmatmul.msk.bf16.vlgmr.msra.gmra.mxu1 %vm431_vm3, %v1174_v14 }
 0xf36   :  { %1394 = vmatpush.bf16.msra.mxu0 %v3934_v8  ;;  %1407 = vmatpush.bf16.msra.mxu1 %v3947_v13 }
 0xf3a   :  { %1395 = vmatpush.bf16.msra.mxu0 %v3956_v16  ;;  %1408 = vmatpush.bf16.msra.mxu1 %v3965_v19 }
 0xf3e   :  { %1396 = vmatpush.bf16.msra.mxu0 %v3987_v26  ;;  %1409 = vmatpush.bf16.msra.mxu1 %v3991_v27 }
 0xf42   :  { %1397 = vmatpush.bf16.msra.mxu0 %v4008_v32  ;;  %1410 = vmatpush.bf16.msra.mxu1 %v4012_v33 }
 0xfb2   :  { %v1187_v18 = vpop.f32.mrf.mxu0  ;;  %v1200_v20 = vpop.f32.mrf.mxu1 }
 0xfb3   :  { %v1204_v21 = vadd.f32 %v1187_v18, %v235_v15  ;;  %v1205_v23 = vadd.f32 %v1200_v20, %v303_v17 }
 0xfb5   :  { %3760 = vtanh.f32 %v1204_v21 }
 0xfb6   :  { %3762 = vtanh.f32 %v1205_v23 }
 0xfba   :  { %v1189_v24 = vpop.f32.mrf.mxu0  ;;  %v1202_v29 = vpop.f32.mrf.mxu1 }
 0xfbb   :  { %v3761_v25 = vpop.eup %3760 }
 0xfbc   :  { %v3763_v30 = vpop.eup %3762  ;;  %v1208_v12 = vmul.f32 0.5, %v3761_v25 }
 0xfbd   :  { %v1209_v31 = vmul.f32 %v3763_v30, %v4058_v57 }
 0xfbe   :  { %v1210_v40 = vadd.f32 0.5, %v1208_v12 }
 0xfbf   :  { %v1211_v52 = vadd.f32 %v1209_v31, %v4062_v61 }
 0xfc0   :  { %1212 = vrot.lane.b32.xlu1 %v1210_v40, %s3845_s22 }
 0xfc1   :  { %1214 = vrot.lane.b32.xlu2 %v1211_v52, %s3845_s22 }
0x101b   :  { %v1215_v28 = vpop.permute.xlu2 %1214 }
0x1032   :  { %v1213_v44 = vpop.permute.xlu1 %1212 }
0x1033   :  { %v1216_v58 = vsel %vm473_vm2, %v1213_v44, %v1215_v28  ;;  %v1217_v59 = vsel %vm473_vm2, %v1215_v28, %v1213_v44  ;;  %v308_v28 = vadd.f32 %v4387_v49, %v4051_v39 }
0x1034   :  { %v1218_v60 = vmul.f32 %v1216_v58, %v1167_v7  ;;  %v1219_v62 = vmul.f32 %v1217_v59, %v1210_v40 }
0x1036   :  { %v1220_v63 = vadd.f32 %v1219_v62, %v1218_v60 }
0x1038   :  { %3764 = vtanh.f32 %v1220_v63 }
0x103e   :  { %v3765_v0 = vpop.eup %3764 }
0x103f   :  { %v1222_v1 = vmul.f32 %v3765_v0, %v1211_v52  ;;  %v240_v52 = vadd.f32 %v4371_v36, %v4049_v38 }
0x1041   :  { %v1223_v2 = vmax.f32 %v1222_v1, 0.0  ;;  %v1227_v22 = vpack.c.bf16 %v1222_v1, %v1222_v1 }
0x1043   :  { %1224 = vst.msk [vmem:[#allocation3 + $0x70] sm:$0xff] %vm431_vm3, %v1223_v2  ;;  %3104 = vmatmul.msk.bf16.vlgmr.msra.gmra.mxu2 %vm431_vm3, %v1227_v22  ;;  %3105 = vmatmul.msk.bf16.vlgmr.msrb.gmra.mxu3 %vm431_vm3, %v1227_v22 }
0x1044   :  { %1460 = vmatpush.bf16.msrb.mxu3 %v3947_v13  ;;  %1447 = vmatpush.bf16.msra.mxu2 %v3934_v8 }
0x1048   :  { %1461 = vmatpush.bf16.msrb.mxu3 %v3965_v19  ;;  %1448 = vmatpush.bf16.msra.mxu2 %v3956_v16 }
0x104c   :  { %1462 = vmatpush.bf16.msrb.mxu3 %v3991_v27  ;;  %1449 = vmatpush.bf16.msra.mxu2 %v3987_v26 }
0x1050   :  { %1463 = vmatpush.bf16.msrb.mxu3 %v4012_v33  ;;  %1450 = vmatpush.bf16.msra.mxu2 %v4008_v32 }
0x10c6   :  { %v1240_v4 = vpop.f32.mrf.mxu2  ;;  %v1253_v5 = vpop.f32.mrf.mxu3 }
0x10c7   :  { %v1257_v6 = vadd.f32 %v1240_v4, %v237_v42  ;;  %v1258_v7 = vadd.f32 %v1253_v5, %v305_v3 }
0x10c9   :  { %3766 = vtanh.f32 %v1257_v6 }
0x10ca   :  { %3768 = vtanh.f32 %v1258_v7 }
0x10ce   :  { %v1242_v9 = vpop.f32.mrf.mxu2  ;;  %v1255_v10 = vpop.f32.mrf.mxu3 }
0x10cf   :  { %v3767_v11 = vpop.eup %3766 }
0x10d0   :  { %v3769_v14 = vpop.eup %3768  ;;  %v1261_v15 = vmul.f32 0.5, %v3767_v11 }
0x10d1   :  { %v1262_v17 = vmul.f32 %v3769_v14, %v4058_v57 }
0x10d2   :  { %v1263_v18 = vadd.f32 0.5, %v1261_v15 }
0x10d3   :  { %v1264_v20 = vadd.f32 %v1262_v17, %v4062_v61  ;;  %v242_v17 = vadd.f32 %v4373_v37, %v4049_v38 }
0x10d4   :  { %1265 = vrot.lane.b32.xlu0 %v1263_v18, %s3845_s22 }
0x10d5   :  { %1267 = vrot.lane.b32.xlu1 %v1264_v20, %s3845_s22 }
0x1146   :  { %v1266_v34 = vpop.permute.xlu0 %1265 }
0x1147   :  { %v1268_v46 = vpop.permute.xlu1 %1267 }
0x1148   :  { %v1269_v21 = vsel %vm473_vm2, %v1266_v34, %v1268_v46  ;;  %v1270_v23 = vsel %vm473_vm2, %v1268_v46, %v1266_v34 }
0x1149   :  { %v1271_v24 = vmul.f32 %v1269_v21, %v1220_v63  ;;  %v1272_v29 = vmul.f32 %v1270_v23, %v1263_v18  ;;  %v310_v18 = vadd.f32 %v4391_v51, %v4051_v39 }
0x114b   :  { %v1273_v25 = vadd.f32 %v1272_v29, %v1271_v24 }
0x114d   :  { %3770 = vtanh.f32 %v1273_v25 }
0x1153   :  { %v3771_v30 = vpop.eup %3770 }
0x1154   :  { %v1275_v12 = vmul.f32 %v3771_v30, %v1264_v20 }
0x1156   :  { %v1276_v31 = vmax.f32 %v1275_v12, 0.0  ;;  %v1280_v40 = vpack.c.bf16 %v1275_v12, %v1275_v12 }
0x1158   :  { %1277 = vst.msk [vmem:[#allocation3 + $0x78] sm:$0xff] %vm431_vm3, %v1276_v31  ;;  %3106 = vmatmul.msk.bf16.vlgmr.msrb.gmra.mxu0 %vm431_vm3, %v1280_v40  ;;  %3107 = vmatmul.msk.bf16.vlgmr.msrb.gmra.mxu1 %vm431_vm3, %v1280_v40 }
0x1159   :  { %1500 = vmatpush.bf16.msrb.mxu0 %v3934_v8  ;;  %1513 = vmatpush.bf16.msrb.mxu1 %v3947_v13 }
0x115d   :  { %1501 = vmatpush.bf16.msrb.mxu0 %v3956_v16  ;;  %1514 = vmatpush.bf16.msrb.mxu1 %v3965_v19 }
0x1161   :  { %1502 = vmatpush.bf16.msrb.mxu0 %v3987_v26  ;;  %1515 = vmatpush.bf16.msrb.mxu1 %v3991_v27 }
0x1165   :  { %1503 = vmatpush.bf16.msrb.mxu0 %v4008_v32  ;;  %1516 = vmatpush.bf16.msrb.mxu1 %v4012_v33 }
0x11d5   :  { %v1293_v44 = vpop.f32.mrf.mxu0  ;;  %v1306_v58 = vpop.f32.mrf.mxu1 }
0x11d6   :  { %v1310_v59 = vadd.f32 %v1293_v44, %v240_v52  ;;  %v1311_v60 = vadd.f32 %v1306_v58, %v308_v28 }
0x11d8   :  { %3772 = vtanh.f32 %v1310_v59 }
0x11d9   :  { %3774 = vtanh.f32 %v1311_v60 }
0x11dd   :  { %v1295_v62 = vpop.f32.mrf.mxu0  ;;  %v1308_v63 = vpop.f32.mrf.mxu1 }
0x11de   :  { %v3773_v0 = vpop.eup %3772 }
0x11df   :  { %v3775_v1 = vpop.eup %3774  ;;  %v1314_v2 = vmul.f32 0.5, %v3773_v0 }
0x11e0   :  { %v1315_v22 = vmul.f32 %v3775_v1, %v4058_v57  ;;  %v245_v1 = vadd.f32 %v4375_v41, %v4049_v38 }
0x11e1   :  { %v1316_v42 = vadd.f32 0.5, %v1314_v2 }
0x11e2   :  { %v1317_v3 = vadd.f32 %v1315_v22, %v4062_v61 }
0x11e3   :  { %1318 = vrot.lane.b32.xlu2 %v1316_v42, %s3845_s22 }
0x11e4   :  { %1320 = vrot.lane.b32.xlu0 %v1317_v3, %s3845_s22 }
0x123d   :  { %v1319_v36 = vpop.permute.xlu2 %1318 }
0x1256   :  { %v1321_v49 = vpop.permute.xlu0 %1320 }
0x1257   :  { %v1322_v4 = vsel %vm473_vm2, %v1319_v36, %v1321_v49  ;;  %v1323_v5 = vsel %vm473_vm2, %v1321_v49, %v1319_v36 }
0x1258   :  { %v1324_v6 = vmul.f32 %v1322_v4, %v1273_v25  ;;  %v1325_v7 = vmul.f32 %v1323_v5, %v1316_v42 }
0x125a   :  { %v1326_v9 = vadd.f32 %v1325_v7, %v1324_v6 }
0x125c   :  { %3776 = vtanh.f32 %v1326_v9 }
0x1262   :  { %v3777_v10 = vpop.eup %3776 }
0x1263   :  { %v1328_v11 = vmul.f32 %v3777_v10, %v1317_v3 }
0x1265   :  { %v1329_v14 = vmax.f32 %v1328_v11, 0.0  ;;  %v1333_v15 = vpack.c.bf16 %v1328_v11, %v1328_v11 }
0x1267   :  { %1330 = vst.msk [vmem:[#allocation3 + $0x80] sm:$0xff] %vm431_vm3, %v1329_v14  ;;  %3108 = vmatmul.msk.bf16.vlgmr.msrb.gmra.mxu2 %vm431_vm3, %v1333_v15  ;;  %3109 = vmatmul.msk.bf16.vlgmr.msra.gmra.mxu3 %vm431_vm3, %v1333_v15  ;;  %v247_v15 = vadd.f32 %v4377_v43, %v4049_v38 }
0x1268   :  { %1553 = vmatpush.bf16.msrb.mxu2 %v3934_v8  ;;  %1566 = vmatpush.bf16.msra.mxu3 %v3947_v13 }
0x126c   :  { %1554 = vmatpush.bf16.msrb.mxu2 %v3956_v16  ;;  %1567 = vmatpush.bf16.msra.mxu3 %v3965_v19 }
0x1270   :  { %1555 = vmatpush.bf16.msrb.mxu2 %v3987_v26  ;;  %1568 = vmatpush.bf16.msra.mxu3 %v3991_v27 }
0x1274   :  { %1556 = vmatpush.bf16.msrb.mxu2 %v4008_v32  ;;  %1569 = vmatpush.bf16.msra.mxu3 %v4012_v33 }
0x12ea   :  { %v1346_v20 = vpop.f32.mrf.mxu2  ;;  %v1359_v34 = vpop.f32.mrf.mxu3 }
0x12eb   :  { %v1363_v46 = vadd.f32 %v1346_v20, %v242_v17  ;;  %v1364_v21 = vadd.f32 %v1359_v34, %v310_v18  ;;  %v315_v17 = vadd.f32 %v4395_v54, %v4051_v39 }
0x12ed   :  { %3778 = vtanh.f32 %v1363_v46 }
0x12ee   :  { %3780 = vtanh.f32 %v1364_v21 }
0x12f2   :  { %v1348_v23 = vpop.f32.mrf.mxu2  ;;  %v1361_v24 = vpop.f32.mrf.mxu3 }
0x12f3   :  { %v3779_v29 = vpop.eup %3778 }
0x12f4   :  { %v3781_v25 = vpop.eup %3780  ;;  %v1367_v30 = vmul.f32 0.5, %v3779_v29 }
0x12f5   :  { %v1368_v12 = vmul.f32 %v3781_v25, %v4058_v57 }
0x12f6   :  { %v1369_v31 = vadd.f32 0.5, %v1367_v30 }
0x12f7   :  { %v1370_v40 = vadd.f32 %v1368_v12, %v4062_v61 }
0x12f8   :  { %1371 = vrot.lane.b32.xlu1 %v1369_v31, %s3845_s22 }
0x12f9   :  { %1373 = vrot.lane.b32.xlu2 %v1370_v40, %s3845_s22 }
0x1353   :  { %v1374_v37 = vpop.permute.xlu2 %1373 }
0x136a   :  { %v1372_v51 = vpop.permute.xlu1 %1371 }
0x136b   :  { %v1375_v52 = vsel %vm473_vm2, %v1372_v51, %v1374_v37  ;;  %v1376_v28 = vsel %vm473_vm2, %v1374_v37, %v1372_v51 }
0x136c   :  { %v1377_v44 = vmul.f32 %v1375_v52, %v1326_v9  ;;  %v1378_v58 = vmul.f32 %v1376_v28, %v1369_v31 }
0x136e   :  { %v1379_v59 = vadd.f32 %v1378_v58, %v1377_v44 }
0x1370   :  { %3782 = vtanh.f32 %v1379_v59 }
0x1376   :  { %v3783_v60 = vpop.eup %3782 }
0x1377   :  { %v1381_v62 = vmul.f32 %v3783_v60, %v1370_v40 }
0x1379   :  { %v1382_v63 = vmax.f32 %v1381_v62, 0.0  ;;  %v1386_v0 = vpack.c.bf16 %v1381_v62, %v1381_v62  ;;  %v250_v62 = vadd.f32 %v4381_v45, %v4049_v38  ;;  %v3567_v45 = vld [vmem:[#allocation4 + $0x18] sm:$0xff] }
0x137b   :  { %1383 = vst.msk [vmem:[#allocation3 + $0x88] sm:$0xff] %vm431_vm3, %v1382_v63  ;;  %3110 = vmatmul.msk.bf16.vlgmr.msra.gmra.mxu0 %vm431_vm3, %v1386_v0  ;;  %3111 = vmatmul.msk.bf16.vlgmr.msra.gmra.mxu1 %vm431_vm3, %v1386_v0  ;;  %v318_v63 = vadd.f32 %v4397_v55, %v4051_v39  ;;  %v3571_v55 = vld [vmem:[#allocation4 + $0x38] sm:$0xff] }
0x137c   :  { %1619 = vmatpush.bf16.msra.mxu1 %v3947_v13  ;;  %1606 = vmatpush.bf16.msra.mxu0 %v3934_v8  ;;  %v313_v13 = vadd.f32 %v4393_v53, %v4051_v39 }
0x1380   :  { %1620 = vmatpush.bf16.msra.mxu1 %v3965_v19  ;;  %1607 = vmatpush.bf16.msra.mxu0 %v3956_v16 }
0x1384   :  { %1621 = vmatpush.bf16.msra.mxu1 %v3991_v27  ;;  %1608 = vmatpush.bf16.msra.mxu0 %v3987_v26 }
0x1388   :  { %1622 = vmatpush.bf16.msra.mxu1 %v4012_v33  ;;  %1609 = vmatpush.bf16.msra.mxu0 %v4008_v32 }
0x13f8   :  { %v1399_v2 = vpop.f32.mrf.mxu0  ;;  %v1412_v8 = vpop.f32.mrf.mxu1 }
0x13f9   :  { %v1416_v22 = vadd.f32 %v1399_v2, %v245_v1  ;;  %v1417_v19 = vadd.f32 %v1412_v8, %v313_v13 }
0x13fb   :  { %3784 = vtanh.f32 %v1416_v22 }
0x13fc   :  { %3786 = vtanh.f32 %v1417_v19 }
0x1400   :  { %v1401_v16 = vpop.f32.mrf.mxu0  ;;  %v1414_v27 = vpop.f32.mrf.mxu1 }
0x1401   :  { %v3785_v42 = vpop.eup %3784 }
0x1402   :  { %v3787_v26 = vpop.eup %3786  ;;  %v1420_v3 = vmul.f32 0.5, %v3785_v42 }
0x1403   :  { %v1421_v33 = vmul.f32 %v3787_v26, %v4058_v57 }
0x1404   :  { %v1422_v32 = vadd.f32 0.5, %v1420_v3 }
0x1405   :  { %v1423_v36 = vadd.f32 %v1421_v33, %v4062_v61  ;;  %v3566_v33 = vld [vmem:[#allocation4 + $0x10] sm:$0xff] }
0x1406   :  { %1424 = vrot.lane.b32.xlu0 %v1422_v32, %s3845_s22 }
0x1407   :  { %1426 = vrot.lane.b32.xlu1 %v1423_v36, %s3845_s22 }
0x1478   :  { %v1425_v41 = vpop.permute.xlu0 %1424 }
0x1479   :  { %v1427_v53 = vpop.permute.xlu1 %1426 }
0x147a   :  { %v1428_v49 = vsel %vm473_vm2, %v1425_v41, %v1427_v53  ;;  %v1429_v4 = vsel %vm473_vm2, %v1427_v53, %v1425_v41  ;;  %v3569_v41 = vld [vmem:[#allocation4 + $0x28] sm:$0xff]  ;;  %v3564_v53 = vld [vmem:[#allocation4] sm:$0xff] }
0x147b   :  { %v1430_v5 = vmul.f32 %v1428_v49, %v1379_v59  ;;  %v1431_v6 = vmul.f32 %v1429_v4, %v1422_v32  ;;  %v3570_v32 = vld [vmem:[#allocation4 + $0x30] sm:$0xff]  ;;  %v3568_v49 = vld [vmem:[#allocation4 + $0x20] sm:$0xff] }
0x147d   :  { %v1432_v7 = vadd.f32 %v1431_v6, %v1430_v5 }
0x147f   :  { %3788 = vtanh.f32 %v1432_v7 }
0x1485   :  { %v3789_v9 = vpop.eup %3788 }
0x1486   :  { %v1434_v10 = vmul.f32 %v3789_v9, %v1423_v36  ;;  %v3565_v36 = vld [vmem:[#allocation4 + $0x8] sm:$0xff] }
0x1488   :  { %v1435_v11 = vmax.f32 %v1434_v10, 0.0  ;;  %v1439_v14 = vpack.c.bf16 %v1434_v10, %v1434_v10 }
0x148a   :  { %1436 = vst.msk [vmem:[#allocation3 + $0x90] sm:$0xff] %vm431_vm3, %v1435_v11  ;;  %3112 = vmatmul.msk.bf16.vlgmr.msra.gmra.mxu2 %vm431_vm3, %v1439_v14  ;;  %3113 = vmatmul.msk.bf16.vlgmr.msrb.gmra.mxu3 %vm431_vm3, %v1439_v14 }
0x148b   :  { %1694 = vmatpush.bf16.msra.mxu2 %v3567_v45  ;;  %1745 = vmatpush.bf16.msrb.mxu3 %v3571_v55 }
0x148f   :  { %1695 = vmatpush.bf16.msra.mxu2 %v3566_v33  ;;  %1746 = vmatpush.bf16.msrb.mxu3 %v3570_v32  ;;  %v3630_v33 = vld [vmem:[#allocation4 + $0x210] sm:$0xff] }
0x1490   :  { %v3634_v32 = vld [vmem:[#allocation4 + $0x230] sm:$0xff] }
0x1493   :  { %1696 = vmatpush.bf16.msra.mxu2 %v3565_v36  ;;  %1747 = vmatpush.bf16.msrb.mxu3 %v3569_v41  ;;  %v3629_v36 = vld [vmem:[#allocation4 + $0x208] sm:$0xff] }
0x1494   :  { %v3633_v41 = vld [vmem:[#allocation4 + $0x228] sm:$0xff] }
0x1497   :  { %1697 = vmatpush.bf16.msra.mxu2 %v3564_v53  ;;  %1748 = vmatpush.bf16.msrb.mxu3 %v3568_v49  ;;  %v3628_v53 = vld [vmem:[#allocation4 + $0x200] sm:$0xff] }
0x1498   :  { %v3632_v49 = vld [vmem:[#allocation4 + $0x220] sm:$0xff] }
0x150d   :  { %v1452_v18 = vpop.f32.mrf.mxu2  ;;  %v1465_v20 = vpop.f32.mrf.mxu3 }
0x150e   :  { %v1469_v34 = vadd.f32 %v1452_v18, %v247_v15  ;;  %v1470_v46 = vadd.f32 %v1465_v20, %v315_v17  ;;  %v3583_v17 = vld [vmem:[#allocation4 + $0x98] sm:$0xff] }
0x150f   :  { %v3587_v18 = vld [vmem:[#allocation4 + $0xb8] sm:$0xff] }
0x1510   :  { %3790 = vtanh.f32 %v1469_v34 }
0x1511   :  { %3792 = vtanh.f32 %v1470_v46  ;;  %v3582_v46 = vld [vmem:[#allocation4 + $0x90] sm:$0xff] }
0x1515   :  { %v1454_v21 = vpop.f32.mrf.mxu2  ;;  %v1467_v23 = vpop.f32.mrf.mxu3 }
0x1516   :  { %v3791_v24 = vpop.eup %3790  ;;  %v3586_v21 = vld [vmem:[#allocation4 + $0xb0] sm:$0xff]  ;;  %v3581_v23 = vld [vmem:[#allocation4 + $0x88] sm:$0xff] }
0x1517   :  { %v3793_v29 = vpop.eup %3792  ;;  %v1473_v25 = vmul.f32 0.5, %v3791_v24  ;;  %v3585_v24 = vld [vmem:[#allocation4 + $0xa8] sm:$0xff] }
0x1518   :  { %v1474_v30 = vmul.f32 %v3793_v29, %v4058_v57  ;;  %v3580_v29 = vld [vmem:[#allocation4 + $0x80] sm:$0xff] }
0x1519   :  { %v1475_v12 = vadd.f32 0.5, %v1473_v25  ;;  %v3584_v25 = vld [vmem:[#allocation4 + $0xa0] sm:$0xff] }
0x151a   :  { %v1476_v31 = vadd.f32 %v1474_v30, %v4062_v61  ;;  %v1653_v30 = vld [vmem:[#allocation3] sm:$0xff] }
0x151b   :  { %1477 = vrot.lane.b32.xlu2 %v1475_v12, %s3845_s22 }
0x151c   :  { %1479 = vrot.lane.b32.xlu0 %v1476_v31, %s3845_s22 }
0x1575   :  { %v1478_v43 = vpop.permute.xlu2 %1477 }
0x158e   :  { %v1480_v54 = vpop.permute.xlu0 %1479 }
0x158f   :  { %v1481_v40 = vsel %vm473_vm2, %v1478_v43, %v1480_v54  ;;  %v1482_v37 = vsel %vm473_vm2, %v1480_v54, %v1478_v43  ;;  %v3603_v43 = vld [vmem:[#allocation4 + $0x138] sm:$0xff]  ;;  %v1654_v54 = vpack.c.bf16 %v1653_v30, %v1653_v30 }
0x1590   :  { %v1483_v51 = vmul.f32 %v1481_v40, %v1432_v7  ;;  %v1484_v52 = vmul.f32 %v1482_v37, %v1475_v12  ;;  %v1704_v12 = vld [vmem:[#allocation3 + $0x8] sm:$0xff] }
0x1591   :  { %v1705_v40 = vpack.c.bf16 %v1704_v12, %v1704_v12  ;;  %v3598_v37 = vld [vmem:[#allocation4 + $0x110] sm:$0xff] }
0x1592   :  { %v1485_v28 = vadd.f32 %v1484_v52, %v1483_v51  ;;  %v3602_v51 = vld [vmem:[#allocation4 + $0x130] sm:$0xff]  ;;  %v3597_v52 = vld [vmem:[#allocation4 + $0x108] sm:$0xff] }
0x1594   :  { %3794 = vtanh.f32 %v1485_v28 }
0x159a   :  { %v3795_v44 = vpop.eup %3794 }
0x159b   :  { %v1487_v58 = vmul.f32 %v3795_v44, %v1476_v31  ;;  %v3599_v31 = vld [vmem:[#allocation4 + $0x118] sm:$0xff]  ;;  %v3596_v44 = vld [vmem:[#allocation4 + $0x100] sm:$0xff] }
0x159d   :  { %v1488_v59 = vmax.f32 %v1487_v58, 0.0  ;;  %v1492_v60 = vpack.c.bf16 %v1487_v58, %v1487_v58  ;;  %v3600_v58 = vld [vmem:[#allocation4 + $0x120] sm:$0xff] }
0x159f   :  { %1489 = vst.msk [vmem:[#allocation3 + $0x98] sm:$0xff] %vm431_vm3, %v1488_v59  ;;  %3114 = vmatmul.msk.bf16.vlgmr.msrb.gmra.mxu0 %vm431_vm3, %v1492_v60  ;;  %3115 = vmatmul.msk.bf16.vlgmr.msrb.gmra.mxu1 %vm431_vm3, %v1492_v60  ;;  %v1857_v59 = vld [vmem:[#allocation3 + $0x20] sm:$0xff]  ;;  %v1908_v60 = vld [vmem:[#allocation3 + $0x28] sm:$0xff] }
0x161c   :  { %v1505_v0 = vpop.f32.mrf.mxu0  ;;  %v1518_v1 = vpop.f32.mrf.mxu1 }
0x161d   :  { %v1522_v13 = vadd.f32 %v1505_v0, %v250_v62  ;;  %v1523_v2 = vadd.f32 %v1518_v1, %v318_v63  ;;  %v3615_v62 = vld [vmem:[#allocation4 + $0x198] sm:$0xff]  ;;  %v1858_v0 = vpack.c.bf16 %v1857_v59, %v1857_v59  ;;  %v1909_v1 = vpack.c.bf16 %v1908_v60, %v1908_v60 }
0x161e   :  { %v3619_v63 = vld [vmem:[#allocation4 + $0x1b8] sm:$0xff] }
0x161f   :  { %3796 = vtanh.f32 %v1522_v13  ;;  %v3614_v13 = vld [vmem:[#allocation4 + $0x190] sm:$0xff] }
0x1620   :  { %3798 = vtanh.f32 %v1523_v2  ;;  %v3618_v2 = vld [vmem:[#allocation4 + $0x1b0] sm:$0xff] }
0x1624   :  { %v1507_v8 = vpop.f32.mrf.mxu0  ;;  %v1520_v22 = vpop.f32.mrf.mxu1 }
0x1625   :  { %v3797_v19 = vpop.eup %3796  ;;  %v3613_v8 = vld [vmem:[#allocation4 + $0x188] sm:$0xff] }
0x1626   :  { %v3799_v16 = vpop.eup %3798  ;;  %v1526_v27 = vmul.f32 0.5, %v3797_v19  ;;  %v3617_v22 = vld [vmem:[#allocation4 + $0x1a8] sm:$0xff]  ;;  %v3612_v19 = vld [vmem:[#allocation4 + $0x180] sm:$0xff] }
0x1627   :  { %v1527_v42 = vmul.f32 %v3799_v16, %v4058_v57  ;;  %v3616_v16 = vld [vmem:[#allocation4 + $0x1a0] sm:$0xff] }
0x1628   :  { %v1528_v26 = vadd.f32 0.5, %v1526_v27  ;;  %v2061_v27 = vld [vmem:[#allocation3 + $0x40] sm:$0xff] }
0x1629   :  { %v1529_v3 = vadd.f32 %v1527_v42, %v4062_v61  ;;  %v2112_v42 = vld [vmem:[#allocation3 + $0x48] sm:$0xff]  ;;  %v2062_v45 = vpack.c.bf16 %v2061_v27, %v2061_v27 }
0x162a   :  { %1530 = vrot.lane.b32.xlu1 %v1528_v26, %s3845_s22  ;;  %v2113_v55 = vpack.c.bf16 %v2112_v42, %v2112_v42 }
0x162b   :  { %1532 = vrot.lane.b32.xlu2 %v1529_v3, %s3845_s22 }
0x1685   :  { %v1533_v4 = vpop.permute.xlu2 %1532 }
0x169c   :  { %v1531_v5 = vpop.permute.xlu1 %1530 }
0x169d   :  { %v1534_v6 = vsel %vm473_vm2, %v1531_v5, %v1533_v4  ;;  %v1535_v7 = vsel %vm473_vm2, %v1533_v4, %v1531_v5  ;;  %v2265_v4 = vld [vmem:[#allocation3 + $0x60] sm:$0xff]  ;;  %v2316_v5 = vld [vmem:[#allocation3 + $0x68] sm:$0xff] }
0x169e   :  { %v1536_v9 = vmul.f32 %v1534_v6, %v1485_v28  ;;  %v1537_v10 = vmul.f32 %v1535_v7, %v1528_v26  ;;  %v3601_v28 = vld [vmem:[#allocation4 + $0x128] sm:$0xff]  ;;  %v3631_v26 = vld [vmem:[#allocation4 + $0x218] sm:$0xff]  ;;  %v2266_v7 = vpack.c.bf16 %v2265_v4, %v2265_v4 }
0x169f   :  { %v3647_v6 = vld [vmem:[#allocation4 + $0x298] sm:$0xff] }
0x16a0   :  { %v4578_v11 = vadd.f32 %v1537_v10, %v1536_v9  ;;  %v2317_v9 = vpack.c.bf16 %v2316_v5, %v2316_v5  ;;  %v3646_v10 = vld [vmem:[#allocation4 + $0x290] sm:$0xff]  ;;  %v3579_v4 = vld [vmem:[#allocation4 + $0x78] sm:$0xff]  ;;  %v3649_v5 = vld [vmem:[#allocation4 + $0x2a8] sm:$0xff] }
0x16a1   :  { %1847 = vmatpush.bf16.msrb.mxu1 %v3579_v4 }
0x16a2   :  { %3800 = vtanh.f32 %v4578_v11 }
0x16a8   :  { %v3801_v14 = vpop.eup %3800 }
0x16a9   :  { %v1540_v15 = vmul.f32 %v3801_v14, %v1529_v3  ;;  %v3635_v3 = vld [vmem:[#allocation4 + $0x238] sm:$0xff]  ;;  %v3645_v14 = vld [vmem:[#allocation4 + $0x288] sm:$0xff] }
0x16ab   :  { %v1541_v20 = vmax.f32 %v1540_v15, 0.0  ;;  %v1545_v34 = vpack.c.bf16 %v1540_v15, %v1540_v15  ;;  %v3644_v15 = vld [vmem:[#allocation4 + $0x280] sm:$0xff] }
0x16ad   :  { %1542 = vst.msk [vmem:[#allocation3 + $0xa0] sm:$0xff] %vm431_vm3, %v1541_v20  ;;  %3116 = vmatmul.msk.bf16.vlgmr.msrb.gmra.mxu2 %vm431_vm3, %v1545_v34  ;;  %3117 = vmatmul.msk.bf16.vlgmr.msra.gmra.mxu3 %vm431_vm3, %v1545_v34 }
0x16ae   :  { %1898 = vmatpush.bf16.msrb.mxu2 %v3583_v17  ;;  %1949 = vmatpush.bf16.msra.mxu3 %v3587_v18  ;;  %v2469_v17 = vld [vmem:[#allocation3 + $0x80] sm:$0xff]  ;;  %v2520_v18 = vld [vmem:[#allocation3 + $0x88] sm:$0xff] }
0x16af   :  { %v2470_v20 = vpack.c.bf16 %v2469_v17, %v2469_v17  ;;  %v2521_v34 = vpack.c.bf16 %v2520_v18, %v2520_v18  ;;  %v3576_v17 = vld [vmem:[#allocation4 + $0x60] sm:$0xff] }
0x16b2   :  { %1899 = vmatpush.bf16.msrb.mxu2 %v3582_v46  ;;  %1950 = vmatpush.bf16.msra.mxu3 %v3586_v21 }
0x16b4   :  { %v2673_v46 = vld [vmem:[#allocation3 + $0xa0] sm:$0xff] }
0x16b5   :  { %v2674_v21 = vpack.c.bf16 %v2673_v46, %v2673_v46 }
0x16b6   :  { %1900 = vmatpush.bf16.msrb.mxu2 %v3581_v23  ;;  %1951 = vmatpush.bf16.msra.mxu3 %v3585_v24  ;;  %v252_v23 = vadd.f32 %v4385_v48, %v4049_v38  ;;  %v320_v24 = vadd.f32 %v4399_v56, %v4051_v39  ;;  %v3672_v48 = vld [vmem:[%s4719_s5] ss:$0 sm:$0xff] }
0x16ba   :  { %1901 = vmatpush.bf16.msrb.mxu2 %v3580_v29  ;;  %1952 = vmatpush.bf16.msra.mxu3 %v3584_v25 }
0x16bd   :  { %3136 = vmatmul.msk.bf16.vlgmr.msra.gmra.mxu2 %vm431_vm3, %v1654_v54  ;;  %3153 = vmatmul.msk.bf16.vlgmr.msrb.gmra.mxu3 %vm431_vm3, %v1705_v40 }
0x16be   :  { %2102 = vmatpush.bf16.msra.mxu2 %v3599_v31  ;;  %2153 = vmatpush.bf16.msrb.mxu3 %v3603_v43 }
0x16c2   :  { %2103 = vmatpush.bf16.msra.mxu2 %v3598_v37  ;;  %2154 = vmatpush.bf16.msrb.mxu3 %v3602_v51 }
0x16c6   :  { %2104 = vmatpush.bf16.msra.mxu2 %v3597_v52  ;;  %2155 = vmatpush.bf16.msrb.mxu3 %v3601_v28 }
0x16ca   :  { %2105 = vmatpush.bf16.msra.mxu2 %v3596_v44  ;;  %2156 = vmatpush.bf16.msrb.mxu3 %v3600_v58 }
0x16cd   :  { %3204 = vmatmul.msk.bf16.vlgmr.msrb.gmra.mxu2 %vm431_vm3, %v1858_v0  ;;  %3221 = vmatmul.msk.bf16.vlgmr.msra.gmra.mxu3 %vm431_vm3, %v1909_v1 }
0x16ce   :  { %2306 = vmatpush.bf16.msrb.mxu2 %v3615_v62  ;;  %2357 = vmatpush.bf16.msra.mxu3 %v3619_v63 }
0x16d2   :  { %2307 = vmatpush.bf16.msrb.mxu2 %v3614_v13  ;;  %2358 = vmatpush.bf16.msra.mxu3 %v3618_v2 }
0x16d6   :  { %2308 = vmatpush.bf16.msrb.mxu2 %v3613_v8  ;;  %2359 = vmatpush.bf16.msra.mxu3 %v3617_v22 }
0x16da   :  { %2309 = vmatpush.bf16.msrb.mxu2 %v3612_v19  ;;  %2360 = vmatpush.bf16.msra.mxu3 %v3616_v16 }
0x16dd   :  { %3272 = vmatmul.msk.bf16.vlgmr.msra.gmra.mxu2 %vm431_vm3, %v2062_v45  ;;  %3289 = vmatmul.msk.bf16.vlgmr.msrb.gmra.mxu3 %vm431_vm3, %v2113_v55 }
0x16de   :  { %2510 = vmatpush.bf16.msra.mxu2 %v3631_v26  ;;  %2561 = vmatpush.bf16.msrb.mxu3 %v3635_v3 }
0x16e2   :  { %2511 = vmatpush.bf16.msra.mxu2 %v3630_v33  ;;  %2562 = vmatpush.bf16.msrb.mxu3 %v3634_v32 }
0x16e6   :  { %2512 = vmatpush.bf16.msra.mxu2 %v3629_v36  ;;  %2563 = vmatpush.bf16.msrb.mxu3 %v3633_v41  ;;  %v3651_v41 = vld [vmem:[#allocation4 + $0x2b8] sm:$0xff] }
0x16ea   :  { %2513 = vmatpush.bf16.msra.mxu2 %v3628_v53  ;;  %2564 = vmatpush.bf16.msrb.mxu3 %v3632_v49  ;;  %v3650_v53 = vld [vmem:[#allocation4 + $0x2b0] sm:$0xff]  ;;  %v3575_v49 = vld [vmem:[#allocation4 + $0x58] sm:$0xff] }
0x16eb   :  { %1796 = vmatpush.bf16.msrb.mxu0 %v3575_v49 }
0x16ed   :  { %3340 = vmatmul.msk.bf16.vlgmr.msrb.gmra.mxu2 %vm431_vm3, %v2266_v7  ;;  %3357 = vmatmul.msk.bf16.vlgmr.msra.gmra.mxu3 %vm431_vm3, %v2317_v9  ;;  %v3578_v7 = vld [vmem:[#allocation4 + $0x70] sm:$0xff]  ;;  %v3648_v9 = vld [vmem:[#allocation4 + $0x2a0] sm:$0xff] }
0x16ee   :  { %2714 = vmatpush.bf16.msrb.mxu2 %v3647_v6  ;;  %2765 = vmatpush.bf16.msra.mxu3 %v3651_v41  ;;  %v3574_v6 = vld [vmem:[#allocation4 + $0x50] sm:$0xff]  ;;  %v3623_v41 = vld [vmem:[#allocation4 + $0x1d8] sm:$0xff] }
0x16ef   :  { %1797 = vmatpush.bf16.msrb.mxu0 %v3574_v6  ;;  %1848 = vmatpush.bf16.msrb.mxu1 %v3578_v7  ;;  %v3626_v6 = vld [vmem:[#allocation4 + $0x1f0] sm:$0xff]  ;;  %v3621_v7 = vld [vmem:[#allocation4 + $0x1c8] sm:$0xff] }
0x16f2   :  { %2715 = vmatpush.bf16.msrb.mxu2 %v3646_v10  ;;  %2766 = vmatpush.bf16.msra.mxu3 %v3650_v53  ;;  %v3573_v10 = vld [vmem:[#allocation4 + $0x48] sm:$0xff]  ;;  %v3627_v53 = vld [vmem:[#allocation4 + $0x1f8] sm:$0xff] }
0x16f3   :  { %1798 = vmatpush.bf16.msrb.mxu0 %v3573_v10  ;;  %v3620_v10 = vld [vmem:[#allocation4 + $0x1c0] sm:$0xff] }
0x16f6   :  { %2716 = vmatpush.bf16.msrb.mxu2 %v3645_v14  ;;  %2767 = vmatpush.bf16.msra.mxu3 %v3649_v5  ;;  %v3577_v14 = vld [vmem:[#allocation4 + $0x68] sm:$0xff]  ;;  %v3622_v5 = vld [vmem:[#allocation4 + $0x1d0] sm:$0xff] }
0x16f7   :  { %1849 = vmatpush.bf16.msrb.mxu1 %v3577_v14  ;;  %v3624_v14 = vld [vmem:[#allocation4 + $0x1e0] sm:$0xff] }
0x16fa   :  { %2717 = vmatpush.bf16.msrb.mxu2 %v3644_v15  ;;  %2768 = vmatpush.bf16.msra.mxu3 %v3648_v9  ;;  %v3572_v15 = vld [vmem:[#allocation4 + $0x40] sm:$0xff]  ;;  %v3625_v9 = vld [vmem:[#allocation4 + $0x1e8] sm:$0xff] }
0x16fb   :  { %1799 = vmatpush.bf16.msrb.mxu0 %v3572_v15  ;;  %1850 = vmatpush.bf16.msrb.mxu1 %v3576_v17  ;;  %v2163_v15 = vld [vmem:[#allocation3 + $0x50] sm:$0xff]  ;;  %v2214_v17 = vld [vmem:[#allocation3 + $0x58] sm:$0xff] }
0x16fd   :  { %3408 = vmatmul.msk.bf16.vlgmr.msra.gmra.mxu2 %vm431_vm3, %v2470_v20  ;;  %3425 = vmatmul.msk.bf16.vlgmr.msrb.gmra.mxu3 %vm431_vm3, %v2521_v34 }
0x170d   :  { %3476 = vmatmul.msk.bf16.vlgmr.msrb.gmra.mxu2 %vm431_vm3, %v2674_v21 }
0x1730   :  { %v1558_v29 = vpop.f32.mrf.mxu2  ;;  %v1571_v25 = vpop.f32.mrf.mxu3 }
0x1731   :  { %v1575_v30 = vadd.f32 %v1558_v29, %v252_v23  ;;  %v1576_v12 = vadd.f32 %v1571_v25, %v320_v24 }
0x1733   :  { %3802 = vtanh.f32 %v1575_v30  ;;  %v3591_v30 = vld [vmem:[#allocation4 + $0xd8] sm:$0xff] }
0x1734   :  { %3804 = vtanh.f32 %v1576_v12  ;;  %v3595_v12 = vld [vmem:[#allocation4 + $0xf8] sm:$0xff] }
0x1738   :  { %v1560_v31 = vpop.f32.mrf.mxu2  ;;  %v1573_v43 = vpop.f32.mrf.mxu3 }
0x1739   :  { %v3803_v54 = vpop.eup %3802 }
0x173a   :  { %v3805_v40 = vpop.eup %3804  ;;  %v1579_v37 = vmul.f32 0.5, %v3803_v54  ;;  %v3594_v54 = vld [vmem:[#allocation4 + $0xf0] sm:$0xff] }
0x173b   :  { %v1580_v51 = vmul.f32 %v3805_v40, %v4058_v57  ;;  %v3589_v40 = vld [vmem:[#allocation4 + $0xc8] sm:$0xff] }
0x173c   :  { %v1581_v52 = vadd.f32 0.5, %v1579_v37  ;;  %v3593_v37 = vld [vmem:[#allocation4 + $0xe8] sm:$0xff] }
0x173d   :  { %v1582_v28 = vadd.f32 %v1580_v51, %v4062_v61 }
0x173e   :  { %1583 = vrot.lane.b32.xlu0 %v1581_v52, %s3845_s22 }
0x173f   :  { %1585 = vrot.lane.b32.xlu1 %v1582_v28, %s3845_s22 }
0x1740   :  { %v1699_v56 = vpop.f32.mrf.mxu2  ;;  %v1750_v44 = vpop.f32.mrf.mxu3 }
0x1741   :  { %v1703_v58 = vadd.f32 %v3672_v48, %v1699_v56  ;;  %v3592_v48 = vld [vmem:[#allocation4 + $0xe0] sm:$0xff]  ;;  %v1755_v56 = vld [vmem:[#allocation3 + $0x10] sm:$0xff] }
0x1743   :  { %v4606_v59 = vadd.f32 %v1750_v44, %v1703_v58  ;;  %v1806_v44 = vld [vmem:[#allocation3 + $0x18] sm:$0xff]  ;;  %v3607_v58 = vld [vmem:[#allocation4 + $0x158] sm:$0xff] }
0x1748   :  { %v1701_v60 = vpop.f32.mrf.mxu2  ;;  %v1752_v62 = vpop.f32.mrf.mxu3 }
0x1749   :  { %v3611_v60 = vld [vmem:[#allocation4 + $0x178] sm:$0xff]  ;;  %v1756_v62 = vpack.c.bf16 %v1755_v56, %v1755_v56 }
0x1750   :  { %v4608_v63 = vpop.f32.mrf.mxu2  ;;  %v4610_v0 = vpop.f32.mrf.mxu3 }
0x1758   :  { %v1905_v1 = vpop.f32.mrf.mxu2  ;;  %v1956_v13 = vpop.f32.mrf.mxu3 }
0x1759   :  { %v1807_v1 = vpack.c.bf16 %v1806_v44, %v1806_v44  ;;  %v3606_v13 = vld [vmem:[#allocation4 + $0x150] sm:$0xff] }
0x1760   :  { %v4612_v2 = vpop.f32.mrf.mxu2  ;;  %v4614_v8 = vpop.f32.mrf.mxu3 }
0x1768   :  { %v2109_v22 = vpop.f32.mrf.mxu2  ;;  %v2160_v19 = vpop.f32.mrf.mxu3 }
0x1769   :  { %v3610_v22 = vld [vmem:[#allocation4 + $0x170] sm:$0xff]  ;;  %v3605_v19 = vld [vmem:[#allocation4 + $0x148] sm:$0xff] }
0x1770   :  { %v4616_v16 = vpop.f32.mrf.mxu2  ;;  %v4618_v27 = vpop.f32.mrf.mxu3 }
0x1778   :  { %v2313_v42 = vpop.f32.mrf.mxu2  ;;  %v2364_v26 = vpop.f32.mrf.mxu3 }
0x1779   :  { %v3609_v42 = vld [vmem:[#allocation4 + $0x168] sm:$0xff]  ;;  %v3604_v26 = vld [vmem:[#allocation4 + $0x140] sm:$0xff] }
0x1780   :  { %v4620_v3 = vpop.f32.mrf.mxu2  ;;  %v4622_v45 = vpop.f32.mrf.mxu3 }
0x1788   :  { %v2517_v55 = vpop.f32.mrf.mxu2  ;;  %v2568_v33 = vpop.f32.mrf.mxu3 }
0x1789   :  { %v3608_v55 = vld [vmem:[#allocation4 + $0x160] sm:$0xff]  ;;  %v1959_v33 = vld [vmem:[#allocation3 + $0x30] sm:$0xff] }
0x178a   :  { %v1960_v49 = vpack.c.bf16 %v1959_v33, %v1959_v33 }
0x1790   :  { %v4624_v32 = vpop.f32.mrf.mxu2 }
0x1798   :  { %v2721_v36 = vpop.f32.mrf.mxu2 }
0x1799   :  { %v2010_v36 = vld [vmem:[#allocation3 + $0x38] sm:$0xff] }
0x179a   :  { %v2011_v4 = vpack.c.bf16 %v2010_v36, %v2010_v36 }
0x17b0   :  { %v1584_v18 = vpop.permute.xlu0 %1583 }
0x17b1   :  { %v1586_v20 = vpop.permute.xlu1 %1585 }
0x17b2   :  { %v1587_v34 = vsel %vm473_vm2, %v1584_v18, %v1586_v20  ;;  %v1588_v46 = vsel %vm473_vm2, %v1586_v20, %v1584_v18  ;;  %v3639_v18 = vld [vmem:[#allocation4 + $0x258] sm:$0xff] }
0x17b3   :  { %v1589_v21 = vmul.f32 %v1587_v34, %v4578_v11  ;;  %v1590_v23 = vmul.f32 %v1588_v46, %v1581_v52  ;;  %v3590_v11 = vld [vmem:[#allocation4 + $0xd0] sm:$0xff]  ;;  %v3643_v20 = vld [vmem:[#allocation4 + $0x278] sm:$0xff]  ;;  %v2164_v34 = vpack.c.bf16 %v2163_v15, %v2163_v15  ;;  %v2215_v46 = vpack.c.bf16 %v2214_v17, %v2214_v17 }
0x17b5   :  { %v4631_v24 = vadd.f32 %v1590_v23, %v1589_v21  ;;  %v3638_v21 = vld [vmem:[#allocation4 + $0x250] sm:$0xff] }
0x17b6   :  { %v3642_v23 = vld [vmem:[#allocation4 + $0x270] sm:$0xff] }
0x17b7   :  { %3806 = vtanh.f32 %v4631_v24 }
0x17bd   :  { %v3807_v29 = vpop.eup %3806 }
0x17be   :  { %v1593_v25 = vmul.f32 %v3807_v29, %v1582_v28  ;;  %v3588_v28 = vld [vmem:[#allocation4 + $0xc0] sm:$0xff]  ;;  %v3637_v29 = vld [vmem:[#allocation4 + $0x248] sm:$0xff] }
0x17c0   :  { %v1594_v31 = vmax.f32 %v1593_v25, 0.0  ;;  %v1598_v43 = vpack.c.bf16 %v1593_v25, %v1593_v25  ;;  %v3641_v25 = vld [vmem:[#allocation4 + $0x268] sm:$0xff] }
0x17c2   :  { %1595 = vst.msk [vmem:[#allocation3 + $0xa8] sm:$0xff] %vm431_vm3, %v1594_v31  ;;  %3118 = vmatmul.msk.bf16.vlgmr.msra.gmra.mxu0 %vm431_vm3, %v1598_v43  ;;  %3119 = vmatmul.msk.bf16.vlgmr.msra.gmra.mxu1 %vm431_vm3, %v1598_v43  ;;  %v2367_v31 = vld [vmem:[#allocation3 + $0x70] sm:$0xff]  ;;  %v2418_v43 = vld [vmem:[#allocation3 + $0x78] sm:$0xff] }
0x17c3   :  { %2000 = vmatpush.bf16.msra.mxu0 %v3591_v30  ;;  %2051 = vmatpush.bf16.msra.mxu1 %v3595_v12  ;;  %v3636_v30 = vld [vmem:[#allocation4 + $0x240] sm:$0xff] }
0x17c4   :  { %v3640_v12 = vld [vmem:[#allocation4 + $0x260] sm:$0xff] }
0x17c7   :  { %2001 = vmatpush.bf16.msra.mxu0 %v3590_v11  ;;  %2052 = vmatpush.bf16.msra.mxu1 %v3594_v54  ;;  %v2368_v11 = vpack.c.bf16 %v2367_v31, %v2367_v31  ;;  %v2419_v54 = vpack.c.bf16 %v2418_v43, %v2418_v43 }
0x17c9   :  { %v2724_v51 = vld [vmem:[#allocation3 + $0xa8] sm:$0xff] }
0x17ca   :  { %v2725_v52 = vpack.c.bf16 %v2724_v51, %v2724_v51 }
0x17cb   :  { %2002 = vmatpush.bf16.msra.mxu0 %v3589_v40  ;;  %2053 = vmatpush.bf16.msra.mxu1 %v3593_v37  ;;  %v2571_v40 = vld [vmem:[#allocation3 + $0x90] sm:$0xff]  ;;  %v2622_v37 = vld [vmem:[#allocation3 + $0x98] sm:$0xff] }
0x17cc   :  { %3493 = vmatmul.msk.bf16.vlgmr.msra.gmra.mxu3 %vm431_vm3, %v2725_v52  ;;  %v2572_v51 = vpack.c.bf16 %v2571_v40, %v2571_v40  ;;  %v2623_v52 = vpack.c.bf16 %v2622_v37, %v2622_v37 }
0x17cf   :  { %2003 = vmatpush.bf16.msra.mxu0 %v3588_v28  ;;  %2054 = vmatpush.bf16.msra.mxu1 %v3592_v48  ;;  %v323_v28 = vadd.f32 %v4044_v35, %v4051_v39  ;;  %v255_v48 = vadd.f32 %v4389_v50, %v4049_v38 }
0x17d2   :  { %3170 = vmatmul.msk.bf16.vlgmr.msrb.gmra.mxu0 %vm431_vm3, %v1756_v62  ;;  %3187 = vmatmul.msk.bf16.vlgmr.msrb.gmra.mxu1 %vm431_vm3, %v1807_v1 }
0x17d3   :  { %2204 = vmatpush.bf16.msrb.mxu0 %v3607_v58  ;;  %2255 = vmatpush.bf16.msrb.mxu1 %v3611_v60 }
0x17d7   :  { %2205 = vmatpush.bf16.msrb.mxu0 %v3606_v13  ;;  %2256 = vmatpush.bf16.msrb.mxu1 %v3610_v22 }
0x17db   :  { %2206 = vmatpush.bf16.msrb.mxu0 %v3605_v19  ;;  %2257 = vmatpush.bf16.msrb.mxu1 %v3609_v42 }
0x17df   :  { %2207 = vmatpush.bf16.msrb.mxu0 %v3604_v26  ;;  %2258 = vmatpush.bf16.msrb.mxu1 %v3608_v55 }
0x17e2   :  { %3238 = vmatmul.msk.bf16.vlgmr.msra.gmra.mxu0 %vm431_vm3, %v1960_v49  ;;  %3255 = vmatmul.msk.bf16.vlgmr.msra.gmra.mxu1 %vm431_vm3, %v2011_v4 }
0x17e3   :  { %2408 = vmatpush.bf16.msra.mxu0 %v3623_v41  ;;  %2459 = vmatpush.bf16.msra.mxu1 %v3627_v53 }
0x17e7   :  { %2409 = vmatpush.bf16.msra.mxu0 %v3622_v5  ;;  %2460 = vmatpush.bf16.msra.mxu1 %v3626_v6 }
0x17eb   :  { %2410 = vmatpush.bf16.msra.mxu0 %v3621_v7  ;;  %2461 = vmatpush.bf16.msra.mxu1 %v3625_v9 }
0x17ef   :  { %2411 = vmatpush.bf16.msra.mxu0 %v3620_v10  ;;  %2462 = vmatpush.bf16.msra.mxu1 %v3624_v14 }
0x17f2   :  { %3306 = vmatmul.msk.bf16.vlgmr.msrb.gmra.mxu0 %vm431_vm3, %v2164_v34  ;;  %3323 = vmatmul.msk.bf16.vlgmr.msrb.gmra.mxu1 %vm431_vm3, %v2215_v46 }
0x17f3   :  { %2612 = vmatpush.bf16.msrb.mxu0 %v3639_v18  ;;  %2663 = vmatpush.bf16.msrb.mxu1 %v3643_v20 }
0x17f7   :  { %2613 = vmatpush.bf16.msrb.mxu0 %v3638_v21  ;;  %2664 = vmatpush.bf16.msrb.mxu1 %v3642_v23 }
0x17fb   :  { %2614 = vmatpush.bf16.msrb.mxu0 %v3637_v29  ;;  %2665 = vmatpush.bf16.msrb.mxu1 %v3641_v25 }
0x17ff   :  { %2615 = vmatpush.bf16.msrb.mxu0 %v3636_v30  ;;  %2666 = vmatpush.bf16.msrb.mxu1 %v3640_v12 }
0x1802   :  { %3374 = vmatmul.msk.bf16.vlgmr.msra.gmra.mxu0 %vm431_vm3, %v2368_v11  ;;  %3391 = vmatmul.msk.bf16.vlgmr.msra.gmra.mxu1 %vm431_vm3, %v2419_v54 }
0x1812   :  { %3442 = vmatmul.msk.bf16.vlgmr.msrb.gmra.mxu0 %vm431_vm3, %v2572_v51  ;;  %3459 = vmatmul.msk.bf16.vlgmr.msrb.gmra.mxu1 %vm431_vm3, %v2623_v52  ;;  %v3654_v51 = vld [vmem:[#allocation4 + $0x2d0] sm:$0xff]  ;;  %v3653_v52 = vld [vmem:[#allocation4 + $0x2c8] sm:$0xff] }
0x183f   :  { %v1611_v56 = vpop.f32.mrf.mxu0  ;;  %v1624_v44 = vpop.f32.mrf.mxu1 }
0x1840   :  { %v1628_v58 = vadd.f32 %v1611_v56, %v255_v48  ;;  %v1629_v60 = vadd.f32 %v1624_v44, %v323_v28  ;;  %v3652_v28 = vld [vmem:[#allocation4 + $0x2c0] sm:$0xff] }
0x1842   :  { %3808 = vtanh.f32 %v1628_v58 }
0x1843   :  { %3810 = vtanh.f32 %v1629_v60 }
0x1847   :  { %v1613_v62 = vpop.f32.mrf.mxu0  ;;  %v1626_v1 = vpop.f32.mrf.mxu1 }
0x1848   :  { %v3809_v13 = vpop.eup %3808 }
0x1849   :  { %v3811_v22 = vpop.eup %3810  ;;  %v1632_v19 = vmul.f32 0.5, %v3809_v13 }
0x184a   :  { %v1633_v42 = vmul.f32 %v3811_v22, %v4058_v57 }
0x184b   :  { %v1634_v26 = vadd.f32 0.5, %v1632_v19  ;;  %v3850_v19 = vmov 4.0  }
0x184c   :  { %v1635_v55 = vadd.f32 %v1633_v42, %v4062_v61 }
0x184d   :  { %1636 = vrot.lane.b32.xlu2 %v1634_v26, %s3845_s22 }
0x184e   :  { %1638 = vrot.lane.b32.xlu0 %v1635_v55, %s3845_s22 }
0x184f   :  { %v1801_v35 = vpop.f32.mrf.mxu0  ;;  %v1852_v38 = vpop.f32.mrf.mxu1 }
0x1850   :  { %v1805_v39 = vadd.f32 %v1801_v35, %v4606_v59  ;;  %v2770_v50 = vpop.f32.mrf.mxu3 }
0x1852   :  { %v1856_v33 = vadd.f32 %v1852_v38, %v1805_v39 }
0x1854   :  { %v1907_v49 = vadd.f32 %v4608_v63, %v1856_v33 }
0x1856   :  { %v1958_v57 = vadd.f32 %v4610_v0, %v1907_v49 }
0x1857   :  { %v1803_v36 = vpop.f32.mrf.mxu0  ;;  %v1854_v41 = vpop.f32.mrf.mxu1 }
0x1858   :  { %v2772_v53 = vpop.f32.mrf.mxu3  ;;  %v3662_v36 = vld [vmem:[%s4722_s8 + $0x30] sm:$0xff] }
0x185f   :  { %v2005_v4 = vpop.f32.mrf.mxu0  ;;  %v2056_v5 = vpop.f32.mrf.mxu1 }
0x1860   :  { %v2009_v61 = vadd.f32 %v2005_v4, %v1958_v57  ;;  %v3661_v4 = vld [vmem:[%s4722_s8 + $0x28] sm:$0xff] }
0x1862   :  { %v2060_v6 = vadd.f32 %v2056_v5, %v2009_v61 }
0x1864   :  { %v2111_v10 = vadd.f32 %v4612_v2, %v2060_v6 }
0x1866   :  { %v2162_v14 = vadd.f32 %v4614_v8, %v2111_v10 }
0x1867   :  { %v2007_v7 = vpop.f32.mrf.mxu0  ;;  %v2058_v9 = vpop.f32.mrf.mxu1 }
0x1868   :  { %v3660_v7 = vld [vmem:[%s4722_s8 + $0x20] sm:$0xff] }
0x186f   :  { %v2209_v59 = vpop.f32.mrf.mxu0  ;;  %v2260_v15 = vpop.f32.mrf.mxu1 }
0x1870   :  { %v2213_v17 = vadd.f32 %v2209_v59, %v2162_v14  ;;  %v3659_v14 = vld [vmem:[%s4722_s8 + $0x18] sm:$0xff] }
0x1872   :  { %v2264_v18 = vadd.f32 %v2260_v15, %v2213_v17  ;;  %v3658_v17 = vld [vmem:[%s4722_s8 + $0x10] sm:$0xff] }
0x1874   :  { %v2315_v63 = vadd.f32 %v4616_v16, %v2264_v18 }
0x1876   :  { %v2366_v0 = vadd.f32 %v4618_v27, %v2315_v63  ;;  %v3655_v27 = vld [vmem:[#allocation4 + $0x2d8] sm:$0xff] }
0x1877   :  { %v2211_v20 = vpop.f32.mrf.mxu0  ;;  %v2262_v34 = vpop.f32.mrf.mxu1  ;;  %2816 = vmatpush.bf16.msra.mxu0 %v3655_v27 }
0x1878   :  { %v3657_v34 = vld [vmem:[%s4722_s8 + $0x8] sm:$0xff] }
0x187b   :  { %2817 = vmatpush.bf16.msra.mxu0 %v3654_v51 }
0x187f   :  { %v2413_v46 = vpop.f32.mrf.mxu0  ;;  %v2464_v21 = vpop.f32.mrf.mxu1  ;;  %2818 = vmatpush.bf16.msra.mxu0 %v3653_v52 }
0x1880   :  { %v2417_v23 = vadd.f32 %v2413_v46, %v2366_v0  ;;  %v3656_v46 = vld [vmem:[%s4722_s8] sm:$0xff] }
0x1882   :  { %v2468_v29 = vadd.f32 %v2464_v21, %v2417_v23 }
0x1883   :  { %2819 = vmatpush.bf16.msra.mxu0 %v3652_v28  ;;  %v3675_v28 = vld [vmem:[%s4723_s9] ss:$0 sm:$0xff] }
0x1884   :  { %v2519_v2 = vadd.f32 %v4620_v3, %v2468_v29 }
0x1886   :  { %v2570_v8 = vadd.f32 %v4622_v45, %v2519_v2 }
0x1887   :  { %v2415_v25 = vpop.f32.mrf.mxu0  ;;  %v2466_v30 = vpop.f32.mrf.mxu1 }
0x188f   :  { %v2617_v12 = vpop.f32.mrf.mxu0  ;;  %v2668_v31 = vpop.f32.mrf.mxu1 }
0x1890   :  { %v2621_v43 = vadd.f32 %v2617_v12, %v2570_v8 }
0x1892   :  { %v2672_v11 = vadd.f32 %v2668_v31, %v2621_v43 }
0x1894   :  { %v2723_v54 = vadd.f32 %v4624_v32, %v2672_v11  ;;  %v3673_v11 = vld [vmem:[%s4720_s6] ss:$0 sm:$0xff] }
0x1896   :  { %v2774_v40 = vadd.f32 %v2770_v50, %v2723_v54 }
0x1897   :  { %v2619_v16 = vpop.f32.mrf.mxu0  ;;  %v2670_v37 = vpop.f32.mrf.mxu1 }
0x1898   :  { %v3674_v16 = vld [vmem:[%s4721_s7] ss:$0 sm:$0xff] }
0x18a7   :  { %v1637_v3 = vpop.permute.xlu2 %1636 }
0x18c0   :  { %v1639_v48 = vpop.permute.xlu0 %1638 }
0x18c1   :  { %v1640_v45 = vsel %vm473_vm2, %v1637_v3, %v1639_v48  ;;  %v1641_v56 = vsel %vm473_vm2, %v1639_v48, %v1637_v3 }
0x18c2   :  { %v1642_v32 = vmul.f32 %v1640_v45, %v4631_v24  ;;  %v1643_v44 = vmul.f32 %v1641_v56, %v1634_v26  ;;  %v3663_v26 = vld [vmem:[%s4722_s8 + $0x38] sm:$0xff] }
0x18c3   :  { %2945 = vmatpush.bf16.msra.mxu1 %v3663_v26 }
0x18c4   :  { %v1644_v58 = vadd.f32 %v1643_v44, %v1642_v32 }
0x18c6   :  { %3812 = vtanh.f32 %v1644_v58 }
0x18c7   :  { %3814 = vrcp.f32 %v3850_v19  ;;  %2946 = vmatpush.bf16.msra.mxu1 %v3662_v36 }
0x18cb   :  { %2947 = vmatpush.bf16.msra.mxu1 %v3661_v4 }
0x18cc   :  { %v3813_v60 = vpop.eup %3812 }
0x18cd   :  { %v1646_v62 = vmul.f32 %v3813_v60, %v1635_v55  ;;  %v3815_v42 = vpop.eup %3814 }
0x18ce   :  { %v2835_v35 = vmul.f32 4.0, %v3815_v42  ;;  %vm2839_vm5 = vweird.f32 %v3815_v42 }
0x18cf   :  { %v1647_v1 = vmax.f32 %v1646_v62, 0.0  ;;  %2948 = vmatpush.bf16.msra.mxu1 %v3660_v7 }
0x18d0   :  { %v2836_v24 = vsub.f32 1.0, %v2835_v35 }
0x18d1   :  { %1648 = vst.msk [vmem:[#allocation3 + $0xb0] sm:$0xff] %vm431_vm3, %v1647_v1 }
0x18d2   :  { %v2837_v50 = vmul.f32 %v3815_v42, %v2836_v24 }
0x18d3   :  { %2949 = vmatpush.bf16.msra.mxu1 %v3659_v14 }
0x18d4   :  { %v2838_v49 = vadd.f32 %v3815_v42, %v2837_v50 }
0x18d6   :  { %v2840_v61 = vsel %vm2839_vm5, %v3815_v42, %v2838_v49 }
0x18d7   :  { %2950 = vmatpush.bf16.msra.mxu1 %v3658_v17 }
0x18d8   :  { %v2775_v13 = vld [vmem:[#allocation3 + $0xb0] sm:$0xff] }
0x18d9   :  { %v2776_v22 = vpack.c.bf16 %v2775_v13, %v2775_v13 }
0x18db   :  { %3510 = vmatmul.msk.bf16.vlgmr.msra.gmra.mxu0 %vm431_vm3, %v2776_v22  ;;  %2951 = vmatpush.bf16.msra.mxu1 %v3657_v34 }
0x18df   :  { %2952 = vmatpush.bf16.msra.mxu1 %v3656_v46 }
0x1958   :  { %v2821_v47 = vpop.f32.mrf.mxu0 }
0x1959   :  { %v2825_v38 = vadd.f32 %v2821_v47, %v2774_v40 }
0x195b   :  { %v2827_v55 = vsel %vm2826_vm4, %v2825_v38, 0.0 }
0x195c   :  { %v2828_v39 = vrot.slane %v2827_v55, 4 }
0x195e   :  { %v2829_v33 = vadd.f32 %v2828_v39, %v2827_v55 }
0x1960   :  { %v2830_v41 = vrot.slane %v2829_v33, 2  ;;  %v2823_v53 = vpop.f32.mrf.mxu0 }
0x1962   :  { %v2831_v57 = vadd.f32 %v2830_v41, %v2829_v33 }
0x1964   :  { %v2832_v5 = vrot.slane %v2831_v57, 1 }
0x1966   :  { %v2833_v6 = vadd.f32 %v2832_v5, %v2831_v57 }
0x1968   :  { %v2841_v9 = vmul.f32 %v2840_v61, %v2833_v6 }
0x196a   :  { %v2842_v10 = vsub.f32 %v2825_v38, %v2841_v9 }
0x196c   :  { %v2843_v59 = vmul.f32 %v2842_v10, %v2842_v10 }
0x196e   :  { %v2844_v15 = vsel %vm2826_vm4, %v2843_v59, 0.0 }
0x196f   :  { %v2845_v18 = vrot.slane %v2844_v15, 4 }
0x1971   :  { %v2846_v20 = vadd.f32 %v2845_v18, %v2844_v15 }
0x1973   :  { %v2847_v63 = vrot.slane %v2846_v20, 2 }
0x1975   :  { %v2848_v0 = vadd.f32 %v2847_v63, %v2846_v20 }
0x1977   :  { %v2849_v21 = vrot.slane %v2848_v0, 1 }
0x1979   :  { %v2850_v23 = vadd.f32 %v2849_v21, %v2848_v0 }
0x197b   :  { %v2851_v29 = vmul.f32 %v2850_v23, %v2840_v61 }
0x197d   :  { %v2852_v25 = vadd.f32 1e-05, %v2851_v29 }
0x197f   :  { %3816 = vrsqrt.f32 %v2852_v25  ;;  %vm2859_vm7 = vweird.f32 %v2852_v25 }
0x1985   :  { %v3817_v30 = vpop.eup %3816 }
0x1986   :  { %v2854_v2 = vmul.f32 %v3817_v30, %v2852_v25  ;;  %vm2860_vm6 = vweird.f32 %v3817_v30 }
0x1987   :  { %vm2861_vm8 = vmor %vm2859_vm7, %vm2860_vm6 }
0x1988   :  { %v2855_v8 = vmul.f32 %v3817_v30, %v2854_v2 }
0x198a   :  { %v2856_v12 = vmul.f32 0.5, %v2855_v8 }
0x198c   :  { %v2857_v31 = vsub.f32 1.5, %v2856_v12 }
0x198e   :  { %v2858_v43 = vmul.f32 %v3817_v30, %v2857_v31 }
0x1990   :  { %v2862_v54 = vsel %vm2861_vm8, %v3817_v30, %v2858_v43 }
0x1991   :  { %v2863_v40 = vmul.f32 %v2862_v54, %v2842_v10 }
0x1993   :  { %v2868_v37 = vmul.f32 %v3673_v11, %v2863_v40 }
0x1995   :  { %v2873_v27 = vadd.f32 %v3674_v16, %v2868_v37 }
0x1997   :  { %v2874_v51 = vmax.f32 %v2873_v27, 0.0 }
0x1999   :  { %2875 = vst [vmem:[%s4725_s11] sm:$0xff] %v2874_v51  ;;  %v2876_v52 = vpack.c.bf16 %v2874_v51, %v2874_v51 }
0x199b   :  { %2953 = vmatmul.bf16.vlgmr.msra.gmra.mxu1 %v2876_v52 }
0x1a18   :  { %v2954_v3 = vpop.f32.mrf.mxu1 }
0x1a19   :  { %v2955_v48 = vadd.f32 %v3675_v28, %v2954_v3 }
0x1a1b   :  { %2958 = vst [vmem:[%s4724_s10] sm:$0xff] %v2955_v48 }
0x1a20   :  { %v2956_v45 = vpop.f32.mrf.mxu1 }
0x1a21   :  { %2967 = vsyncpa [#allocation5], 1 }

</bundles_post_ra>
